<compile_context>
chip_gen: v6e
topology: v6e:2x2x1
jax: 0.10.0
libtpu: 0.0.40
codegen_flags: <defaults>
</compile_context>

<pallas_src>
import functools

import jax
import jax.numpy as jnp
from jax.experimental import pallas as pl
from jax.experimental.pallas import tpu as pltpu


# ----------------------------------------------------------------------------
# Fused Pallas kernel: gathers + folded layer-0 projection + 3-layer LSTM
# ----------------------------------------------------------------------------
def _pitg_lstm_kernel(x_ids_ref, seed1_ref, seed2_ref, proj0_ref,
                      wihn_ref, whh_ref, biasn_ref,
                      h0a_ref, h0b_ref, c0a_ref, c0b_ref,
                      hn_ref, cn_ref, proj_a, proj_b):
    # x_ids_ref : SMEM (B, S) int32   token ids
    # seed1_ref : SMEM (B,)   int32   EntityEncoder-1 ids
    # seed2_ref : SMEM (B,)   int32   EntityEncoder-2 ids
    # proj0_ref : VMEM (V_in, 1, 4H)  f32   emb@W0 + b0 (layer-0 proj table)
    # wihn_ref  : VMEM (L-1, H, 4H)   bf16  W_ih^T for layers 1..L-1
    # whh_ref   : VMEM (L,   H, 4H)   bf16  W_hh^T per layer
    # biasn_ref : VMEM (L-1, 1, 4H)   f32   b_ih + b_hh for layers 1..L-1
    # h0a/h0b   : VMEM (V1/V2, L, H)  f32   lane-padded seed tables -> h_0
    # c0a/c0b   : VMEM (V1/V2, L, H)  f32   lane-padded seed tables -> c_0
    # hn_ref    : VMEM (L, B, H)      f32   output h_n
    # cn_ref    : VMEM (L, B, H)      f32   output c_n
    # proj_a/b  : VMEM (S, B, 4H)     f32   ping-pong input-projection buffers
    B, S = x_ids_ref.shape
    L, H, _ = whh_ref.shape

    # ---- layer-0 input projections: pure gather of the folded table --------
    for t in range(S):
        rows = [proj0_ref[x_ids_ref[b, t]] for b in range(B)]    # each (1, 4H)
        proj_a[t] = jnp.concatenate(rows, axis=0)                # aligned (B, 4H)

    bufs = (proj_a, proj_b)

    for l in range(L):                                           # static layer loop
        # ---- initial (h, c): replicates torch's embedding(x).view(L,-1,H) ----
        rows_h, rows_c = [], []
        for b in range(B):
            n = l * B + b
            si, sl = n // L, n % L                               # static ints
            v1 = seed1_ref[si]
            v2 = seed2_ref[si]
            rows_h.append(h0a_ref[v1][sl:sl + 1, :] + h0b_ref[v2][sl:sl + 1, :])
            rows_c.append(c0a_ref[v1][sl:sl + 1, :] + c0b_ref[v2][sl:sl + 1, :])
        h = jnp.concatenate(rows_h, axis=0)                      # (B, H) f32
        c = jnp.concatenate(rows_c, axis=0)                      # (B, H) f32

        read_buf = bufs[l % 2]
        write_buf = bufs[1 - (l % 2)]
        last_layer = (l == L - 1)

        w_hh = whh_ref[l]                                        # (H, 4H) bf16
        if not last_layer:
            w_ihn = wihn_ref[l]                                  # (H, 4H) bf16
            b_n = biasn_ref[l]                                   # (1, 4H) f32

        hb = h.astype(jnp.bfloat16)                              # MXU operand

        # ---- serial recurrence, fully unrolled (S static & small) ----------
        # PyTorch gate order: i, f, g, o
        for t in range(S):
            gates = read_buf[t] + jnp.dot(hb, w_hh,
                                          preferred_element_type=jnp.float32)
            sg = jax.nn.sigmoid(gates)        # one full-width EUP pass
            th = jnp.tanh(gates)              # one full-width EUP pass
            i_g = sg[:, 0:H]
            f_g = sg[:, H:2 * H]
            g_g = th[:, 2 * H:3 * H]
            o_g = sg[:, 3 * H:4 * H]
            c = f_g * c + i_g * g_g           # cell state kept in f32
            h = o_g * jnp.tanh(c)
            hb = h.astype(jnp.bfloat16)
            if not last_layer:
                # Next layer's input projection, accumulated immediately:
                # this MXU push + aligned store is OFF this layer's critical
                # chain and replaces the old seq_scr + inter-layer matmul.
                write_buf[t] = b_n + jnp.dot(hb, w_ihn,
                                             preferred_element_type=jnp.float32)

        hn_ref[l] = h
        cn_ref[l] = c
        # TODO(synk): nn.LSTM inter-layer dropout (p=0.3) is stochastic and
        # training-only; eval-mode semantics (no dropout) are implemented.


def pitg_lstm_pallas(x_ids, seed1, seed2, kp):
    B, S = x_ids.shape
    L, H, H4 = kp["whh"].shape
    vmem = pl.BlockSpec(memory_space=pltpu.MemorySpace.VMEM)
    smem = pl.BlockSpec(memory_space=pltpu.MemorySpace.SMEM)
    return pl.pallas_call(
        _pitg_lstm_kernel,
        out_shape=(jax.ShapeDtypeStruct((L, B, H), jnp.float32),
                   jax.ShapeDtypeStruct((L, B, H), jnp.float32)),
        in_specs=[smem, smem, smem] + [vmem] * 8,
        out_specs=(vmem, vmem),
        scratch_shapes=[pltpu.VMEM((S, B, H4), jnp.float32),     # proj ping
                        pltpu.VMEM((S, B, H4), jnp.float32)],    # proj pong
    )(x_ids, seed1, seed2, kp["proj0"], kp["wihn"], kp["whh"], kp["biasn"],
      kp["h0a"], kp["h0b"], kp["c0a"], kp["c0b"])


@jax.jit
def pitg_encoder_forward(kp, x_input, seed1, seed2):
    # Entire forward is the single pallas_call; no host-side glue ops.
    return pitg_lstm_pallas(x_input, seed1, seed2, kp)


# ----------------------------------------------------------------------------
# Parameter init (deterministic, synthetic) — mirrors the PyTorch shapes
# ----------------------------------------------------------------------------
def init_params(key, input_size, e1_vocab, e2_vocab, hidden, num_layers,
                embed, h1, h2):
    ks = jax.random.split(key, 7 + num_layers)
    s = 0.1
    p = {}
    p["e1_emb1"] = jax.random.normal(ks[0], (e1_vocab, h1 * num_layers), jnp.float32) * s
    p["e1_emb2"] = jax.random.normal(ks[1], (e1_vocab, h1 * num_layers), jnp.float32) * s
    p["e2_emb1"] = jax.random.normal(ks[2], (e2_vocab, h2 * num_layers), jnp.float32) * s
    p["e2_emb2"] = jax.random.normal(ks[3], (e2_vocab, h2 * num_layers), jnp.float32) * s
    p["emb"] = jax.random.normal(ks[4], (input_size, embed), jnp.float32) * s
    p["W_fc"] = jax.random.normal(ks[5], (hidden, embed), jnp.float32) * s   # torch (out,in)
    p["b_fc"] = jax.random.normal(ks[6], (hidden,), jnp.float32) * s
    W_ih, W_hh, b_ih, b_hh = [], [], [], []
    for l in range(num_layers):
        kk = jax.random.split(ks[7 + l], 4)
        W_ih.append(jax.random.normal(kk[0], (4 * hidden, hidden), jnp.float32) * s)
        W_hh.append(jax.random.normal(kk[1], (4 * hidden, hidden), jnp.float32) * s)
        b_ih.append(jax.random.normal(kk[2], (4 * hidden,), jnp.float32) * s)
        b_hh.append(jax.random.normal(kk[3], (4 * hidden,), jnp.float32) * s)
    p["W_ih"] = jnp.stack(W_ih)
    p["W_hh"] = jnp.stack(W_hh)
    p["b_ih"] = jnp.stack(b_ih)
    p["b_hh"] = jnp.stack(b_hh)
    return p


def prepare_kernel_params(p, num_layers, h1, h2):
    """One-time weight massaging: transposes, bias sums, embedding/input_fc fold,
    bf16 MXU operands, lane-padded seed tables.  Nothing here runs per call."""
    L = num_layers
    H = p["W_hh"].shape[-1] // 4 * 4 // 4  # = hidden
    H = p["W_hh"].shape[-1]                # hidden (W_hh is (L, 4H, H))
    W_fc_t = p["W_fc"].T                                 # (E, H)
    W_ih_t = jnp.transpose(p["W_ih"], (0, 2, 1))         # (L, H, 4H)
    W_hh_t = jnp.transpose(p["W_hh"], (0, 2, 1))         # (L, H, 4H)

    # Fold input_fc AND the token embedding into a layer-0 projection table:
    #   (emb[tok] @ Wfc^T + b_fc) @ Wih0^T + b_ih0 + b_hh0
    # = emb[tok] @ (Wfc^T @ Wih0^T) + (b_fc @ Wih0^T + b_ih0 + b_hh0)
    W0 = W_fc_t @ W_ih_t[0]                                            # (E, 4H)
    b0 = p["b_fc"] @ W_ih_t[0] + p["b_ih"][0] + p["b_hh"][0]           # (4H,)
    proj0 = (p["emb"] @ W0 + b0)[:, None, :].astype(jnp.float32)       # (V_in,1,4H)

    # MXU operands in bf16 (f32 accumulate in-kernel); biases stay f32.
    wihn = W_ih_t[1:].astype(jnp.bfloat16)                             # (L-1,H,4H)
    whh = W_hh_t.astype(jnp.bfloat16)                                  # (L,  H,4H)
    biasn = (p["b_ih"] + p["b_hh"])[1:][:, None, :].astype(jnp.float32)

    # EntityEncoder seed tables, lane-padded so one (l,b) row of h_0/c_0 is a
    # single add of two gathered rows (replicates torch .view(L,-1,h) + cat).
    V1 = p["e1_emb1"].shape[0]
    V2 = p["e2_emb1"].shape[0]

    def pad1(t):   # (V1, L*h1) -> (V1, L, H), cols [0:h1]
        return jnp.zeros((V1, L, H), jnp.float32).at[:, :, :h1].set(
            t.reshape(V1, L, h1))

    def pad2(t):   # (V2, L*h2) -> (V2, L, H), cols [h1:H]
        return jnp.zeros((V2, L, H), jnp.float32).at[:, :, h1:].set(
            t.reshape(V2, L, h2))

    return {"proj0": proj0, "wihn": wihn, "whh": whh, "biasn": biasn,
            "h0a": pad1(p["e1_emb1"]), "h0b": pad2(p["e2_emb1"]),
            "c0a": pad1(p["e1_emb2"]), "c0b": pad2(p["e2_emb2"])}


# ----------------------------------------------------------------------------
# Pure-JAX reference (mirrors the PyTorch math) for a correctness self-check
# ----------------------------------------------------------------------------
def pitg_encoder_ref(p, x_input, seed1, seed2, num_layers, h1, h2):
    L = num_layers
    hc1 = p["e1_emb1"][seed1].reshape(L, -1, h1)
    hx1 = p["e1_emb2"][seed1].reshape(L, -1, h1)
    hc2 = p["e2_emb1"][seed2].reshape(L, -1, h2)
    hx2 = p["e2_emb2"][seed2].reshape(L, -1, h2)
    h0 = jnp.concatenate([hc1, hc2], axis=2)
    c0 = jnp.concatenate([hx1, hx2], axis=2)
    x = p["emb"][x_input] @ p["W_fc"].T + p["b_fc"]          # (B, S, H)
    B, S, H = x.shape
    layer_in = x
    hs, cs = [], []
    for l in range(num_layers):
        h, c = h0[l], c0[l]
        outs = []
        for t in range(S):
            gates = (layer_in[:, t, :] @ p["W_ih"][l].T + p["b_ih"][l]
                     + h @ p["W_hh"][l].T + p["b_hh"][l])
            i = jax.nn.sigmoid(gates[:, 0:H])
            f = jax.nn.sigmoid(gates[:, H:2 * H])
            g = jnp.tanh(gates[:, 2 * H:3 * H])
            o = jax.nn.sigmoid(gates[:, 3 * H:4 * H])
            c = f * c + i * g
            h = o * jnp.tanh(c)
            outs.append(h)
        layer_in = jnp.stack(outs, axis=1)
        hs.append(h)
        cs.append(c)
    return jnp.stack(hs), jnp.stack(cs)


if __name__ == "__main__":
    # Small shapes consistent with the module
    B, S = 2, 8
    input_size, e1_vocab, e2_vocab = 20, 10, 12
    hidden, num_layers, embed = 32, 3, 32
    # ratio '1:1'
    h1 = int(hidden * 1.0 / 2.0)
    h2 = hidden - h1

    key = jax.random.PRNGKey(0)
    kparam, kx, k1, k2 = jax.random.split(key, 4)
    params = init_params(kparam, input_size, e1_vocab, e2_vocab, hidden,
                         num_layers, embed, h1, h2)
    kernel_params = prepare_kernel_params(params, num_layers, h1, h2)

    x_input = jax.random.randint(kx, (B, S), 0, input_size, dtype=jnp.int32)
    seed1 = jax.random.randint(k1, (B,), 0, e1_vocab, dtype=jnp.int32)
    seed2 = jax.random.randint(k2, (B,), 0, e2_vocab, dtype=jnp.int32)

    hn, cn = pitg_encoder_forward(kernel_params, x_input, seed1, seed2)
    jax.block_until_ready((hn, cn))

    hn_ref, cn_ref = pitg_encoder_ref(params, x_input, seed1, seed2,
                                      num_layers, h1, h2)
    assert hn.shape == (num_layers, B, hidden) and cn.shape == (num_layers, B, hidden)
    # bf16 MXU operands in an 8-step recurrence -> loosened tolerance.
    assert jnp.allclose(hn, hn_ref, atol=2e-2, rtol=2e-2)
    assert jnp.allclose(cn, cn_ref, atol=2e-2, rtol=2e-2)
    print("KERNEL_OK")
</pallas_src>

<mosaic_0001>
module attributes {stable_mosaic.version = 11 : i64} {
  func.func @_pitg_lstm_kernel(%arg0: memref<2x8xi32, #tpu.memory_space<smem>>, %arg1: memref<2xi32, #tpu.memory_space<smem>>, %arg2: memref<2xi32, #tpu.memory_space<smem>>, %arg3: memref<20x1x128xf32, #tpu.memory_space<vmem>>, %arg4: memref<2x32x128xbf16, #tpu.memory_space<vmem>>, %arg5: memref<3x32x128xbf16, #tpu.memory_space<vmem>>, %arg6: memref<2x1x128xf32, #tpu.memory_space<vmem>>, %arg7: memref<10x3x32xf32, #tpu.memory_space<vmem>>, %arg8: memref<12x3x32xf32, #tpu.memory_space<vmem>>, %arg9: memref<10x3x32xf32, #tpu.memory_space<vmem>>, %arg10: memref<12x3x32xf32, #tpu.memory_space<vmem>>, %arg11: memref<3x2x32xf32, #tpu.memory_space<vmem>>, %arg12: memref<3x2x32xf32, #tpu.memory_space<vmem>>, %arg13: memref<8x2x128xf32, #tpu.memory_space<vmem>>, %arg14: memref<8x2x128xf32, #tpu.memory_space<vmem>>) attributes {dimension_semantics = [], scalar_prefetch = 0 : i64, scratch_operands = 2 : i64, tpu.core_type = #tpu.core_type<tc>} {
    %c0 = arith.constant 0 : index
    %c0_0 = arith.constant 0 : index
    %0 = memref.load %arg0[%c0, %c0_0] : memref<2x8xi32, #tpu.memory_space<smem>>
    %1 = arith.index_cast %0 : i32 to index
    %c0_1 = arith.constant 0 : index
    %c0_2 = arith.constant 0 : index
    %2 = vector.load %arg3[%1, %c0_1, %c0_2] : memref<20x1x128xf32, #tpu.memory_space<vmem>>, vector<1x1x128xf32>
    %3 = vector.shape_cast %2 : vector<1x1x128xf32> to vector<1x128xf32>
    %c1 = arith.constant 1 : index
    %c0_3 = arith.constant 0 : index
    %4 = memref.load %arg0[%c1, %c0_3] : memref<2x8xi32, #tpu.memory_space<smem>>
    %5 = arith.index_cast %4 : i32 to index
    %c0_4 = arith.constant 0 : index
    %c0_5 = arith.constant 0 : index
    %6 = vector.load %arg3[%5, %c0_4, %c0_5] : memref<20x1x128xf32, #tpu.memory_space<vmem>>, vector<1x1x128xf32>
    %7 = vector.shape_cast %6 : vector<1x1x128xf32> to vector<1x128xf32>
    %8 = tpu.concatenate %3, %7 in 0 : vector<1x128xf32>, vector<1x128xf32> -> vector<2x128xf32>
    %c0_6 = arith.constant 0 : index
    %c0_7 = arith.constant 0 : index
    %c0_8 = arith.constant 0 : index
    %9 = vector.load %arg13[%c0_6, %c0_7, %c0_8] : memref<8x2x128xf32, #tpu.memory_space<vmem>>, vector<1x2x128xf32>
    %10 = vector.shape_cast %9 : vector<1x2x128xf32> to vector<2x128xf32>
    %11 = vector.shape_cast %8 : vector<2x128xf32> to vector<1x2x128xf32>
    tpu.vector_store %arg13[%c0_6, %c0_7, %c0_8], %11 {strides = array<i32>} : memref<8x2x128xf32, #tpu.memory_space<vmem>>, vector<1x2x128xf32>,
    %c0_9 = arith.constant 0 : index
    %c1_10 = arith.constant 1 : index
    %12 = memref.load %arg0[%c0_9, %c1_10] : memref<2x8xi32, #tpu.memory_space<smem>>
    %13 = arith.index_cast %12 : i32 to index
    %c0_11 = arith.constant 0 : index
    %c0_12 = arith.constant 0 : index
    %14 = vector.load %arg3[%13, %c0_11, %c0_12] : memref<20x1x128xf32, #tpu.memory_space<vmem>>, vector<1x1x128xf32>
    %15 = vector.shape_cast %14 : vector<1x1x128xf32> to vector<1x128xf32>
    %c1_13 = arith.constant 1 : index
    %c1_14 = arith.constant 1 : index
    %16 = memref.load %arg0[%c1_13, %c1_14] : memref<2x8xi32, #tpu.memory_space<smem>>
    %17 = arith.index_cast %16 : i32 to index
    %c0_15 = arith.constant 0 : index
    %c0_16 = arith.constant 0 : index
    %18 = vector.load %arg3[%17, %c0_15, %c0_16] : memref<20x1x128xf32, #tpu.memory_space<vmem>>, vector<1x1x128xf32>
    %19 = vector.shape_cast %18 : vector<1x1x128xf32> to vector<1x128xf32>
    %20 = tpu.concatenate %15, %19 in 0 : vector<1x128xf32>, vector<1x128xf32> -> vector<2x128xf32>
    %c1_17 = arith.constant 1 : index
    %c0_18 = arith.constant 0 : index
    %c0_19 = arith.constant 0 : index
    %21 = vector.load %arg13[%c1_17, %c0_18, %c0_19] : memref<8x2x128xf32, #tpu.memory_space<vmem>>, vector<1x2x128xf32>
    %22 = vector.shape_cast %21 : vector<1x2x128xf32> to vector<2x128xf32>
    %23 = vector.shape_cast %20 : vector<2x128xf32> to vector<1x2x128xf32>
    tpu.vector_store %arg13[%c1_17, %c0_18, %c0_19], %23 {strides = array<i32>} : memref<8x2x128xf32, #tpu.memory_space<vmem>>, vector<1x2x128xf32>,
    %c0_20 = arith.constant 0 : index
    %c2 = arith.constant 2 : index
    %24 = memref.load %arg0[%c0_20, %c2] : memref<2x8xi32, #tpu.memory_space<smem>>
    %25 = arith.index_cast %24 : i32 to index
    %c0_21 = arith.constant 0 : index
    %c0_22 = arith.constant 0 : index
    %26 = vector.load %arg3[%25, %c0_21, %c0_22] : memref<20x1x128xf32, #tpu.memory_space<vmem>>, vector<1x1x128xf32>
    %27 = vector.shape_cast %26 : vector<1x1x128xf32> to vector<1x128xf32>
    %c1_23 = arith.constant 1 : index
    %c2_24 = arith.constant 2 : index
    %28 = memref.load %arg0[%c1_23, %c2_24] : memref<2x8xi32, #tpu.memory_space<smem>>
    %29 = arith.index_cast %28 : i32 to index
    %c0_25 = arith.constant 0 : index
    %c0_26 = arith.constant 0 : index
    %30 = vector.load %arg3[%29, %c0_25, %c0_26] : memref<20x1x128xf32, #tpu.memory_space<vmem>>, vector<1x1x128xf32>
    %31 = vector.shape_cast %30 : vector<1x1x128xf32> to vector<1x128xf32>
    %32 = tpu.concatenate %27, %31 in 0 : vector<1x128xf32>, vector<1x128xf32> -> vector<2x128xf32>
    %c2_27 = arith.constant 2 : index
    %c0_28 = arith.constant 0 : index
    %c0_29 = arith.constant 0 : index
    %33 = vector.load %arg13[%c2_27, %c0_28, %c0_29] : memref<8x2x128xf32, #tpu.memory_space<vmem>>, vector<1x2x128xf32>
    %34 = vector.shape_cast %33 : vector<1x2x128xf32> to vector<2x128xf32>
    %35 = vector.shape_cast %32 : vector<2x128xf32> to vector<1x2x128xf32>
    tpu.vector_store %arg13[%c2_27, %c0_28, %c0_29], %35 {strides = array<i32>} : memref<8x2x128xf32, #tpu.memory_space<vmem>>, vector<1x2x128xf32>,
    %c0_30 = arith.constant 0 : index
    %c3 = arith.constant 3 : index
    %36 = memref.load %arg0[%c0_30, %c3] : memref<2x8xi32, #tpu.memory_space<smem>>
    %37 = arith.index_cast %36 : i32 to index
    %c0_31 = arith.constant 0 : index
    %c0_32 = arith.constant 0 : index
    %38 = vector.load %arg3[%37, %c0_31, %c0_32] : memref<20x1x128xf32, #tpu.memory_space<vmem>>, vector<1x1x128xf32>
    %39 = vector.shape_cast %38 : vector<1x1x128xf32> to vector<1x128xf32>
    %c1_33 = arith.constant 1 : index
    %c3_34 = arith.constant 3 : index
    %40 = memref.load %arg0[%c1_33, %c3_34] : memref<2x8xi32, #tpu.memory_space<smem>>
    %41 = arith.index_cast %40 : i32 to index
    %c0_35 = arith.constant 0 : index
    %c0_36 = arith.constant 0 : index
    %42 = vector.load %arg3[%41, %c0_35, %c0_36] : memref<20x1x128xf32, #tpu.memory_space<vmem>>, vector<1x1x128xf32>
    %43 = vector.shape_cast %42 : vector<1x1x128xf32> to vector<1x128xf32>
    %44 = tpu.concatenate %39, %43 in 0 : vector<1x128xf32>, vector<1x128xf32> -> vector<2x128xf32>
    %c3_37 = arith.constant 3 : index
    %c0_38 = arith.constant 0 : index
    %c0_39 = arith.constant 0 : index
    %45 = vector.load %arg13[%c3_37, %c0_38, %c0_39] : memref<8x2x128xf32, #tpu.memory_space<vmem>>, vector<1x2x128xf32>
    %46 = vector.shape_cast %45 : vector<1x2x128xf32> to vector<2x128xf32>
    %47 = vector.shape_cast %44 : vector<2x128xf32> to vector<1x2x128xf32>
    tpu.vector_store %arg13[%c3_37, %c0_38, %c0_39], %47 {strides = array<i32>} : memref<8x2x128xf32, #tpu.memory_space<vmem>>, vector<1x2x128xf32>,
    %c0_40 = arith.constant 0 : index
    %c4 = arith.constant 4 : index
    %48 = memref.load %arg0[%c0_40, %c4] : memref<2x8xi32, #tpu.memory_space<smem>>
    %49 = arith.index_cast %48 : i32 to index
    %c0_41 = arith.constant 0 : index
    %c0_42 = arith.constant 0 : index
    %50 = vector.load %arg3[%49, %c0_41, %c0_42] : memref<20x1x128xf32, #tpu.memory_space<vmem>>, vector<1x1x128xf32>
    %51 = vector.shape_cast %50 : vector<1x1x128xf32> to vector<1x128xf32>
    %c1_43 = arith.constant 1 : index
    %c4_44 = arith.constant 4 : index
    %52 = memref.load %arg0[%c1_43, %c4_44] : memref<2x8xi32, #tpu.memory_space<smem>>
    %53 = arith.index_cast %52 : i32 to index
    %c0_45 = arith.constant 0 : index
    %c0_46 = arith.constant 0 : index
    %54 = vector.load %arg3[%53, %c0_45, %c0_46] : memref<20x1x128xf32, #tpu.memory_space<vmem>>, vector<1x1x128xf32>
    %55 = vector.shape_cast %54 : vector<1x1x128xf32> to vector<1x128xf32>
    %56 = tpu.concatenate %51, %55 in 0 : vector<1x128xf32>, vector<1x128xf32> -> vector<2x128xf32>
    %c4_47 = arith.constant 4 : index
    %c0_48 = arith.constant 0 : index
    %c0_49 = arith.constant 0 : index
    %57 = vector.load %arg13[%c4_47, %c0_48, %c0_49] : memref<8x2x128xf32, #tpu.memory_space<vmem>>, vector<1x2x128xf32>
    %58 = vector.shape_cast %57 : vector<1x2x128xf32> to vector<2x128xf32>
    %59 = vector.shape_cast %56 : vector<2x128xf32> to vector<1x2x128xf32>
    tpu.vector_store %arg13[%c4_47, %c0_48, %c0_49], %59 {strides = array<i32>} : memref<8x2x128xf32, #tpu.memory_space<vmem>>, vector<1x2x128xf32>,
    %c0_50 = arith.constant 0 : index
    %c5 = arith.constant 5 : index
    %60 = memref.load %arg0[%c0_50, %c5] : memref<2x8xi32, #tpu.memory_space<smem>>
    %61 = arith.index_cast %60 : i32 to index
    %c0_51 = arith.constant 0 : index
    %c0_52 = arith.constant 0 : index
    %62 = vector.load %arg3[%61, %c0_51, %c0_52] : memref<20x1x128xf32, #tpu.memory_space<vmem>>, vector<1x1x128xf32>
    %63 = vector.shape_cast %62 : vector<1x1x128xf32> to vector<1x128xf32>
    %c1_53 = arith.constant 1 : index
    %c5_54 = arith.constant 5 : index
    %64 = memref.load %arg0[%c1_53, %c5_54] : memref<2x8xi32, #tpu.memory_space<smem>>
    %65 = arith.index_cast %64 : i32 to index
    %c0_55 = arith.constant 0 : index
    %c0_56 = arith.constant 0 : index
    %66 = vector.load %arg3[%65, %c0_55, %c0_56] : memref<20x1x128xf32, #tpu.memory_space<vmem>>, vector<1x1x128xf32>
    %67 = vector.shape_cast %66 : vector<1x1x128xf32> to vector<1x128xf32>
    %68 = tpu.concatenate %63, %67 in 0 : vector<1x128xf32>, vector<1x128xf32> -> vector<2x128xf32>
    %c5_57 = arith.constant 5 : index
    %c0_58 = arith.constant 0 : index
    %c0_59 = arith.constant 0 : index
    %69 = vector.load %arg13[%c5_57, %c0_58, %c0_59] : memref<8x2x128xf32, #tpu.memory_space<vmem>>, vector<1x2x128xf32>
    %70 = vector.shape_cast %69 : vector<1x2x128xf32> to vector<2x128xf32>
    %71 = vector.shape_cast %68 : vector<2x128xf32> to vector<1x2x128xf32>
    tpu.vector_store %arg13[%c5_57, %c0_58, %c0_59], %71 {strides = array<i32>} : memref<8x2x128xf32, #tpu.memory_space<vmem>>, vector<1x2x128xf32>,
    %c0_60 = arith.constant 0 : index
    %c6 = arith.constant 6 : index
    %72 = memref.load %arg0[%c0_60, %c6] : memref<2x8xi32, #tpu.memory_space<smem>>
    %73 = arith.index_cast %72 : i32 to index
    %c0_61 = arith.constant 0 : index
    %c0_62 = arith.constant 0 : index
    %74 = vector.load %arg3[%73, %c0_61, %c0_62] : memref<20x1x128xf32, #tpu.memory_space<vmem>>, vector<1x1x128xf32>
    %75 = vector.shape_cast %74 : vector<1x1x128xf32> to vector<1x128xf32>
    %c1_63 = arith.constant 1 : index
    %c6_64 = arith.constant 6 : index
    %76 = memref.load %arg0[%c1_63, %c6_64] : memref<2x8xi32, #tpu.memory_space<smem>>
    %77 = arith.index_cast %76 : i32 to index
    %c0_65 = arith.constant 0 : index
    %c0_66 = arith.constant 0 : index
    %78 = vector.load %arg3[%77, %c0_65, %c0_66] : memref<20x1x128xf32, #tpu.memory_space<vmem>>, vector<1x1x128xf32>
    %79 = vector.shape_cast %78 : vector<1x1x128xf32> to vector<1x128xf32>
    %80 = tpu.concatenate %75, %79 in 0 : vector<1x128xf32>, vector<1x128xf32> -> vector<2x128xf32>
    %c6_67 = arith.constant 6 : index
    %c0_68 = arith.constant 0 : index
    %c0_69 = arith.constant 0 : index
    %81 = vector.load %arg13[%c6_67, %c0_68, %c0_69] : memref<8x2x128xf32, #tpu.memory_space<vmem>>, vector<1x2x128xf32>
    %82 = vector.shape_cast %81 : vector<1x2x128xf32> to vector<2x128xf32>
    %83 = vector.shape_cast %80 : vector<2x128xf32> to vector<1x2x128xf32>
    tpu.vector_store %arg13[%c6_67, %c0_68, %c0_69], %83 {strides = array<i32>} : memref<8x2x128xf32, #tpu.memory_space<vmem>>, vector<1x2x128xf32>,
    %c0_70 = arith.constant 0 : index
    %c7 = arith.constant 7 : index
    %84 = memref.load %arg0[%c0_70, %c7] : memref<2x8xi32, #tpu.memory_space<smem>>
    %85 = arith.index_cast %84 : i32 to index
    %c0_71 = arith.constant 0 : index
    %c0_72 = arith.constant 0 : index
    %86 = vector.load %arg3[%85, %c0_71, %c0_72] : memref<20x1x128xf32, #tpu.memory_space<vmem>>, vector<1x1x128xf32>
    %87 = vector.shape_cast %86 : vector<1x1x128xf32> to vector<1x128xf32>
    %c1_73 = arith.constant 1 : index
    %c7_74 = arith.constant 7 : index
    %88 = memref.load %arg0[%c1_73, %c7_74] : memref<2x8xi32, #tpu.memory_space<smem>>
    %89 = arith.index_cast %88 : i32 to index
    %c0_75 = arith.constant 0 : index
    %c0_76 = arith.constant 0 : index
    %90 = vector.load %arg3[%89, %c0_75, %c0_76] : memref<20x1x128xf32, #tpu.memory_space<vmem>>, vector<1x1x128xf32>
    %91 = vector.shape_cast %90 : vector<1x1x128xf32> to vector<1x128xf32>
    %92 = tpu.concatenate %87, %91 in 0 : vector<1x128xf32>, vector<1x128xf32> -> vector<2x128xf32>
    %c7_77 = arith.constant 7 : index
    %c0_78 = arith.constant 0 : index
    %c0_79 = arith.constant 0 : index
    %93 = vector.load %arg13[%c7_77, %c0_78, %c0_79] : memref<8x2x128xf32, #tpu.memory_space<vmem>>, vector<1x2x128xf32>
    %94 = vector.shape_cast %93 : vector<1x2x128xf32> to vector<2x128xf32>
    %95 = vector.shape_cast %92 : vector<2x128xf32> to vector<1x2x128xf32>
    tpu.vector_store %arg13[%c7_77, %c0_78, %c0_79], %95 {strides = array<i32>} : memref<8x2x128xf32, #tpu.memory_space<vmem>>, vector<1x2x128xf32>,
    %c0_80 = arith.constant 0 : index
    %96 = memref.load %arg1[%c0_80] : memref<2xi32, #tpu.memory_space<smem>>
    %c0_81 = arith.constant 0 : index
    %97 = memref.load %arg2[%c0_81] : memref<2xi32, #tpu.memory_space<smem>>
    %98 = arith.index_cast %96 : i32 to index
    %c0_82 = arith.constant 0 : index
    %c0_83 = arith.constant 0 : index
    %99 = vector.load %arg7[%98, %c0_82, %c0_83] : memref<10x3x32xf32, #tpu.memory_space<vmem>>, vector<1x3x32xf32>
    %100 = vector.shape_cast %99 : vector<1x3x32xf32> to vector<3x32xf32>
    %101 = vector.extract_strided_slice %100 {offsets = [0, 0], sizes = [1, 32], strides = [1, 1]} : vector<3x32xf32> to vector<1x32xf32>
    %102 = arith.index_cast %97 : i32 to index
    %c0_84 = arith.constant 0 : index
    %c0_85 = arith.constant 0 : index
    %103 = vector.load %arg8[%102, %c0_84, %c0_85] : memref<12x3x32xf32, #tpu.memory_space<vmem>>, vector<1x3x32xf32>
    %104 = vector.shape_cast %103 : vector<1x3x32xf32> to vector<3x32xf32>
    %105 = vector.extract_strided_slice %104 {offsets = [0, 0], sizes = [1, 32], strides = [1, 1]} : vector<3x32xf32> to vector<1x32xf32>
    %106 = arith.addf %101, %105 : vector<1x32xf32>
    %107 = arith.index_cast %96 : i32 to index
    %c0_86 = arith.constant 0 : index
    %c0_87 = arith.constant 0 : index
    %108 = vector.load %arg9[%107, %c0_86, %c0_87] : memref<10x3x32xf32, #tpu.memory_space<vmem>>, vector<1x3x32xf32>
    %109 = vector.shape_cast %108 : vector<1x3x32xf32> to vector<3x32xf32>
    %110 = vector.extract_strided_slice %109 {offsets = [0, 0], sizes = [1, 32], strides = [1, 1]} : vector<3x32xf32> to vector<1x32xf32>
    %111 = arith.index_cast %97 : i32 to index
    %c0_88 = arith.constant 0 : index
    %c0_89 = arith.constant 0 : index
    %112 = vector.load %arg10[%111, %c0_88, %c0_89] : memref<12x3x32xf32, #tpu.memory_space<vmem>>, vector<1x3x32xf32>
    %113 = vector.shape_cast %112 : vector<1x3x32xf32> to vector<3x32xf32>
    %114 = vector.extract_strided_slice %113 {offsets = [0, 0], sizes = [1, 32], strides = [1, 1]} : vector<3x32xf32> to vector<1x32xf32>
    %115 = arith.addf %110, %114 : vector<1x32xf32>
    %c0_90 = arith.constant 0 : index
    %116 = memref.load %arg1[%c0_90] : memref<2xi32, #tpu.memory_space<smem>>
    %c0_91 = arith.constant 0 : index
    %117 = memref.load %arg2[%c0_91] : memref<2xi32, #tpu.memory_space<smem>>
    %118 = arith.index_cast %116 : i32 to index
    %c0_92 = arith.constant 0 : index
    %c0_93 = arith.constant 0 : index
    %119 = vector.load %arg7[%118, %c0_92, %c0_93] : memref<10x3x32xf32, #tpu.memory_space<vmem>>, vector<1x3x32xf32>
    %120 = vector.shape_cast %119 : vector<1x3x32xf32> to vector<3x32xf32>
    %121 = vector.extract_strided_slice %120 {offsets = [1, 0], sizes = [1, 32], strides = [1, 1]} : vector<3x32xf32> to vector<1x32xf32>
    %122 = arith.index_cast %117 : i32 to index
    %c0_94 = arith.constant 0 : index
    %c0_95 = arith.constant 0 : index
    %123 = vector.load %arg8[%122, %c0_94, %c0_95] : memref<12x3x32xf32, #tpu.memory_space<vmem>>, vector<1x3x32xf32>
    %124 = vector.shape_cast %123 : vector<1x3x32xf32> to vector<3x32xf32>
    %125 = vector.extract_strided_slice %124 {offsets = [1, 0], sizes = [1, 32], strides = [1, 1]} : vector<3x32xf32> to vector<1x32xf32>
    %126 = arith.addf %121, %125 : vector<1x32xf32>
    %127 = arith.index_cast %116 : i32 to index
    %c0_96 = arith.constant 0 : index
    %c0_97 = arith.constant 0 : index
    %128 = vector.load %arg9[%127, %c0_96, %c0_97] : memref<10x3x32xf32, #tpu.memory_space<vmem>>, vector<1x3x32xf32>
    %129 = vector.shape_cast %128 : vector<1x3x32xf32> to vector<3x32xf32>
    %130 = vector.extract_strided_slice %129 {offsets = [1, 0], sizes = [1, 32], strides = [1, 1]} : vector<3x32xf32> to vector<1x32xf32>
    %131 = arith.index_cast %117 : i32 to index
    %c0_98 = arith.constant 0 : index
    %c0_99 = arith.constant 0 : index
    %132 = vector.load %arg10[%131, %c0_98, %c0_99] : memref<12x3x32xf32, #tpu.memory_space<vmem>>, vector<1x3x32xf32>
    %133 = vector.shape_cast %132 : vector<1x3x32xf32> to vector<3x32xf32>
    %134 = vector.extract_strided_slice %133 {offsets = [1, 0], sizes = [1, 32], strides = [1, 1]} : vector<3x32xf32> to vector<1x32xf32>
    %135 = arith.addf %130, %134 : vector<1x32xf32>
    %136 = tpu.concatenate %106, %126 in 0 : vector<1x32xf32>, vector<1x32xf32> -> vector<2x32xf32>
    %137 = tpu.concatenate %115, %135 in 0 : vector<1x32xf32>, vector<1x32xf32> -> vector<2x32xf32>
    %c0_100 = arith.constant 0 : index
    %c0_101 = arith.constant 0 : index
    %c0_102 = arith.constant 0 : index
    %138 = vector.load %arg5[%c0_100, %c0_101, %c0_102] : memref<3x32x128xbf16, #tpu.memory_space<vmem>>, vector<1x32x128xbf16>
    %139 = vector.shape_cast %138 : vector<1x32x128xbf16> to vector<32x128xbf16>
    %c0_103 = arith.constant 0 : index
    %c0_104 = arith.constant 0 : index
    %c0_105 = arith.constant 0 : index
    %140 = vector.load %arg4[%c0_103, %c0_104, %c0_105] : memref<2x32x128xbf16, #tpu.memory_space<vmem>>, vector<1x32x128xbf16>
    %141 = vector.shape_cast %140 : vector<1x32x128xbf16> to vector<32x128xbf16>
    %c0_106 = arith.constant 0 : index
    %c0_107 = arith.constant 0 : index
    %c0_108 = arith.constant 0 : index
    %142 = vector.load %arg6[%c0_106, %c0_107, %c0_108] : memref<2x1x128xf32, #tpu.memory_space<vmem>>, vector<1x1x128xf32>
    %143 = vector.shape_cast %142 : vector<1x1x128xf32> to vector<1x128xf32>
    %144 = arith.truncf %136 : vector<2x32xf32> to vector<2x32xbf16>
    %c0_109 = arith.constant 0 : index
    %c0_110 = arith.constant 0 : index
    %c0_111 = arith.constant 0 : index
    %145 = vector.load %arg13[%c0_109, %c0_110, %c0_111] : memref<8x2x128xf32, #tpu.memory_space<vmem>>, vector<1x2x128xf32>
    %146 = vector.shape_cast %145 : vector<1x2x128xf32> to vector<2x128xf32>
    %cst = arith.constant dense<0.000000e+00> : vector<2x128xf32>
    %147 = tpu.matmul %144, %139, %cst {dimension_numbers = #tpu.dot_dimension_numbers<[1], [0], [0], [1], [0, 0, 1, 1], [], []>} : vector<2x32xbf16>, vector<32x128xbf16>, vector<2x128xf32> -> vector<2x128xf32>
    %148 = arith.addf %146, %147 : vector<2x128xf32>
    %149 = arith.negf %148 : vector<2x128xf32>
    %150 = math.exp %149 : vector<2x128xf32>
    %cst_112 = arith.constant 1.000000e+00 : f32
    %151 = vector.broadcast %cst_112 : f32 to vector<2x128xf32>
    %152 = arith.addf %151, %150 : vector<2x128xf32>
    %153 = arith.divf %151, %152 : vector<2x128xf32>
    %154 = math.tanh %148 : vector<2x128xf32>
    %155 = vector.extract_strided_slice %153 {offsets = [0, 0], sizes = [2, 32], strides = [1, 1]} : vector<2x128xf32> to vector<2x32xf32>
    %156 = vector.extract_strided_slice %153 {offsets = [0, 32], sizes = [2, 32], strides = [1, 1]} : vector<2x128xf32> to vector<2x32xf32>
    %157 = vector.extract_strided_slice %154 {offsets = [0, 64], sizes = [2, 32], strides = [1, 1]} : vector<2x128xf32> to vector<2x32xf32>
    %158 = vector.extract_strided_slice %153 {offsets = [0, 96], sizes = [2, 32], strides = [1, 1]} : vector<2x128xf32> to vector<2x32xf32>
    %159 = arith.mulf %156, %137 : vector<2x32xf32>
    %160 = arith.mulf %155, %157 : vector<2x32xf32>
    %161 = arith.addf %159, %160 : vector<2x32xf32>
    %162 = math.tanh %161 : vector<2x32xf32>
    %163 = arith.mulf %158, %162 : vector<2x32xf32>
    %164 = arith.truncf %163 : vector<2x32xf32> to vector<2x32xbf16>
    %cst_113 = arith.constant dense<0.000000e+00> : vector<2x128xf32>
    %165 = tpu.matmul %164, %141, %cst_113 {dimension_numbers = #tpu.dot_dimension_numbers<[1], [0], [0], [1], [0, 0, 1, 1], [], []>} : vector<2x32xbf16>, vector<32x128xbf16>, vector<2x128xf32> -> vector<2x128xf32>
    %166 = vector.broadcast %143 : vector<1x128xf32> to vector<2x128xf32>
    %167 = arith.addf %166, %165 : vector<2x128xf32>
    %c0_114 = arith.constant 0 : index
    %c0_115 = arith.constant 0 : index
    %c0_116 = arith.constant 0 : index
    %168 = vector.load %arg14[%c0_114, %c0_115, %c0_116] : memref<8x2x128xf32, #tpu.memory_space<vmem>>, vector<1x2x128xf32>
    %169 = vector.shape_cast %168 : vector<1x2x128xf32> to vector<2x128xf32>
    %170 = vector.shape_cast %167 : vector<2x128xf32> to vector<1x2x128xf32>
    tpu.vector_store %arg14[%c0_114, %c0_115, %c0_116], %170 {strides = array<i32>} : memref<8x2x128xf32, #tpu.memory_space<vmem>>, vector<1x2x128xf32>,
    %c1_117 = arith.constant 1 : index
    %c0_118 = arith.constant 0 : index
    %c0_119 = arith.constant 0 : index
    %171 = vector.load %arg13[%c1_117, %c0_118, %c0_119] : memref<8x2x128xf32, #tpu.memory_space<vmem>>, vector<1x2x128xf32>
    %172 = vector.shape_cast %171 : vector<1x2x128xf32> to vector<2x128xf32>
    %cst_120 = arith.constant dense<0.000000e+00> : vector<2x128xf32>
    %173 = tpu.matmul %164, %139, %cst_120 {dimension_numbers = #tpu.dot_dimension_numbers<[1], [0], [0], [1], [0, 0, 1, 1], [], []>} : vector<2x32xbf16>, vector<32x128xbf16>, vector<2x128xf32> -> vector<2x128xf32>
    %174 = arith.addf %172, %173 : vector<2x128xf32>
    %175 = arith.negf %174 : vector<2x128xf32>
    %176 = math.exp %175 : vector<2x128xf32>
    %cst_121 = arith.constant 1.000000e+00 : f32
    %177 = vector.broadcast %cst_121 : f32 to vector<2x128xf32>
    %178 = arith.addf %177, %176 : vector<2x128xf32>
    %179 = arith.divf %177, %178 : vector<2x128xf32>
    %180 = math.tanh %174 : vector<2x128xf32>
    %181 = vector.extract_strided_slice %179 {offsets = [0, 0], sizes = [2, 32], strides = [1, 1]} : vector<2x128xf32> to vector<2x32xf32>
    %182 = vector.extract_strided_slice %179 {offsets = [0, 32], sizes = [2, 32], strides = [1, 1]} : vector<2x128xf32> to vector<2x32xf32>
    %183 = vector.extract_strided_slice %180 {offsets = [0, 64], sizes = [2, 32], strides = [1, 1]} : vector<2x128xf32> to vector<2x32xf32>
    %184 = vector.extract_strided_slice %179 {offsets = [0, 96], sizes = [2, 32], strides = [1, 1]} : vector<2x128xf32> to vector<2x32xf32>
    %185 = arith.mulf %182, %161 : vector<2x32xf32>
    %186 = arith.mulf %181, %183 : vector<2x32xf32>
    %187 = arith.addf %185, %186 : vector<2x32xf32>
    %188 = math.tanh %187 : vector<2x32xf32>
    %189 = arith.mulf %184, %188 : vector<2x32xf32>
    %190 = arith.truncf %189 : vector<2x32xf32> to vector<2x32xbf16>
    %cst_122 = arith.constant dense<0.000000e+00> : vector<2x128xf32>
    %191 = tpu.matmul %190, %141, %cst_122 {dimension_numbers = #tpu.dot_dimension_numbers<[1], [0], [0], [1], [0, 0, 1, 1], [], []>} : vector<2x32xbf16>, vector<32x128xbf16>, vector<2x128xf32> -> vector<2x128xf32>
    %192 = vector.broadcast %143 : vector<1x128xf32> to vector<2x128xf32>
    %193 = arith.addf %192, %191 : vector<2x128xf32>
    %c1_123 = arith.constant 1 : index
    %c0_124 = arith.constant 0 : index
    %c0_125 = arith.constant 0 : index
    %194 = vector.load %arg14[%c1_123, %c0_124, %c0_125] : memref<8x2x128xf32, #tpu.memory_space<vmem>>, vector<1x2x128xf32>
    %195 = vector.shape_cast %194 : vector<1x2x128xf32> to vector<2x128xf32>
    %196 = vector.shape_cast %193 : vector<2x128xf32> to vector<1x2x128xf32>
    tpu.vector_store %arg14[%c1_123, %c0_124, %c0_125], %196 {strides = array<i32>} : memref<8x2x128xf32, #tpu.memory_space<vmem>>, vector<1x2x128xf32>,
    %c2_126 = arith.constant 2 : index
    %c0_127 = arith.constant 0 : index
    %c0_128 = arith.constant 0 : index
    %197 = vector.load %arg13[%c2_126, %c0_127, %c0_128] : memref<8x2x128xf32, #tpu.memory_space<vmem>>, vector<1x2x128xf32>
    %198 = vector.shape_cast %197 : vector<1x2x128xf32> to vector<2x128xf32>
    %cst_129 = arith.constant dense<0.000000e+00> : vector<2x128xf32>
    %199 = tpu.matmul %190, %139, %cst_129 {dimension_numbers = #tpu.dot_dimension_numbers<[1], [0], [0], [1], [0, 0, 1, 1], [], []>} : vector<2x32xbf16>, vector<32x128xbf16>, vector<2x128xf32> -> vector<2x128xf32>
    %200 = arith.addf %198, %199 : vector<2x128xf32>
    %201 = arith.negf %200 : vector<2x128xf32>
    %202 = math.exp %201 : vector<2x128xf32>
    %cst_130 = arith.constant 1.000000e+00 : f32
    %203 = vector.broadcast %cst_130 : f32 to vector<2x128xf32>
    %204 = arith.addf %203, %202 : vector<2x128xf32>
    %205 = arith.divf %203, %204 : vector<2x128xf32>
    %206 = math.tanh %200 : vector<2x128xf32>
    %207 = vector.extract_strided_slice %205 {offsets = [0, 0], sizes = [2, 32], strides = [1, 1]} : vector<2x128xf32> to vector<2x32xf32>
    %208 = vector.extract_strided_slice %205 {offsets = [0, 32], sizes = [2, 32], strides = [1, 1]} : vector<2x128xf32> to vector<2x32xf32>
    %209 = vector.extract_strided_slice %206 {offsets = [0, 64], sizes = [2, 32], strides = [1, 1]} : vector<2x128xf32> to vector<2x32xf32>
    %210 = vector.extract_strided_slice %205 {offsets = [0, 96], sizes = [2, 32], strides = [1, 1]} : vector<2x128xf32> to vector<2x32xf32>
    %211 = arith.mulf %208, %187 : vector<2x32xf32>
    %212 = arith.mulf %207, %209 : vector<2x32xf32>
    %213 = arith.addf %211, %212 : vector<2x32xf32>
    %214 = math.tanh %213 : vector<2x32xf32>
    %215 = arith.mulf %210, %214 : vector<2x32xf32>
    %216 = arith.truncf %215 : vector<2x32xf32> to vector<2x32xbf16>
    %cst_131 = arith.constant dense<0.000000e+00> : vector<2x128xf32>
    %217 = tpu.matmul %216, %141, %cst_131 {dimension_numbers = #tpu.dot_dimension_numbers<[1], [0], [0], [1], [0, 0, 1, 1], [], []>} : vector<2x32xbf16>, vector<32x128xbf16>, vector<2x128xf32> -> vector<2x128xf32>
    %218 = vector.broadcast %143 : vector<1x128xf32> to vector<2x128xf32>
    %219 = arith.addf %218, %217 : vector<2x128xf32>
    %c2_132 = arith.constant 2 : index
    %c0_133 = arith.constant 0 : index
    %c0_134 = arith.constant 0 : index
    %220 = vector.load %arg14[%c2_132, %c0_133, %c0_134] : memref<8x2x128xf32, #tpu.memory_space<vmem>>, vector<1x2x128xf32>
    %221 = vector.shape_cast %220 : vector<1x2x128xf32> to vector<2x128xf32>
    %222 = vector.shape_cast %219 : vector<2x128xf32> to vector<1x2x128xf32>
    tpu.vector_store %arg14[%c2_132, %c0_133, %c0_134], %222 {strides = array<i32>} : memref<8x2x128xf32, #tpu.memory_space<vmem>>, vector<1x2x128xf32>,
    %c3_135 = arith.constant 3 : index
    %c0_136 = arith.constant 0 : index
    %c0_137 = arith.constant 0 : index
    %223 = vector.load %arg13[%c3_135, %c0_136, %c0_137] : memref<8x2x128xf32, #tpu.memory_space<vmem>>, vector<1x2x128xf32>
    %224 = vector.shape_cast %223 : vector<1x2x128xf32> to vector<2x128xf32>
    %cst_138 = arith.constant dense<0.000000e+00> : vector<2x128xf32>
    %225 = tpu.matmul %216, %139, %cst_138 {dimension_numbers = #tpu.dot_dimension_numbers<[1], [0], [0], [1], [0, 0, 1, 1], [], []>} : vector<2x32xbf16>, vector<32x128xbf16>, vector<2x128xf32> -> vector<2x128xf32>
    %226 = arith.addf %224, %225 : vector<2x128xf32>
    %227 = arith.negf %226 : vector<2x128xf32>
    %228 = math.exp %227 : vector<2x128xf32>
    %cst_139 = arith.constant 1.000000e+00 : f32
    %229 = vector.broadcast %cst_139 : f32 to vector<2x128xf32>
    %230 = arith.addf %229, %228 : vector<2x128xf32>
    %231 = arith.divf %229, %230 : vector<2x128xf32>
    %232 = math.tanh %226 : vector<2x128xf32>
    %233 = vector.extract_strided_slice %231 {offsets = [0, 0], sizes = [2, 32], strides = [1, 1]} : vector<2x128xf32> to vector<2x32xf32>
    %234 = vector.extract_strided_slice %231 {offsets = [0, 32], sizes = [2, 32], strides = [1, 1]} : vector<2x128xf32> to vector<2x32xf32>
    %235 = vector.extract_strided_slice %232 {offsets = [0, 64], sizes = [2, 32], strides = [1, 1]} : vector<2x128xf32> to vector<2x32xf32>
    %236 = vector.extract_strided_slice %231 {offsets = [0, 96], sizes = [2, 32], strides = [1, 1]} : vector<2x128xf32> to vector<2x32xf32>
    %237 = arith.mulf %234, %213 : vector<2x32xf32>
    %238 = arith.mulf %233, %235 : vector<2x32xf32>
    %239 = arith.addf %237, %238 : vector<2x32xf32>
    %240 = math.tanh %239 : vector<2x32xf32>
    %241 = arith.mulf %236, %240 : vector<2x32xf32>
    %242 = arith.truncf %241 : vector<2x32xf32> to vector<2x32xbf16>
    %cst_140 = arith.constant dense<0.000000e+00> : vector<2x128xf32>
    %243 = tpu.matmul %242, %141, %cst_140 {dimension_numbers = #tpu.dot_dimension_numbers<[1], [0], [0], [1], [0, 0, 1, 1], [], []>} : vector<2x32xbf16>, vector<32x128xbf16>, vector<2x128xf32> -> vector<2x128xf32>
    %244 = vector.broadcast %143 : vector<1x128xf32> to vector<2x128xf32>
    %245 = arith.addf %244, %243 : vector<2x128xf32>
    %c3_141 = arith.constant 3 : index
    %c0_142 = arith.constant 0 : index
    %c0_143 = arith.constant 0 : index
    %246 = vector.load %arg14[%c3_141, %c0_142, %c0_143] : memref<8x2x128xf32, #tpu.memory_space<vmem>>, vector<1x2x128xf32>
    %247 = vector.shape_cast %246 : vector<1x2x128xf32> to vector<2x128xf32>
    %248 = vector.shape_cast %245 : vector<2x128xf32> to vector<1x2x128xf32>
    tpu.vector_store %arg14[%c3_141, %c0_142, %c0_143], %248 {strides = array<i32>} : memref<8x2x128xf32, #tpu.memory_space<vmem>>, vector<1x2x128xf32>,
    %c4_144 = arith.constant 4 : index
    %c0_145 = arith.constant 0 : index
    %c0_146 = arith.constant 0 : index
    %249 = vector.load %arg13[%c4_144, %c0_145, %c0_146] : memref<8x2x128xf32, #tpu.memory_space<vmem>>, vector<1x2x128xf32>
    %250 = vector.shape_cast %249 : vector<1x2x128xf32> to vector<2x128xf32>
    %cst_147 = arith.constant dense<0.000000e+00> : vector<2x128xf32>
    %251 = tpu.matmul %242, %139, %cst_147 {dimension_numbers = #tpu.dot_dimension_numbers<[1], [0], [0], [1], [0, 0, 1, 1], [], []>} : vector<2x32xbf16>, vector<32x128xbf16>, vector<2x128xf32> -> vector<2x128xf32>
    %252 = arith.addf %250, %251 : vector<2x128xf32>
    %253 = arith.negf %252 : vector<2x128xf32>
    %254 = math.exp %253 : vector<2x128xf32>
    %cst_148 = arith.constant 1.000000e+00 : f32
    %255 = vector.broadcast %cst_148 : f32 to vector<2x128xf32>
    %256 = arith.addf %255, %254 : vector<2x128xf32>
    %257 = arith.divf %255, %256 : vector<2x128xf32>
    %258 = math.tanh %252 : vector<2x128xf32>
    %259 = vector.extract_strided_slice %257 {offsets = [0, 0], sizes = [2, 32], strides = [1, 1]} : vector<2x128xf32> to vector<2x32xf32>
    %260 = vector.extract_strided_slice %257 {offsets = [0, 32], sizes = [2, 32], strides = [1, 1]} : vector<2x128xf32> to vector<2x32xf32>
    %261 = vector.extract_strided_slice %258 {offsets = [0, 64], sizes = [2, 32], strides = [1, 1]} : vector<2x128xf32> to vector<2x32xf32>
    %262 = vector.extract_strided_slice %257 {offsets = [0, 96], sizes = [2, 32], strides = [1, 1]} : vector<2x128xf32> to vector<2x32xf32>
    %263 = arith.mulf %260, %239 : vector<2x32xf32>
    %264 = arith.mulf %259, %261 : vector<2x32xf32>
    %265 = arith.addf %263, %264 : vector<2x32xf32>
    %266 = math.tanh %265 : vector<2x32xf32>
    %267 = arith.mulf %262, %266 : vector<2x32xf32>
    %268 = arith.truncf %267 : vector<2x32xf32> to vector<2x32xbf16>
    %cst_149 = arith.constant dense<0.000000e+00> : vector<2x128xf32>
    %269 = tpu.matmul %268, %141, %cst_149 {dimension_numbers = #tpu.dot_dimension_numbers<[1], [0], [0], [1], [0, 0, 1, 1], [], []>} : vector<2x32xbf16>, vector<32x128xbf16>, vector<2x128xf32> -> vector<2x128xf32>
    %270 = vector.broadcast %143 : vector<1x128xf32> to vector<2x128xf32>
    %271 = arith.addf %270, %269 : vector<2x128xf32>
    %c4_150 = arith.constant 4 : index
    %c0_151 = arith.constant 0 : index
    %c0_152 = arith.constant 0 : index
    %272 = vector.load %arg14[%c4_150, %c0_151, %c0_152] : memref<8x2x128xf32, #tpu.memory_space<vmem>>, vector<1x2x128xf32>
    %273 = vector.shape_cast %272 : vector<1x2x128xf32> to vector<2x128xf32>
    %274 = vector.shape_cast %271 : vector<2x128xf32> to vector<1x2x128xf32>
    tpu.vector_store %arg14[%c4_150, %c0_151, %c0_152], %274 {strides = array<i32>} : memref<8x2x128xf32, #tpu.memory_space<vmem>>, vector<1x2x128xf32>,
    %c5_153 = arith.constant 5 : index
    %c0_154 = arith.constant 0 : index
    %c0_155 = arith.constant 0 : index
    %275 = vector.load %arg13[%c5_153, %c0_154, %c0_155] : memref<8x2x128xf32, #tpu.memory_space<vmem>>, vector<1x2x128xf32>
    %276 = vector.shape_cast %275 : vector<1x2x128xf32> to vector<2x128xf32>
    %cst_156 = arith.constant dense<0.000000e+00> : vector<2x128xf32>
    %277 = tpu.matmul %268, %139, %cst_156 {dimension_numbers = #tpu.dot_dimension_numbers<[1], [0], [0], [1], [0, 0, 1, 1], [], []>} : vector<2x32xbf16>, vector<32x128xbf16>, vector<2x128xf32> -> vector<2x128xf32>
    %278 = arith.addf %276, %277 : vector<2x128xf32>
    %279 = arith.negf %278 : vector<2x128xf32>
    %280 = math.exp %279 : vector<2x128xf32>
    %cst_157 = arith.constant 1.000000e+00 : f32
    %281 = vector.broadcast %cst_157 : f32 to vector<2x128xf32>
    %282 = arith.addf %281, %280 : vector<2x128xf32>
    %283 = arith.divf %281, %282 : vector<2x128xf32>
    %284 = math.tanh %278 : vector<2x128xf32>
    %285 = vector.extract_strided_slice %283 {offsets = [0, 0], sizes = [2, 32], strides = [1, 1]} : vector<2x128xf32> to vector<2x32xf32>
    %286 = vector.extract_strided_slice %283 {offsets = [0, 32], sizes = [2, 32], strides = [1, 1]} : vector<2x128xf32> to vector<2x32xf32>
    %287 = vector.extract_strided_slice %284 {offsets = [0, 64], sizes = [2, 32], strides = [1, 1]} : vector<2x128xf32> to vector<2x32xf32>
    %288 = vector.extract_strided_slice %283 {offsets = [0, 96], sizes = [2, 32], strides = [1, 1]} : vector<2x128xf32> to vector<2x32xf32>
    %289 = arith.mulf %286, %265 : vector<2x32xf32>
    %290 = arith.mulf %285, %287 : vector<2x32xf32>
    %291 = arith.addf %289, %290 : vector<2x32xf32>
    %292 = math.tanh %291 : vector<2x32xf32>
    %293 = arith.mulf %288, %292 : vector<2x32xf32>
    %294 = arith.truncf %293 : vector<2x32xf32> to vector<2x32xbf16>
    %cst_158 = arith.constant dense<0.000000e+00> : vector<2x128xf32>
    %295 = tpu.matmul %294, %141, %cst_158 {dimension_numbers = #tpu.dot_dimension_numbers<[1], [0], [0], [1], [0, 0, 1, 1], [], []>} : vector<2x32xbf16>, vector<32x128xbf16>, vector<2x128xf32> -> vector<2x128xf32>
    %296 = vector.broadcast %143 : vector<1x128xf32> to vector<2x128xf32>
    %297 = arith.addf %296, %295 : vector<2x128xf32>
    %c5_159 = arith.constant 5 : index
    %c0_160 = arith.constant 0 : index
    %c0_161 = arith.constant 0 : index
    %298 = vector.load %arg14[%c5_159, %c0_160, %c0_161] : memref<8x2x128xf32, #tpu.memory_space<vmem>>, vector<1x2x128xf32>
    %299 = vector.shape_cast %298 : vector<1x2x128xf32> to vector<2x128xf32>
    %300 = vector.shape_cast %297 : vector<2x128xf32> to vector<1x2x128xf32>
    tpu.vector_store %arg14[%c5_159, %c0_160, %c0_161], %300 {strides = array<i32>} : memref<8x2x128xf32, #tpu.memory_space<vmem>>, vector<1x2x128xf32>,
    %c6_162 = arith.constant 6 : index
    %c0_163 = arith.constant 0 : index
    %c0_164 = arith.constant 0 : index
    %301 = vector.load %arg13[%c6_162, %c0_163, %c0_164] : memref<8x2x128xf32, #tpu.memory_space<vmem>>, vector<1x2x128xf32>
    %302 = vector.shape_cast %301 : vector<1x2x128xf32> to vector<2x128xf32>
    %cst_165 = arith.constant dense<0.000000e+00> : vector<2x128xf32>
    %303 = tpu.matmul %294, %139, %cst_165 {dimension_numbers = #tpu.dot_dimension_numbers<[1], [0], [0], [1], [0, 0, 1, 1], [], []>} : vector<2x32xbf16>, vector<32x128xbf16>, vector<2x128xf32> -> vector<2x128xf32>
    %304 = arith.addf %302, %303 : vector<2x128xf32>
    %305 = arith.negf %304 : vector<2x128xf32>
    %306 = math.exp %305 : vector<2x128xf32>
    %cst_166 = arith.constant 1.000000e+00 : f32
    %307 = vector.broadcast %cst_166 : f32 to vector<2x128xf32>
    %308 = arith.addf %307, %306 : vector<2x128xf32>
    %309 = arith.divf %307, %308 : vector<2x128xf32>
    %310 = math.tanh %304 : vector<2x128xf32>
    %311 = vector.extract_strided_slice %309 {offsets = [0, 0], sizes = [2, 32], strides = [1, 1]} : vector<2x128xf32> to vector<2x32xf32>
    %312 = vector.extract_strided_slice %309 {offsets = [0, 32], sizes = [2, 32], strides = [1, 1]} : vector<2x128xf32> to vector<2x32xf32>
    %313 = vector.extract_strided_slice %310 {offsets = [0, 64], sizes = [2, 32], strides = [1, 1]} : vector<2x128xf32> to vector<2x32xf32>
    %314 = vector.extract_strided_slice %309 {offsets = [0, 96], sizes = [2, 32], strides = [1, 1]} : vector<2x128xf32> to vector<2x32xf32>
    %315 = arith.mulf %312, %291 : vector<2x32xf32>
    %316 = arith.mulf %311, %313 : vector<2x32xf32>
    %317 = arith.addf %315, %316 : vector<2x32xf32>
    %318 = math.tanh %317 : vector<2x32xf32>
    %319 = arith.mulf %314, %318 : vector<2x32xf32>
    %320 = arith.truncf %319 : vector<2x32xf32> to vector<2x32xbf16>
    %cst_167 = arith.constant dense<0.000000e+00> : vector<2x128xf32>
    %321 = tpu.matmul %320, %141, %cst_167 {dimension_numbers = #tpu.dot_dimension_numbers<[1], [0], [0], [1], [0, 0, 1, 1], [], []>} : vector<2x32xbf16>, vector<32x128xbf16>, vector<2x128xf32> -> vector<2x128xf32>
    %322 = vector.broadcast %143 : vector<1x128xf32> to vector<2x128xf32>
    %323 = arith.addf %322, %321 : vector<2x128xf32>
    %c6_168 = arith.constant 6 : index
    %c0_169 = arith.constant 0 : index
    %c0_170 = arith.constant 0 : index
    %324 = vector.load %arg14[%c6_168, %c0_169, %c0_170] : memref<8x2x128xf32, #tpu.memory_space<vmem>>, vector<1x2x128xf32>
    %325 = vector.shape_cast %324 : vector<1x2x128xf32> to vector<2x128xf32>
    %326 = vector.shape_cast %323 : vector<2x128xf32> to vector<1x2x128xf32>
    tpu.vector_store %arg14[%c6_168, %c0_169, %c0_170], %326 {strides = array<i32>} : memref<8x2x128xf32, #tpu.memory_space<vmem>>, vector<1x2x128xf32>,
    %c7_171 = arith.constant 7 : index
    %c0_172 = arith.constant 0 : index
    %c0_173 = arith.constant 0 : index
    %327 = vector.load %arg13[%c7_171, %c0_172, %c0_173] : memref<8x2x128xf32, #tpu.memory_space<vmem>>, vector<1x2x128xf32>
    %328 = vector.shape_cast %327 : vector<1x2x128xf32> to vector<2x128xf32>
    %cst_174 = arith.constant dense<0.000000e+00> : vector<2x128xf32>
    %329 = tpu.matmul %320, %139, %cst_174 {dimension_numbers = #tpu.dot_dimension_numbers<[1], [0], [0], [1], [0, 0, 1, 1], [], []>} : vector<2x32xbf16>, vector<32x128xbf16>, vector<2x128xf32> -> vector<2x128xf32>
    %330 = arith.addf %328, %329 : vector<2x128xf32>
    %331 = arith.negf %330 : vector<2x128xf32>
    %332 = math.exp %331 : vector<2x128xf32>
    %cst_175 = arith.constant 1.000000e+00 : f32
    %333 = vector.broadcast %cst_175 : f32 to vector<2x128xf32>
    %334 = arith.addf %333, %332 : vector<2x128xf32>
    %335 = arith.divf %333, %334 : vector<2x128xf32>
    %336 = math.tanh %330 : vector<2x128xf32>
    %337 = vector.extract_strided_slice %335 {offsets = [0, 0], sizes = [2, 32], strides = [1, 1]} : vector<2x128xf32> to vector<2x32xf32>
    %338 = vector.extract_strided_slice %335 {offsets = [0, 32], sizes = [2, 32], strides = [1, 1]} : vector<2x128xf32> to vector<2x32xf32>
    %339 = vector.extract_strided_slice %336 {offsets = [0, 64], sizes = [2, 32], strides = [1, 1]} : vector<2x128xf32> to vector<2x32xf32>
    %340 = vector.extract_strided_slice %335 {offsets = [0, 96], sizes = [2, 32], strides = [1, 1]} : vector<2x128xf32> to vector<2x32xf32>
    %341 = arith.mulf %338, %317 : vector<2x32xf32>
    %342 = arith.mulf %337, %339 : vector<2x32xf32>
    %343 = arith.addf %341, %342 : vector<2x32xf32>
    %344 = math.tanh %343 : vector<2x32xf32>
    %345 = arith.mulf %340, %344 : vector<2x32xf32>
    %346 = arith.truncf %345 : vector<2x32xf32> to vector<2x32xbf16>
    %cst_176 = arith.constant dense<0.000000e+00> : vector<2x128xf32>
    %347 = tpu.matmul %346, %141, %cst_176 {dimension_numbers = #tpu.dot_dimension_numbers<[1], [0], [0], [1], [0, 0, 1, 1], [], []>} : vector<2x32xbf16>, vector<32x128xbf16>, vector<2x128xf32> -> vector<2x128xf32>
    %348 = vector.broadcast %143 : vector<1x128xf32> to vector<2x128xf32>
    %349 = arith.addf %348, %347 : vector<2x128xf32>
    %c7_177 = arith.constant 7 : index
    %c0_178 = arith.constant 0 : index
    %c0_179 = arith.constant 0 : index
    %350 = vector.load %arg14[%c7_177, %c0_178, %c0_179] : memref<8x2x128xf32, #tpu.memory_space<vmem>>, vector<1x2x128xf32>
    %351 = vector.shape_cast %350 : vector<1x2x128xf32> to vector<2x128xf32>
    %352 = vector.shape_cast %349 : vector<2x128xf32> to vector<1x2x128xf32>
    tpu.vector_store %arg14[%c7_177, %c0_178, %c0_179], %352 {strides = array<i32>} : memref<8x2x128xf32, #tpu.memory_space<vmem>>, vector<1x2x128xf32>,
    %c0_180 = arith.constant 0 : index
    %c0_181 = arith.constant 0 : index
    %c0_182 = arith.constant 0 : index
    %353 = vector.load %arg11[%c0_180, %c0_181, %c0_182] : memref<3x2x32xf32, #tpu.memory_space<vmem>>, vector<1x2x32xf32>
    %354 = vector.shape_cast %353 : vector<1x2x32xf32> to vector<2x32xf32>
    %355 = vector.shape_cast %345 : vector<2x32xf32> to vector<1x2x32xf32>
    tpu.vector_store %arg11[%c0_180, %c0_181, %c0_182], %355 {strides = array<i32>} : memref<3x2x32xf32, #tpu.memory_space<vmem>>, vector<1x2x32xf32>,
    %c0_183 = arith.constant 0 : index
    %c0_184 = arith.constant 0 : index
    %c0_185 = arith.constant 0 : index
    %356 = vector.load %arg12[%c0_183, %c0_184, %c0_185] : memref<3x2x32xf32, #tpu.memory_space<vmem>>, vector<1x2x32xf32>
    %357 = vector.shape_cast %356 : vector<1x2x32xf32> to vector<2x32xf32>
    %358 = vector.shape_cast %343 : vector<2x32xf32> to vector<1x2x32xf32>
    tpu.vector_store %arg12[%c0_183, %c0_184, %c0_185], %358 {strides = array<i32>} : memref<3x2x32xf32, #tpu.memory_space<vmem>>, vector<1x2x32xf32>,
    %c0_186 = arith.constant 0 : index
    %359 = memref.load %arg1[%c0_186] : memref<2xi32, #tpu.memory_space<smem>>
    %c0_187 = arith.constant 0 : index
    %360 = memref.load %arg2[%c0_187] : memref<2xi32, #tpu.memory_space<smem>>
    %361 = arith.index_cast %359 : i32 to index
    %c0_188 = arith.constant 0 : index
    %c0_189 = arith.constant 0 : index
    %362 = vector.load %arg7[%361, %c0_188, %c0_189] : memref<10x3x32xf32, #tpu.memory_space<vmem>>, vector<1x3x32xf32>
    %363 = vector.shape_cast %362 : vector<1x3x32xf32> to vector<3x32xf32>
    %364 = vector.extract_strided_slice %363 {offsets = [2, 0], sizes = [1, 32], strides = [1, 1]} : vector<3x32xf32> to vector<1x32xf32>
    %365 = arith.index_cast %360 : i32 to index
    %c0_190 = arith.constant 0 : index
    %c0_191 = arith.constant 0 : index
    %366 = vector.load %arg8[%365, %c0_190, %c0_191] : memref<12x3x32xf32, #tpu.memory_space<vmem>>, vector<1x3x32xf32>
    %367 = vector.shape_cast %366 : vector<1x3x32xf32> to vector<3x32xf32>
    %368 = vector.extract_strided_slice %367 {offsets = [2, 0], sizes = [1, 32], strides = [1, 1]} : vector<3x32xf32> to vector<1x32xf32>
    %369 = arith.addf %364, %368 : vector<1x32xf32>
    %370 = arith.index_cast %359 : i32 to index
    %c0_192 = arith.constant 0 : index
    %c0_193 = arith.constant 0 : index
    %371 = vector.load %arg9[%370, %c0_192, %c0_193] : memref<10x3x32xf32, #tpu.memory_space<vmem>>, vector<1x3x32xf32>
    %372 = vector.shape_cast %371 : vector<1x3x32xf32> to vector<3x32xf32>
    %373 = vector.extract_strided_slice %372 {offsets = [2, 0], sizes = [1, 32], strides = [1, 1]} : vector<3x32xf32> to vector<1x32xf32>
    %374 = arith.index_cast %360 : i32 to index
    %c0_194 = arith.constant 0 : index
    %c0_195 = arith.constant 0 : index
    %375 = vector.load %arg10[%374, %c0_194, %c0_195] : memref<12x3x32xf32, #tpu.memory_space<vmem>>, vector<1x3x32xf32>
    %376 = vector.shape_cast %375 : vector<1x3x32xf32> to vector<3x32xf32>
    %377 = vector.extract_strided_slice %376 {offsets = [2, 0], sizes = [1, 32], strides = [1, 1]} : vector<3x32xf32> to vector<1x32xf32>
    %378 = arith.addf %373, %377 : vector<1x32xf32>
    %c1_196 = arith.constant 1 : index
    %379 = memref.load %arg1[%c1_196] : memref<2xi32, #tpu.memory_space<smem>>
    %c1_197 = arith.constant 1 : index
    %380 = memref.load %arg2[%c1_197] : memref<2xi32, #tpu.memory_space<smem>>
    %381 = arith.index_cast %379 : i32 to index
    %c0_198 = arith.constant 0 : index
    %c0_199 = arith.constant 0 : index
    %382 = vector.load %arg7[%381, %c0_198, %c0_199] : memref<10x3x32xf32, #tpu.memory_space<vmem>>, vector<1x3x32xf32>
    %383 = vector.shape_cast %382 : vector<1x3x32xf32> to vector<3x32xf32>
    %384 = vector.extract_strided_slice %383 {offsets = [0, 0], sizes = [1, 32], strides = [1, 1]} : vector<3x32xf32> to vector<1x32xf32>
    %385 = arith.index_cast %380 : i32 to index
    %c0_200 = arith.constant 0 : index
    %c0_201 = arith.constant 0 : index
    %386 = vector.load %arg8[%385, %c0_200, %c0_201] : memref<12x3x32xf32, #tpu.memory_space<vmem>>, vector<1x3x32xf32>
    %387 = vector.shape_cast %386 : vector<1x3x32xf32> to vector<3x32xf32>
    %388 = vector.extract_strided_slice %387 {offsets = [0, 0], sizes = [1, 32], strides = [1, 1]} : vector<3x32xf32> to vector<1x32xf32>
    %389 = arith.addf %384, %388 : vector<1x32xf32>
    %390 = arith.index_cast %379 : i32 to index
    %c0_202 = arith.constant 0 : index
    %c0_203 = arith.constant 0 : index
    %391 = vector.load %arg9[%390, %c0_202, %c0_203] : memref<10x3x32xf32, #tpu.memory_space<vmem>>, vector<1x3x32xf32>
    %392 = vector.shape_cast %391 : vector<1x3x32xf32> to vector<3x32xf32>
    %393 = vector.extract_strided_slice %392 {offsets = [0, 0], sizes = [1, 32], strides = [1, 1]} : vector<3x32xf32> to vector<1x32xf32>
    %394 = arith.index_cast %380 : i32 to index
    %c0_204 = arith.constant 0 : index
    %c0_205 = arith.constant 0 : index
    %395 = vector.load %arg10[%394, %c0_204, %c0_205] : memref<12x3x32xf32, #tpu.memory_space<vmem>>, vector<1x3x32xf32>
    %396 = vector.shape_cast %395 : vector<1x3x32xf32> to vector<3x32xf32>
    %397 = vector.extract_strided_slice %396 {offsets = [0, 0], sizes = [1, 32], strides = [1, 1]} : vector<3x32xf32> to vector<1x32xf32>
    %398 = arith.addf %393, %397 : vector<1x32xf32>
    %399 = tpu.concatenate %369, %389 in 0 : vector<1x32xf32>, vector<1x32xf32> -> vector<2x32xf32>
    %400 = tpu.concatenate %378, %398 in 0 : vector<1x32xf32>, vector<1x32xf32> -> vector<2x32xf32>
    %c1_206 = arith.constant 1 : index
    %c0_207 = arith.constant 0 : index
    %c0_208 = arith.constant 0 : index
    %401 = vector.load %arg5[%c1_206, %c0_207, %c0_208] : memref<3x32x128xbf16, #tpu.memory_space<vmem>>, vector<1x32x128xbf16>
    %402 = vector.shape_cast %401 : vector<1x32x128xbf16> to vector<32x128xbf16>
    %c1_209 = arith.constant 1 : index
    %c0_210 = arith.constant 0 : index
    %c0_211 = arith.constant 0 : index
    %403 = vector.load %arg4[%c1_209, %c0_210, %c0_211] : memref<2x32x128xbf16, #tpu.memory_space<vmem>>, vector<1x32x128xbf16>
    %404 = vector.shape_cast %403 : vector<1x32x128xbf16> to vector<32x128xbf16>
    %c1_212 = arith.constant 1 : index
    %c0_213 = arith.constant 0 : index
    %c0_214 = arith.constant 0 : index
    %405 = vector.load %arg6[%c1_212, %c0_213, %c0_214] : memref<2x1x128xf32, #tpu.memory_space<vmem>>, vector<1x1x128xf32>
    %406 = vector.shape_cast %405 : vector<1x1x128xf32> to vector<1x128xf32>
    %407 = arith.truncf %399 : vector<2x32xf32> to vector<2x32xbf16>
    %c0_215 = arith.constant 0 : index
    %c0_216 = arith.constant 0 : index
    %c0_217 = arith.constant 0 : index
    %408 = vector.load %arg14[%c0_215, %c0_216, %c0_217] : memref<8x2x128xf32, #tpu.memory_space<vmem>>, vector<1x2x128xf32>
    %409 = vector.shape_cast %408 : vector<1x2x128xf32> to vector<2x128xf32>
    %cst_218 = arith.constant dense<0.000000e+00> : vector<2x128xf32>
    %410 = tpu.matmul %407, %402, %cst_218 {dimension_numbers = #tpu.dot_dimension_numbers<[1], [0], [0], [1], [0, 0, 1, 1], [], []>} : vector<2x32xbf16>, vector<32x128xbf16>, vector<2x128xf32> -> vector<2x128xf32>
    %411 = arith.addf %409, %410 : vector<2x128xf32>
    %412 = arith.negf %411 : vector<2x128xf32>
    %413 = math.exp %412 : vector<2x128xf32>
    %cst_219 = arith.constant 1.000000e+00 : f32
    %414 = vector.broadcast %cst_219 : f32 to vector<2x128xf32>
    %415 = arith.addf %414, %413 : vector<2x128xf32>
    %416 = arith.divf %414, %415 : vector<2x128xf32>
    %417 = math.tanh %411 : vector<2x128xf32>
    %418 = vector.extract_strided_slice %416 {offsets = [0, 0], sizes = [2, 32], strides = [1, 1]} : vector<2x128xf32> to vector<2x32xf32>
    %419 = vector.extract_strided_slice %416 {offsets = [0, 32], sizes = [2, 32], strides = [1, 1]} : vector<2x128xf32> to vector<2x32xf32>
    %420 = vector.extract_strided_slice %417 {offsets = [0, 64], sizes = [2, 32], strides = [1, 1]} : vector<2x128xf32> to vector<2x32xf32>
    %421 = vector.extract_strided_slice %416 {offsets = [0, 96], sizes = [2, 32], strides = [1, 1]} : vector<2x128xf32> to vector<2x32xf32>
    %422 = arith.mulf %419, %400 : vector<2x32xf32>
    %423 = arith.mulf %418, %420 : vector<2x32xf32>
    %424 = arith.addf %422, %423 : vector<2x32xf32>
    %425 = math.tanh %424 : vector<2x32xf32>
    %426 = arith.mulf %421, %425 : vector<2x32xf32>
    %427 = arith.truncf %426 : vector<2x32xf32> to vector<2x32xbf16>
    %cst_220 = arith.constant dense<0.000000e+00> : vector<2x128xf32>
    %428 = tpu.matmul %427, %404, %cst_220 {dimension_numbers = #tpu.dot_dimension_numbers<[1], [0], [0], [1], [0, 0, 1, 1], [], []>} : vector<2x32xbf16>, vector<32x128xbf16>, vector<2x128xf32> -> vector<2x128xf32>
    %429 = vector.broadcast %406 : vector<1x128xf32> to vector<2x128xf32>
    %430 = arith.addf %429, %428 : vector<2x128xf32>
    %c0_221 = arith.constant 0 : index
    %c0_222 = arith.constant 0 : index
    %c0_223 = arith.constant 0 : index
    %431 = vector.load %arg13[%c0_221, %c0_222, %c0_223] : memref<8x2x128xf32, #tpu.memory_space<vmem>>, vector<1x2x128xf32>
    %432 = vector.shape_cast %431 : vector<1x2x128xf32> to vector<2x128xf32>
    %433 = vector.shape_cast %430 : vector<2x128xf32> to vector<1x2x128xf32>
    tpu.vector_store %arg13[%c0_221, %c0_222, %c0_223], %433 {strides = array<i32>} : memref<8x2x128xf32, #tpu.memory_space<vmem>>, vector<1x2x128xf32>,
    %c1_224 = arith.constant 1 : index
    %c0_225 = arith.constant 0 : index
    %c0_226 = arith.constant 0 : index
    %434 = vector.load %arg14[%c1_224, %c0_225, %c0_226] : memref<8x2x128xf32, #tpu.memory_space<vmem>>, vector<1x2x128xf32>
    %435 = vector.shape_cast %434 : vector<1x2x128xf32> to vector<2x128xf32>
    %cst_227 = arith.constant dense<0.000000e+00> : vector<2x128xf32>
    %436 = tpu.matmul %427, %402, %cst_227 {dimension_numbers = #tpu.dot_dimension_numbers<[1], [0], [0], [1], [0, 0, 1, 1], [], []>} : vector<2x32xbf16>, vector<32x128xbf16>, vector<2x128xf32> -> vector<2x128xf32>
    %437 = arith.addf %435, %436 : vector<2x128xf32>
    %438 = arith.negf %437 : vector<2x128xf32>
    %439 = math.exp %438 : vector<2x128xf32>
    %cst_228 = arith.constant 1.000000e+00 : f32
    %440 = vector.broadcast %cst_228 : f32 to vector<2x128xf32>
    %441 = arith.addf %440, %439 : vector<2x128xf32>
    %442 = arith.divf %440, %441 : vector<2x128xf32>
    %443 = math.tanh %437 : vector<2x128xf32>
    %444 = vector.extract_strided_slice %442 {offsets = [0, 0], sizes = [2, 32], strides = [1, 1]} : vector<2x128xf32> to vector<2x32xf32>
    %445 = vector.extract_strided_slice %442 {offsets = [0, 32], sizes = [2, 32], strides = [1, 1]} : vector<2x128xf32> to vector<2x32xf32>
    %446 = vector.extract_strided_slice %443 {offsets = [0, 64], sizes = [2, 32], strides = [1, 1]} : vector<2x128xf32> to vector<2x32xf32>
    %447 = vector.extract_strided_slice %442 {offsets = [0, 96], sizes = [2, 32], strides = [1, 1]} : vector<2x128xf32> to vector<2x32xf32>
    %448 = arith.mulf %445, %424 : vector<2x32xf32>
    %449 = arith.mulf %444, %446 : vector<2x32xf32>
    %450 = arith.addf %448, %449 : vector<2x32xf32>
    %451 = math.tanh %450 : vector<2x32xf32>
    %452 = arith.mulf %447, %451 : vector<2x32xf32>
    %453 = arith.truncf %452 : vector<2x32xf32> to vector<2x32xbf16>
    %cst_229 = arith.constant dense<0.000000e+00> : vector<2x128xf32>
    %454 = tpu.matmul %453, %404, %cst_229 {dimension_numbers = #tpu.dot_dimension_numbers<[1], [0], [0], [1], [0, 0, 1, 1], [], []>} : vector<2x32xbf16>, vector<32x128xbf16>, vector<2x128xf32> -> vector<2x128xf32>
    %455 = vector.broadcast %406 : vector<1x128xf32> to vector<2x128xf32>
    %456 = arith.addf %455, %454 : vector<2x128xf32>
    %c1_230 = arith.constant 1 : index
    %c0_231 = arith.constant 0 : index
    %c0_232 = arith.constant 0 : index
    %457 = vector.load %arg13[%c1_230, %c0_231, %c0_232] : memref<8x2x128xf32, #tpu.memory_space<vmem>>, vector<1x2x128xf32>
    %458 = vector.shape_cast %457 : vector<1x2x128xf32> to vector<2x128xf32>
    %459 = vector.shape_cast %456 : vector<2x128xf32> to vector<1x2x128xf32>
    tpu.vector_store %arg13[%c1_230, %c0_231, %c0_232], %459 {strides = array<i32>} : memref<8x2x128xf32, #tpu.memory_space<vmem>>, vector<1x2x128xf32>,
    %c2_233 = arith.constant 2 : index
    %c0_234 = arith.constant 0 : index
    %c0_235 = arith.constant 0 : index
    %460 = vector.load %arg14[%c2_233, %c0_234, %c0_235] : memref<8x2x128xf32, #tpu.memory_space<vmem>>, vector<1x2x128xf32>
    %461 = vector.shape_cast %460 : vector<1x2x128xf32> to vector<2x128xf32>
    %cst_236 = arith.constant dense<0.000000e+00> : vector<2x128xf32>
    %462 = tpu.matmul %453, %402, %cst_236 {dimension_numbers = #tpu.dot_dimension_numbers<[1], [0], [0], [1], [0, 0, 1, 1], [], []>} : vector<2x32xbf16>, vector<32x128xbf16>, vector<2x128xf32> -> vector<2x128xf32>
    %463 = arith.addf %461, %462 : vector<2x128xf32>
    %464 = arith.negf %463 : vector<2x128xf32>
    %465 = math.exp %464 : vector<2x128xf32>
    %cst_237 = arith.constant 1.000000e+00 : f32
    %466 = vector.broadcast %cst_237 : f32 to vector<2x128xf32>
    %467 = arith.addf %466, %465 : vector<2x128xf32>
    %468 = arith.divf %466, %467 : vector<2x128xf32>
    %469 = math.tanh %463 : vector<2x128xf32>
    %470 = vector.extract_strided_slice %468 {offsets = [0, 0], sizes = [2, 32], strides = [1, 1]} : vector<2x128xf32> to vector<2x32xf32>
    %471 = vector.extract_strided_slice %468 {offsets = [0, 32], sizes = [2, 32], strides = [1, 1]} : vector<2x128xf32> to vector<2x32xf32>
    %472 = vector.extract_strided_slice %469 {offsets = [0, 64], sizes = [2, 32], strides = [1, 1]} : vector<2x128xf32> to vector<2x32xf32>
    %473 = vector.extract_strided_slice %468 {offsets = [0, 96], sizes = [2, 32], strides = [1, 1]} : vector<2x128xf32> to vector<2x32xf32>
    %474 = arith.mulf %471, %450 : vector<2x32xf32>
    %475 = arith.mulf %470, %472 : vector<2x32xf32>
    %476 = arith.addf %474, %475 : vector<2x32xf32>
    %477 = math.tanh %476 : vector<2x32xf32>
    %478 = arith.mulf %473, %477 : vector<2x32xf32>
    %479 = arith.truncf %478 : vector<2x32xf32> to vector<2x32xbf16>
    %cst_238 = arith.constant dense<0.000000e+00> : vector<2x128xf32>
    %480 = tpu.matmul %479, %404, %cst_238 {dimension_numbers = #tpu.dot_dimension_numbers<[1], [0], [0], [1], [0, 0, 1, 1], [], []>} : vector<2x32xbf16>, vector<32x128xbf16>, vector<2x128xf32> -> vector<2x128xf32>
    %481 = vector.broadcast %406 : vector<1x128xf32> to vector<2x128xf32>
    %482 = arith.addf %481, %480 : vector<2x128xf32>
    %c2_239 = arith.constant 2 : index
    %c0_240 = arith.constant 0 : index
    %c0_241 = arith.constant 0 : index
    %483 = vector.load %arg13[%c2_239, %c0_240, %c0_241] : memref<8x2x128xf32, #tpu.memory_space<vmem>>, vector<1x2x128xf32>
    %484 = vector.shape_cast %483 : vector<1x2x128xf32> to vector<2x128xf32>
    %485 = vector.shape_cast %482 : vector<2x128xf32> to vector<1x2x128xf32>
    tpu.vector_store %arg13[%c2_239, %c0_240, %c0_241], %485 {strides = array<i32>} : memref<8x2x128xf32, #tpu.memory_space<vmem>>, vector<1x2x128xf32>,
    %c3_242 = arith.constant 3 : index
    %c0_243 = arith.constant 0 : index
    %c0_244 = arith.constant 0 : index
    %486 = vector.load %arg14[%c3_242, %c0_243, %c0_244] : memref<8x2x128xf32, #tpu.memory_space<vmem>>, vector<1x2x128xf32>
    %487 = vector.shape_cast %486 : vector<1x2x128xf32> to vector<2x128xf32>
    %cst_245 = arith.constant dense<0.000000e+00> : vector<2x128xf32>
    %488 = tpu.matmul %479, %402, %cst_245 {dimension_numbers = #tpu.dot_dimension_numbers<[1], [0], [0], [1], [0, 0, 1, 1], [], []>} : vector<2x32xbf16>, vector<32x128xbf16>, vector<2x128xf32> -> vector<2x128xf32>
    %489 = arith.addf %487, %488 : vector<2x128xf32>
    %490 = arith.negf %489 : vector<2x128xf32>
    %491 = math.exp %490 : vector<2x128xf32>
    %cst_246 = arith.constant 1.000000e+00 : f32
    %492 = vector.broadcast %cst_246 : f32 to vector<2x128xf32>
    %493 = arith.addf %492, %491 : vector<2x128xf32>
    %494 = arith.divf %492, %493 : vector<2x128xf32>
    %495 = math.tanh %489 : vector<2x128xf32>
    %496 = vector.extract_strided_slice %494 {offsets = [0, 0], sizes = [2, 32], strides = [1, 1]} : vector<2x128xf32> to vector<2x32xf32>
    %497 = vector.extract_strided_slice %494 {offsets = [0, 32], sizes = [2, 32], strides = [1, 1]} : vector<2x128xf32> to vector<2x32xf32>
    %498 = vector.extract_strided_slice %495 {offsets = [0, 64], sizes = [2, 32], strides = [1, 1]} : vector<2x128xf32> to vector<2x32xf32>
    %499 = vector.extract_strided_slice %494 {offsets = [0, 96], sizes = [2, 32], strides = [1, 1]} : vector<2x128xf32> to vector<2x32xf32>
    %500 = arith.mulf %497, %476 : vector<2x32xf32>
    %501 = arith.mulf %496, %498 : vector<2x32xf32>
    %502 = arith.addf %500, %501 : vector<2x32xf32>
    %503 = math.tanh %502 : vector<2x32xf32>
    %504 = arith.mulf %499, %503 : vector<2x32xf32>
    %505 = arith.truncf %504 : vector<2x32xf32> to vector<2x32xbf16>
    %cst_247 = arith.constant dense<0.000000e+00> : vector<2x128xf32>
    %506 = tpu.matmul %505, %404, %cst_247 {dimension_numbers = #tpu.dot_dimension_numbers<[1], [0], [0], [1], [0, 0, 1, 1], [], []>} : vector<2x32xbf16>, vector<32x128xbf16>, vector<2x128xf32> -> vector<2x128xf32>
    %507 = vector.broadcast %406 : vector<1x128xf32> to vector<2x128xf32>
    %508 = arith.addf %507, %506 : vector<2x128xf32>
    %c3_248 = arith.constant 3 : index
    %c0_249 = arith.constant 0 : index
    %c0_250 = arith.constant 0 : index
    %509 = vector.load %arg13[%c3_248, %c0_249, %c0_250] : memref<8x2x128xf32, #tpu.memory_space<vmem>>, vector<1x2x128xf32>
    %510 = vector.shape_cast %509 : vector<1x2x128xf32> to vector<2x128xf32>
    %511 = vector.shape_cast %508 : vector<2x128xf32> to vector<1x2x128xf32>
    tpu.vector_store %arg13[%c3_248, %c0_249, %c0_250], %511 {strides = array<i32>} : memref<8x2x128xf32, #tpu.memory_space<vmem>>, vector<1x2x128xf32>,
    %c4_251 = arith.constant 4 : index
    %c0_252 = arith.constant 0 : index
    %c0_253 = arith.constant 0 : index
    %512 = vector.load %arg14[%c4_251, %c0_252, %c0_253] : memref<8x2x128xf32, #tpu.memory_space<vmem>>, vector<1x2x128xf32>
    %513 = vector.shape_cast %512 : vector<1x2x128xf32> to vector<2x128xf32>
    %cst_254 = arith.constant dense<0.000000e+00> : vector<2x128xf32>
    %514 = tpu.matmul %505, %402, %cst_254 {dimension_numbers = #tpu.dot_dimension_numbers<[1], [0], [0], [1], [0, 0, 1, 1], [], []>} : vector<2x32xbf16>, vector<32x128xbf16>, vector<2x128xf32> -> vector<2x128xf32>
    %515 = arith.addf %513, %514 : vector<2x128xf32>
    %516 = arith.negf %515 : vector<2x128xf32>
    %517 = math.exp %516 : vector<2x128xf32>
    %cst_255 = arith.constant 1.000000e+00 : f32
    %518 = vector.broadcast %cst_255 : f32 to vector<2x128xf32>
    %519 = arith.addf %518, %517 : vector<2x128xf32>
    %520 = arith.divf %518, %519 : vector<2x128xf32>
    %521 = math.tanh %515 : vector<2x128xf32>
    %522 = vector.extract_strided_slice %520 {offsets = [0, 0], sizes = [2, 32], strides = [1, 1]} : vector<2x128xf32> to vector<2x32xf32>
    %523 = vector.extract_strided_slice %520 {offsets = [0, 32], sizes = [2, 32], strides = [1, 1]} : vector<2x128xf32> to vector<2x32xf32>
    %524 = vector.extract_strided_slice %521 {offsets = [0, 64], sizes = [2, 32], strides = [1, 1]} : vector<2x128xf32> to vector<2x32xf32>
    %525 = vector.extract_strided_slice %520 {offsets = [0, 96], sizes = [2, 32], strides = [1, 1]} : vector<2x128xf32> to vector<2x32xf32>
    %526 = arith.mulf %523, %502 : vector<2x32xf32>
    %527 = arith.mulf %522, %524 : vector<2x32xf32>
    %528 = arith.addf %526, %527 : vector<2x32xf32>
    %529 = math.tanh %528 : vector<2x32xf32>
    %530 = arith.mulf %525, %529 : vector<2x32xf32>
    %531 = arith.truncf %530 : vector<2x32xf32> to vector<2x32xbf16>
    %cst_256 = arith.constant dense<0.000000e+00> : vector<2x128xf32>
    %532 = tpu.matmul %531, %404, %cst_256 {dimension_numbers = #tpu.dot_dimension_numbers<[1], [0], [0], [1], [0, 0, 1, 1], [], []>} : vector<2x32xbf16>, vector<32x128xbf16>, vector<2x128xf32> -> vector<2x128xf32>
    %533 = vector.broadcast %406 : vector<1x128xf32> to vector<2x128xf32>
    %534 = arith.addf %533, %532 : vector<2x128xf32>
    %c4_257 = arith.constant 4 : index
    %c0_258 = arith.constant 0 : index
    %c0_259 = arith.constant 0 : index
    %535 = vector.load %arg13[%c4_257, %c0_258, %c0_259] : memref<8x2x128xf32, #tpu.memory_space<vmem>>, vector<1x2x128xf32>
    %536 = vector.shape_cast %535 : vector<1x2x128xf32> to vector<2x128xf32>
    %537 = vector.shape_cast %534 : vector<2x128xf32> to vector<1x2x128xf32>
    tpu.vector_store %arg13[%c4_257, %c0_258, %c0_259], %537 {strides = array<i32>} : memref<8x2x128xf32, #tpu.memory_space<vmem>>, vector<1x2x128xf32>,
    %c5_260 = arith.constant 5 : index
    %c0_261 = arith.constant 0 : index
    %c0_262 = arith.constant 0 : index
    %538 = vector.load %arg14[%c5_260, %c0_261, %c0_262] : memref<8x2x128xf32, #tpu.memory_space<vmem>>, vector<1x2x128xf32>
    %539 = vector.shape_cast %538 : vector<1x2x128xf32> to vector<2x128xf32>
    %cst_263 = arith.constant dense<0.000000e+00> : vector<2x128xf32>
    %540 = tpu.matmul %531, %402, %cst_263 {dimension_numbers = #tpu.dot_dimension_numbers<[1], [0], [0], [1], [0, 0, 1, 1], [], []>} : vector<2x32xbf16>, vector<32x128xbf16>, vector<2x128xf32> -> vector<2x128xf32>
    %541 = arith.addf %539, %540 : vector<2x128xf32>
    %542 = arith.negf %541 : vector<2x128xf32>
    %543 = math.exp %542 : vector<2x128xf32>
    %cst_264 = arith.constant 1.000000e+00 : f32
    %544 = vector.broadcast %cst_264 : f32 to vector<2x128xf32>
    %545 = arith.addf %544, %543 : vector<2x128xf32>
    %546 = arith.divf %544, %545 : vector<2x128xf32>
    %547 = math.tanh %541 : vector<2x128xf32>
    %548 = vector.extract_strided_slice %546 {offsets = [0, 0], sizes = [2, 32], strides = [1, 1]} : vector<2x128xf32> to vector<2x32xf32>
    %549 = vector.extract_strided_slice %546 {offsets = [0, 32], sizes = [2, 32], strides = [1, 1]} : vector<2x128xf32> to vector<2x32xf32>
    %550 = vector.extract_strided_slice %547 {offsets = [0, 64], sizes = [2, 32], strides = [1, 1]} : vector<2x128xf32> to vector<2x32xf32>
    %551 = vector.extract_strided_slice %546 {offsets = [0, 96], sizes = [2, 32], strides = [1, 1]} : vector<2x128xf32> to vector<2x32xf32>
    %552 = arith.mulf %549, %528 : vector<2x32xf32>
    %553 = arith.mulf %548, %550 : vector<2x32xf32>
    %554 = arith.addf %552, %553 : vector<2x32xf32>
    %555 = math.tanh %554 : vector<2x32xf32>
    %556 = arith.mulf %551, %555 : vector<2x32xf32>
    %557 = arith.truncf %556 : vector<2x32xf32> to vector<2x32xbf16>
    %cst_265 = arith.constant dense<0.000000e+00> : vector<2x128xf32>
    %558 = tpu.matmul %557, %404, %cst_265 {dimension_numbers = #tpu.dot_dimension_numbers<[1], [0], [0], [1], [0, 0, 1, 1], [], []>} : vector<2x32xbf16>, vector<32x128xbf16>, vector<2x128xf32> -> vector<2x128xf32>
    %559 = vector.broadcast %406 : vector<1x128xf32> to vector<2x128xf32>
    %560 = arith.addf %559, %558 : vector<2x128xf32>
    %c5_266 = arith.constant 5 : index
    %c0_267 = arith.constant 0 : index
    %c0_268 = arith.constant 0 : index
    %561 = vector.load %arg13[%c5_266, %c0_267, %c0_268] : memref<8x2x128xf32, #tpu.memory_space<vmem>>, vector<1x2x128xf32>
    %562 = vector.shape_cast %561 : vector<1x2x128xf32> to vector<2x128xf32>
    %563 = vector.shape_cast %560 : vector<2x128xf32> to vector<1x2x128xf32>
    tpu.vector_store %arg13[%c5_266, %c0_267, %c0_268], %563 {strides = array<i32>} : memref<8x2x128xf32, #tpu.memory_space<vmem>>, vector<1x2x128xf32>,
    %c6_269 = arith.constant 6 : index
    %c0_270 = arith.constant 0 : index
    %c0_271 = arith.constant 0 : index
    %564 = vector.load %arg14[%c6_269, %c0_270, %c0_271] : memref<8x2x128xf32, #tpu.memory_space<vmem>>, vector<1x2x128xf32>
    %565 = vector.shape_cast %564 : vector<1x2x128xf32> to vector<2x128xf32>
    %cst_272 = arith.constant dense<0.000000e+00> : vector<2x128xf32>
    %566 = tpu.matmul %557, %402, %cst_272 {dimension_numbers = #tpu.dot_dimension_numbers<[1], [0], [0], [1], [0, 0, 1, 1], [], []>} : vector<2x32xbf16>, vector<32x128xbf16>, vector<2x128xf32> -> vector<2x128xf32>
    %567 = arith.addf %565, %566 : vector<2x128xf32>
    %568 = arith.negf %567 : vector<2x128xf32>
    %569 = math.exp %568 : vector<2x128xf32>
    %cst_273 = arith.constant 1.000000e+00 : f32
    %570 = vector.broadcast %cst_273 : f32 to vector<2x128xf32>
    %571 = arith.addf %570, %569 : vector<2x128xf32>
    %572 = arith.divf %570, %571 : vector<2x128xf32>
    %573 = math.tanh %567 : vector<2x128xf32>
    %574 = vector.extract_strided_slice %572 {offsets = [0, 0], sizes = [2, 32], strides = [1, 1]} : vector<2x128xf32> to vector<2x32xf32>
    %575 = vector.extract_strided_slice %572 {offsets = [0, 32], sizes = [2, 32], strides = [1, 1]} : vector<2x128xf32> to vector<2x32xf32>
    %576 = vector.extract_strided_slice %573 {offsets = [0, 64], sizes = [2, 32], strides = [1, 1]} : vector<2x128xf32> to vector<2x32xf32>
    %577 = vector.extract_strided_slice %572 {offsets = [0, 96], sizes = [2, 32], strides = [1, 1]} : vector<2x128xf32> to vector<2x32xf32>
    %578 = arith.mulf %575, %554 : vector<2x32xf32>
    %579 = arith.mulf %574, %576 : vector<2x32xf32>
    %580 = arith.addf %578, %579 : vector<2x32xf32>
    %581 = math.tanh %580 : vector<2x32xf32>
    %582 = arith.mulf %577, %581 : vector<2x32xf32>
    %583 = arith.truncf %582 : vector<2x32xf32> to vector<2x32xbf16>
    %cst_274 = arith.constant dense<0.000000e+00> : vector<2x128xf32>
    %584 = tpu.matmul %583, %404, %cst_274 {dimension_numbers = #tpu.dot_dimension_numbers<[1], [0], [0], [1], [0, 0, 1, 1], [], []>} : vector<2x32xbf16>, vector<32x128xbf16>, vector<2x128xf32> -> vector<2x128xf32>
    %585 = vector.broadcast %406 : vector<1x128xf32> to vector<2x128xf32>
    %586 = arith.addf %585, %584 : vector<2x128xf32>
    %c6_275 = arith.constant 6 : index
    %c0_276 = arith.constant 0 : index
    %c0_277 = arith.constant 0 : index
    %587 = vector.load %arg13[%c6_275, %c0_276, %c0_277] : memref<8x2x128xf32, #tpu.memory_space<vmem>>, vector<1x2x128xf32>
    %588 = vector.shape_cast %587 : vector<1x2x128xf32> to vector<2x128xf32>
    %589 = vector.shape_cast %586 : vector<2x128xf32> to vector<1x2x128xf32>
    tpu.vector_store %arg13[%c6_275, %c0_276, %c0_277], %589 {strides = array<i32>} : memref<8x2x128xf32, #tpu.memory_space<vmem>>, vector<1x2x128xf32>,
    %c7_278 = arith.constant 7 : index
    %c0_279 = arith.constant 0 : index
    %c0_280 = arith.constant 0 : index
    %590 = vector.load %arg14[%c7_278, %c0_279, %c0_280] : memref<8x2x128xf32, #tpu.memory_space<vmem>>, vector<1x2x128xf32>
    %591 = vector.shape_cast %590 : vector<1x2x128xf32> to vector<2x128xf32>
    %cst_281 = arith.constant dense<0.000000e+00> : vector<2x128xf32>
    %592 = tpu.matmul %583, %402, %cst_281 {dimension_numbers = #tpu.dot_dimension_numbers<[1], [0], [0], [1], [0, 0, 1, 1], [], []>} : vector<2x32xbf16>, vector<32x128xbf16>, vector<2x128xf32> -> vector<2x128xf32>
    %593 = arith.addf %591, %592 : vector<2x128xf32>
    %594 = arith.negf %593 : vector<2x128xf32>
    %595 = math.exp %594 : vector<2x128xf32>
    %cst_282 = arith.constant 1.000000e+00 : f32
    %596 = vector.broadcast %cst_282 : f32 to vector<2x128xf32>
    %597 = arith.addf %596, %595 : vector<2x128xf32>
    %598 = arith.divf %596, %597 : vector<2x128xf32>
    %599 = math.tanh %593 : vector<2x128xf32>
    %600 = vector.extract_strided_slice %598 {offsets = [0, 0], sizes = [2, 32], strides = [1, 1]} : vector<2x128xf32> to vector<2x32xf32>
    %601 = vector.extract_strided_slice %598 {offsets = [0, 32], sizes = [2, 32], strides = [1, 1]} : vector<2x128xf32> to vector<2x32xf32>
    %602 = vector.extract_strided_slice %599 {offsets = [0, 64], sizes = [2, 32], strides = [1, 1]} : vector<2x128xf32> to vector<2x32xf32>
    %603 = vector.extract_strided_slice %598 {offsets = [0, 96], sizes = [2, 32], strides = [1, 1]} : vector<2x128xf32> to vector<2x32xf32>
    %604 = arith.mulf %601, %580 : vector<2x32xf32>
    %605 = arith.mulf %600, %602 : vector<2x32xf32>
    %606 = arith.addf %604, %605 : vector<2x32xf32>
    %607 = math.tanh %606 : vector<2x32xf32>
    %608 = arith.mulf %603, %607 : vector<2x32xf32>
    %609 = arith.truncf %608 : vector<2x32xf32> to vector<2x32xbf16>
    %cst_283 = arith.constant dense<0.000000e+00> : vector<2x128xf32>
    %610 = tpu.matmul %609, %404, %cst_283 {dimension_numbers = #tpu.dot_dimension_numbers<[1], [0], [0], [1], [0, 0, 1, 1], [], []>} : vector<2x32xbf16>, vector<32x128xbf16>, vector<2x128xf32> -> vector<2x128xf32>
    %611 = vector.broadcast %406 : vector<1x128xf32> to vector<2x128xf32>
    %612 = arith.addf %611, %610 : vector<2x128xf32>
    %c7_284 = arith.constant 7 : index
    %c0_285 = arith.constant 0 : index
    %c0_286 = arith.constant 0 : index
    %613 = vector.load %arg13[%c7_284, %c0_285, %c0_286] : memref<8x2x128xf32, #tpu.memory_space<vmem>>, vector<1x2x128xf32>
    %614 = vector.shape_cast %613 : vector<1x2x128xf32> to vector<2x128xf32>
    %615 = vector.shape_cast %612 : vector<2x128xf32> to vector<1x2x128xf32>
    tpu.vector_store %arg13[%c7_284, %c0_285, %c0_286], %615 {strides = array<i32>} : memref<8x2x128xf32, #tpu.memory_space<vmem>>, vector<1x2x128xf32>,
    %c1_287 = arith.constant 1 : index
    %c0_288 = arith.constant 0 : index
    %c0_289 = arith.constant 0 : index
    %616 = vector.load %arg11[%c1_287, %c0_288, %c0_289] : memref<3x2x32xf32, #tpu.memory_space<vmem>>, vector<1x2x32xf32>
    %617 = vector.shape_cast %616 : vector<1x2x32xf32> to vector<2x32xf32>
    %618 = vector.shape_cast %608 : vector<2x32xf32> to vector<1x2x32xf32>
    tpu.vector_store %arg11[%c1_287, %c0_288, %c0_289], %618 {strides = array<i32>} : memref<3x2x32xf32, #tpu.memory_space<vmem>>, vector<1x2x32xf32>,
    %c1_290 = arith.constant 1 : index
    %c0_291 = arith.constant 0 : index
    %c0_292 = arith.constant 0 : index
    %619 = vector.load %arg12[%c1_290, %c0_291, %c0_292] : memref<3x2x32xf32, #tpu.memory_space<vmem>>, vector<1x2x32xf32>
    %620 = vector.shape_cast %619 : vector<1x2x32xf32> to vector<2x32xf32>
    %621 = vector.shape_cast %606 : vector<2x32xf32> to vector<1x2x32xf32>
    tpu.vector_store %arg12[%c1_290, %c0_291, %c0_292], %621 {strides = array<i32>} : memref<3x2x32xf32, #tpu.memory_space<vmem>>, vector<1x2x32xf32>,
    %c1_293 = arith.constant 1 : index
    %622 = memref.load %arg1[%c1_293] : memref<2xi32, #tpu.memory_space<smem>>
    %c1_294 = arith.constant 1 : index
    %623 = memref.load %arg2[%c1_294] : memref<2xi32, #tpu.memory_space<smem>>
    %624 = arith.index_cast %622 : i32 to index
    %c0_295 = arith.constant 0 : index
    %c0_296 = arith.constant 0 : index
    %625 = vector.load %arg7[%624, %c0_295, %c0_296] : memref<10x3x32xf32, #tpu.memory_space<vmem>>, vector<1x3x32xf32>
    %626 = vector.shape_cast %625 : vector<1x3x32xf32> to vector<3x32xf32>
    %627 = vector.extract_strided_slice %626 {offsets = [1, 0], sizes = [1, 32], strides = [1, 1]} : vector<3x32xf32> to vector<1x32xf32>
    %628 = arith.index_cast %623 : i32 to index
    %c0_297 = arith.constant 0 : index
    %c0_298 = arith.constant 0 : index
    %629 = vector.load %arg8[%628, %c0_297, %c0_298] : memref<12x3x32xf32, #tpu.memory_space<vmem>>, vector<1x3x32xf32>
    %630 = vector.shape_cast %629 : vector<1x3x32xf32> to vector<3x32xf32>
    %631 = vector.extract_strided_slice %630 {offsets = [1, 0], sizes = [1, 32], strides = [1, 1]} : vector<3x32xf32> to vector<1x32xf32>
    %632 = arith.addf %627, %631 : vector<1x32xf32>
    %633 = arith.index_cast %622 : i32 to index
    %c0_299 = arith.constant 0 : index
    %c0_300 = arith.constant 0 : index
    %634 = vector.load %arg9[%633, %c0_299, %c0_300] : memref<10x3x32xf32, #tpu.memory_space<vmem>>, vector<1x3x32xf32>
    %635 = vector.shape_cast %634 : vector<1x3x32xf32> to vector<3x32xf32>
    %636 = vector.extract_strided_slice %635 {offsets = [1, 0], sizes = [1, 32], strides = [1, 1]} : vector<3x32xf32> to vector<1x32xf32>
    %637 = arith.index_cast %623 : i32 to index
    %c0_301 = arith.constant 0 : index
    %c0_302 = arith.constant 0 : index
    %638 = vector.load %arg10[%637, %c0_301, %c0_302] : memref<12x3x32xf32, #tpu.memory_space<vmem>>, vector<1x3x32xf32>
    %639 = vector.shape_cast %638 : vector<1x3x32xf32> to vector<3x32xf32>
    %640 = vector.extract_strided_slice %639 {offsets = [1, 0], sizes = [1, 32], strides = [1, 1]} : vector<3x32xf32> to vector<1x32xf32>
    %641 = arith.addf %636, %640 : vector<1x32xf32>
    %c1_303 = arith.constant 1 : index
    %642 = memref.load %arg1[%c1_303] : memref<2xi32, #tpu.memory_space<smem>>
    %c1_304 = arith.constant 1 : index
    %643 = memref.load %arg2[%c1_304] : memref<2xi32, #tpu.memory_space<smem>>
    %644 = arith.index_cast %642 : i32 to index
    %c0_305 = arith.constant 0 : index
    %c0_306 = arith.constant 0 : index
    %645 = vector.load %arg7[%644, %c0_305, %c0_306] : memref<10x3x32xf32, #tpu.memory_space<vmem>>, vector<1x3x32xf32>
    %646 = vector.shape_cast %645 : vector<1x3x32xf32> to vector<3x32xf32>
    %647 = vector.extract_strided_slice %646 {offsets = [2, 0], sizes = [1, 32], strides = [1, 1]} : vector<3x32xf32> to vector<1x32xf32>
    %648 = arith.index_cast %643 : i32 to index
    %c0_307 = arith.constant 0 : index
    %c0_308 = arith.constant 0 : index
    %649 = vector.load %arg8[%648, %c0_307, %c0_308] : memref<12x3x32xf32, #tpu.memory_space<vmem>>, vector<1x3x32xf32>
    %650 = vector.shape_cast %649 : vector<1x3x32xf32> to vector<3x32xf32>
    %651 = vector.extract_strided_slice %650 {offsets = [2, 0], sizes = [1, 32], strides = [1, 1]} : vector<3x32xf32> to vector<1x32xf32>
    %652 = arith.addf %647, %651 : vector<1x32xf32>
    %653 = arith.index_cast %642 : i32 to index
    %c0_309 = arith.constant 0 : index
    %c0_310 = arith.constant 0 : index
    %654 = vector.load %arg9[%653, %c0_309, %c0_310] : memref<10x3x32xf32, #tpu.memory_space<vmem>>, vector<1x3x32xf32>
    %655 = vector.shape_cast %654 : vector<1x3x32xf32> to vector<3x32xf32>
    %656 = vector.extract_strided_slice %655 {offsets = [2, 0], sizes = [1, 32], strides = [1, 1]} : vector<3x32xf32> to vector<1x32xf32>
    %657 = arith.index_cast %643 : i32 to index
    %c0_311 = arith.constant 0 : index
    %c0_312 = arith.constant 0 : index
    %658 = vector.load %arg10[%657, %c0_311, %c0_312] : memref<12x3x32xf32, #tpu.memory_space<vmem>>, vector<1x3x32xf32>
    %659 = vector.shape_cast %658 : vector<1x3x32xf32> to vector<3x32xf32>
    %660 = vector.extract_strided_slice %659 {offsets = [2, 0], sizes = [1, 32], strides = [1, 1]} : vector<3x32xf32> to vector<1x32xf32>
    %661 = arith.addf %656, %660 : vector<1x32xf32>
    %662 = tpu.concatenate %632, %652 in 0 : vector<1x32xf32>, vector<1x32xf32> -> vector<2x32xf32>
    %663 = tpu.concatenate %641, %661 in 0 : vector<1x32xf32>, vector<1x32xf32> -> vector<2x32xf32>
    %c2_313 = arith.constant 2 : index
    %c0_314 = arith.constant 0 : index
    %c0_315 = arith.constant 0 : index
    %664 = vector.load %arg5[%c2_313, %c0_314, %c0_315] : memref<3x32x128xbf16, #tpu.memory_space<vmem>>, vector<1x32x128xbf16>
    %665 = vector.shape_cast %664 : vector<1x32x128xbf16> to vector<32x128xbf16>
    %666 = arith.truncf %662 : vector<2x32xf32> to vector<2x32xbf16>
    %c0_316 = arith.constant 0 : index
    %c0_317 = arith.constant 0 : index
    %c0_318 = arith.constant 0 : index
    %667 = vector.load %arg13[%c0_316, %c0_317, %c0_318] : memref<8x2x128xf32, #tpu.memory_space<vmem>>, vector<1x2x128xf32>
    %668 = vector.shape_cast %667 : vector<1x2x128xf32> to vector<2x128xf32>
    %cst_319 = arith.constant dense<0.000000e+00> : vector<2x128xf32>
    %669 = tpu.matmul %666, %665, %cst_319 {dimension_numbers = #tpu.dot_dimension_numbers<[1], [0], [0], [1], [0, 0, 1, 1], [], []>} : vector<2x32xbf16>, vector<32x128xbf16>, vector<2x128xf32> -> vector<2x128xf32>
    %670 = arith.addf %668, %669 : vector<2x128xf32>
    %671 = arith.negf %670 : vector<2x128xf32>
    %672 = math.exp %671 : vector<2x128xf32>
    %cst_320 = arith.constant 1.000000e+00 : f32
    %673 = vector.broadcast %cst_320 : f32 to vector<2x128xf32>
    %674 = arith.addf %673, %672 : vector<2x128xf32>
    %675 = arith.divf %673, %674 : vector<2x128xf32>
    %676 = math.tanh %670 : vector<2x128xf32>
    %677 = vector.extract_strided_slice %675 {offsets = [0, 0], sizes = [2, 32], strides = [1, 1]} : vector<2x128xf32> to vector<2x32xf32>
    %678 = vector.extract_strided_slice %675 {offsets = [0, 32], sizes = [2, 32], strides = [1, 1]} : vector<2x128xf32> to vector<2x32xf32>
    %679 = vector.extract_strided_slice %676 {offsets = [0, 64], sizes = [2, 32], strides = [1, 1]} : vector<2x128xf32> to vector<2x32xf32>
    %680 = vector.extract_strided_slice %675 {offsets = [0, 96], sizes = [2, 32], strides = [1, 1]} : vector<2x128xf32> to vector<2x32xf32>
    %681 = arith.mulf %678, %663 : vector<2x32xf32>
    %682 = arith.mulf %677, %679 : vector<2x32xf32>
    %683 = arith.addf %681, %682 : vector<2x32xf32>
    %684 = math.tanh %683 : vector<2x32xf32>
    %685 = arith.mulf %680, %684 : vector<2x32xf32>
    %686 = arith.truncf %685 : vector<2x32xf32> to vector<2x32xbf16>
    %c1_321 = arith.constant 1 : index
    %c0_322 = arith.constant 0 : index
    %c0_323 = arith.constant 0 : index
    %687 = vector.load %arg13[%c1_321, %c0_322, %c0_323] : memref<8x2x128xf32, #tpu.memory_space<vmem>>, vector<1x2x128xf32>
    %688 = vector.shape_cast %687 : vector<1x2x128xf32> to vector<2x128xf32>
    %cst_324 = arith.constant dense<0.000000e+00> : vector<2x128xf32>
    %689 = tpu.matmul %686, %665, %cst_324 {dimension_numbers = #tpu.dot_dimension_numbers<[1], [0], [0], [1], [0, 0, 1, 1], [], []>} : vector<2x32xbf16>, vector<32x128xbf16>, vector<2x128xf32> -> vector<2x128xf32>
    %690 = arith.addf %688, %689 : vector<2x128xf32>
    %691 = arith.negf %690 : vector<2x128xf32>
    %692 = math.exp %691 : vector<2x128xf32>
    %cst_325 = arith.constant 1.000000e+00 : f32
    %693 = vector.broadcast %cst_325 : f32 to vector<2x128xf32>
    %694 = arith.addf %693, %692 : vector<2x128xf32>
    %695 = arith.divf %693, %694 : vector<2x128xf32>
    %696 = math.tanh %690 : vector<2x128xf32>
    %697 = vector.extract_strided_slice %695 {offsets = [0, 0], sizes = [2, 32], strides = [1, 1]} : vector<2x128xf32> to vector<2x32xf32>
    %698 = vector.extract_strided_slice %695 {offsets = [0, 32], sizes = [2, 32], strides = [1, 1]} : vector<2x128xf32> to vector<2x32xf32>
    %699 = vector.extract_strided_slice %696 {offsets = [0, 64], sizes = [2, 32], strides = [1, 1]} : vector<2x128xf32> to vector<2x32xf32>
    %700 = vector.extract_strided_slice %695 {offsets = [0, 96], sizes = [2, 32], strides = [1, 1]} : vector<2x128xf32> to vector<2x32xf32>
    %701 = arith.mulf %698, %683 : vector<2x32xf32>
    %702 = arith.mulf %697, %699 : vector<2x32xf32>
    %703 = arith.addf %701, %702 : vector<2x32xf32>
    %704 = math.tanh %703 : vector<2x32xf32>
    %705 = arith.mulf %700, %704 : vector<2x32xf32>
    %706 = arith.truncf %705 : vector<2x32xf32> to vector<2x32xbf16>
    %c2_326 = arith.constant 2 : index
    %c0_327 = arith.constant 0 : index
    %c0_328 = arith.constant 0 : index
    %707 = vector.load %arg13[%c2_326, %c0_327, %c0_328] : memref<8x2x128xf32, #tpu.memory_space<vmem>>, vector<1x2x128xf32>
    %708 = vector.shape_cast %707 : vector<1x2x128xf32> to vector<2x128xf32>
    %cst_329 = arith.constant dense<0.000000e+00> : vector<2x128xf32>
    %709 = tpu.matmul %706, %665, %cst_329 {dimension_numbers = #tpu.dot_dimension_numbers<[1], [0], [0], [1], [0, 0, 1, 1], [], []>} : vector<2x32xbf16>, vector<32x128xbf16>, vector<2x128xf32> -> vector<2x128xf32>
    %710 = arith.addf %708, %709 : vector<2x128xf32>
    %711 = arith.negf %710 : vector<2x128xf32>
    %712 = math.exp %711 : vector<2x128xf32>
    %cst_330 = arith.constant 1.000000e+00 : f32
    %713 = vector.broadcast %cst_330 : f32 to vector<2x128xf32>
    %714 = arith.addf %713, %712 : vector<2x128xf32>
    %715 = arith.divf %713, %714 : vector<2x128xf32>
    %716 = math.tanh %710 : vector<2x128xf32>
    %717 = vector.extract_strided_slice %715 {offsets = [0, 0], sizes = [2, 32], strides = [1, 1]} : vector<2x128xf32> to vector<2x32xf32>
    %718 = vector.extract_strided_slice %715 {offsets = [0, 32], sizes = [2, 32], strides = [1, 1]} : vector<2x128xf32> to vector<2x32xf32>
    %719 = vector.extract_strided_slice %716 {offsets = [0, 64], sizes = [2, 32], strides = [1, 1]} : vector<2x128xf32> to vector<2x32xf32>
    %720 = vector.extract_strided_slice %715 {offsets = [0, 96], sizes = [2, 32], strides = [1, 1]} : vector<2x128xf32> to vector<2x32xf32>
    %721 = arith.mulf %718, %703 : vector<2x32xf32>
    %722 = arith.mulf %717, %719 : vector<2x32xf32>
    %723 = arith.addf %721, %722 : vector<2x32xf32>
    %724 = math.tanh %723 : vector<2x32xf32>
    %725 = arith.mulf %720, %724 : vector<2x32xf32>
    %726 = arith.truncf %725 : vector<2x32xf32> to vector<2x32xbf16>
    %c3_331 = arith.constant 3 : index
    %c0_332 = arith.constant 0 : index
    %c0_333 = arith.constant 0 : index
    %727 = vector.load %arg13[%c3_331, %c0_332, %c0_333] : memref<8x2x128xf32, #tpu.memory_space<vmem>>, vector<1x2x128xf32>
    %728 = vector.shape_cast %727 : vector<1x2x128xf32> to vector<2x128xf32>
    %cst_334 = arith.constant dense<0.000000e+00> : vector<2x128xf32>
    %729 = tpu.matmul %726, %665, %cst_334 {dimension_numbers = #tpu.dot_dimension_numbers<[1], [0], [0], [1], [0, 0, 1, 1], [], []>} : vector<2x32xbf16>, vector<32x128xbf16>, vector<2x128xf32> -> vector<2x128xf32>
    %730 = arith.addf %728, %729 : vector<2x128xf32>
    %731 = arith.negf %730 : vector<2x128xf32>
    %732 = math.exp %731 : vector<2x128xf32>
    %cst_335 = arith.constant 1.000000e+00 : f32
    %733 = vector.broadcast %cst_335 : f32 to vector<2x128xf32>
    %734 = arith.addf %733, %732 : vector<2x128xf32>
    %735 = arith.divf %733, %734 : vector<2x128xf32>
    %736 = math.tanh %730 : vector<2x128xf32>
    %737 = vector.extract_strided_slice %735 {offsets = [0, 0], sizes = [2, 32], strides = [1, 1]} : vector<2x128xf32> to vector<2x32xf32>
    %738 = vector.extract_strided_slice %735 {offsets = [0, 32], sizes = [2, 32], strides = [1, 1]} : vector<2x128xf32> to vector<2x32xf32>
    %739 = vector.extract_strided_slice %736 {offsets = [0, 64], sizes = [2, 32], strides = [1, 1]} : vector<2x128xf32> to vector<2x32xf32>
    %740 = vector.extract_strided_slice %735 {offsets = [0, 96], sizes = [2, 32], strides = [1, 1]} : vector<2x128xf32> to vector<2x32xf32>
    %741 = arith.mulf %738, %723 : vector<2x32xf32>
    %742 = arith.mulf %737, %739 : vector<2x32xf32>
    %743 = arith.addf %741, %742 : vector<2x32xf32>
    %744 = math.tanh %743 : vector<2x32xf32>
    %745 = arith.mulf %740, %744 : vector<2x32xf32>
    %746 = arith.truncf %745 : vector<2x32xf32> to vector<2x32xbf16>
    %c4_336 = arith.constant 4 : index
    %c0_337 = arith.constant 0 : index
    %c0_338 = arith.constant 0 : index
    %747 = vector.load %arg13[%c4_336, %c0_337, %c0_338] : memref<8x2x128xf32, #tpu.memory_space<vmem>>, vector<1x2x128xf32>
    %748 = vector.shape_cast %747 : vector<1x2x128xf32> to vector<2x128xf32>
    %cst_339 = arith.constant dense<0.000000e+00> : vector<2x128xf32>
    %749 = tpu.matmul %746, %665, %cst_339 {dimension_numbers = #tpu.dot_dimension_numbers<[1], [0], [0], [1], [0, 0, 1, 1], [], []>} : vector<2x32xbf16>, vector<32x128xbf16>, vector<2x128xf32> -> vector<2x128xf32>
    %750 = arith.addf %748, %749 : vector<2x128xf32>
    %751 = arith.negf %750 : vector<2x128xf32>
    %752 = math.exp %751 : vector<2x128xf32>
    %cst_340 = arith.constant 1.000000e+00 : f32
    %753 = vector.broadcast %cst_340 : f32 to vector<2x128xf32>
    %754 = arith.addf %753, %752 : vector<2x128xf32>
    %755 = arith.divf %753, %754 : vector<2x128xf32>
    %756 = math.tanh %750 : vector<2x128xf32>
    %757 = vector.extract_strided_slice %755 {offsets = [0, 0], sizes = [2, 32], strides = [1, 1]} : vector<2x128xf32> to vector<2x32xf32>
    %758 = vector.extract_strided_slice %755 {offsets = [0, 32], sizes = [2, 32], strides = [1, 1]} : vector<2x128xf32> to vector<2x32xf32>
    %759 = vector.extract_strided_slice %756 {offsets = [0, 64], sizes = [2, 32], strides = [1, 1]} : vector<2x128xf32> to vector<2x32xf32>
    %760 = vector.extract_strided_slice %755 {offsets = [0, 96], sizes = [2, 32], strides = [1, 1]} : vector<2x128xf32> to vector<2x32xf32>
    %761 = arith.mulf %758, %743 : vector<2x32xf32>
    %762 = arith.mulf %757, %759 : vector<2x32xf32>
    %763 = arith.addf %761, %762 : vector<2x32xf32>
    %764 = math.tanh %763 : vector<2x32xf32>
    %765 = arith.mulf %760, %764 : vector<2x32xf32>
    %766 = arith.truncf %765 : vector<2x32xf32> to vector<2x32xbf16>
    %c5_341 = arith.constant 5 : index
    %c0_342 = arith.constant 0 : index
    %c0_343 = arith.constant 0 : index
    %767 = vector.load %arg13[%c5_341, %c0_342, %c0_343] : memref<8x2x128xf32, #tpu.memory_space<vmem>>, vector<1x2x128xf32>
    %768 = vector.shape_cast %767 : vector<1x2x128xf32> to vector<2x128xf32>
    %cst_344 = arith.constant dense<0.000000e+00> : vector<2x128xf32>
    %769 = tpu.matmul %766, %665, %cst_344 {dimension_numbers = #tpu.dot_dimension_numbers<[1], [0], [0], [1], [0, 0, 1, 1], [], []>} : vector<2x32xbf16>, vector<32x128xbf16>, vector<2x128xf32> -> vector<2x128xf32>
    %770 = arith.addf %768, %769 : vector<2x128xf32>
    %771 = arith.negf %770 : vector<2x128xf32>
    %772 = math.exp %771 : vector<2x128xf32>
    %cst_345 = arith.constant 1.000000e+00 : f32
    %773 = vector.broadcast %cst_345 : f32 to vector<2x128xf32>
    %774 = arith.addf %773, %772 : vector<2x128xf32>
    %775 = arith.divf %773, %774 : vector<2x128xf32>
    %776 = math.tanh %770 : vector<2x128xf32>
    %777 = vector.extract_strided_slice %775 {offsets = [0, 0], sizes = [2, 32], strides = [1, 1]} : vector<2x128xf32> to vector<2x32xf32>
    %778 = vector.extract_strided_slice %775 {offsets = [0, 32], sizes = [2, 32], strides = [1, 1]} : vector<2x128xf32> to vector<2x32xf32>
    %779 = vector.extract_strided_slice %776 {offsets = [0, 64], sizes = [2, 32], strides = [1, 1]} : vector<2x128xf32> to vector<2x32xf32>
    %780 = vector.extract_strided_slice %775 {offsets = [0, 96], sizes = [2, 32], strides = [1, 1]} : vector<2x128xf32> to vector<2x32xf32>
    %781 = arith.mulf %778, %763 : vector<2x32xf32>
    %782 = arith.mulf %777, %779 : vector<2x32xf32>
    %783 = arith.addf %781, %782 : vector<2x32xf32>
    %784 = math.tanh %783 : vector<2x32xf32>
    %785 = arith.mulf %780, %784 : vector<2x32xf32>
    %786 = arith.truncf %785 : vector<2x32xf32> to vector<2x32xbf16>
    %c6_346 = arith.constant 6 : index
    %c0_347 = arith.constant 0 : index
    %c0_348 = arith.constant 0 : index
    %787 = vector.load %arg13[%c6_346, %c0_347, %c0_348] : memref<8x2x128xf32, #tpu.memory_space<vmem>>, vector<1x2x128xf32>
    %788 = vector.shape_cast %787 : vector<1x2x128xf32> to vector<2x128xf32>
    %cst_349 = arith.constant dense<0.000000e+00> : vector<2x128xf32>
    %789 = tpu.matmul %786, %665, %cst_349 {dimension_numbers = #tpu.dot_dimension_numbers<[1], [0], [0], [1], [0, 0, 1, 1], [], []>} : vector<2x32xbf16>, vector<32x128xbf16>, vector<2x128xf32> -> vector<2x128xf32>
    %790 = arith.addf %788, %789 : vector<2x128xf32>
    %791 = arith.negf %790 : vector<2x128xf32>
    %792 = math.exp %791 : vector<2x128xf32>
    %cst_350 = arith.constant 1.000000e+00 : f32
    %793 = vector.broadcast %cst_350 : f32 to vector<2x128xf32>
    %794 = arith.addf %793, %792 : vector<2x128xf32>
    %795 = arith.divf %793, %794 : vector<2x128xf32>
    %796 = math.tanh %790 : vector<2x128xf32>
    %797 = vector.extract_strided_slice %795 {offsets = [0, 0], sizes = [2, 32], strides = [1, 1]} : vector<2x128xf32> to vector<2x32xf32>
    %798 = vector.extract_strided_slice %795 {offsets = [0, 32], sizes = [2, 32], strides = [1, 1]} : vector<2x128xf32> to vector<2x32xf32>
    %799 = vector.extract_strided_slice %796 {offsets = [0, 64], sizes = [2, 32], strides = [1, 1]} : vector<2x128xf32> to vector<2x32xf32>
    %800 = vector.extract_strided_slice %795 {offsets = [0, 96], sizes = [2, 32], strides = [1, 1]} : vector<2x128xf32> to vector<2x32xf32>
    %801 = arith.mulf %798, %783 : vector<2x32xf32>
    %802 = arith.mulf %797, %799 : vector<2x32xf32>
    %803 = arith.addf %801, %802 : vector<2x32xf32>
    %804 = math.tanh %803 : vector<2x32xf32>
    %805 = arith.mulf %800, %804 : vector<2x32xf32>
    %806 = arith.truncf %805 : vector<2x32xf32> to vector<2x32xbf16>
    %c7_351 = arith.constant 7 : index
    %c0_352 = arith.constant 0 : index
    %c0_353 = arith.constant 0 : index
    %807 = vector.load %arg13[%c7_351, %c0_352, %c0_353] : memref<8x2x128xf32, #tpu.memory_space<vmem>>, vector<1x2x128xf32>
    %808 = vector.shape_cast %807 : vector<1x2x128xf32> to vector<2x128xf32>
    %cst_354 = arith.constant dense<0.000000e+00> : vector<2x128xf32>
    %809 = tpu.matmul %806, %665, %cst_354 {dimension_numbers = #tpu.dot_dimension_numbers<[1], [0], [0], [1], [0, 0, 1, 1], [], []>} : vector<2x32xbf16>, vector<32x128xbf16>, vector<2x128xf32> -> vector<2x128xf32>
    %810 = arith.addf %808, %809 : vector<2x128xf32>
    %811 = arith.negf %810 : vector<2x128xf32>
    %812 = math.exp %811 : vector<2x128xf32>
    %cst_355 = arith.constant 1.000000e+00 : f32
    %813 = vector.broadcast %cst_355 : f32 to vector<2x128xf32>
    %814 = arith.addf %813, %812 : vector<2x128xf32>
    %815 = arith.divf %813, %814 : vector<2x128xf32>
    %816 = math.tanh %810 : vector<2x128xf32>
    %817 = vector.extract_strided_slice %815 {offsets = [0, 0], sizes = [2, 32], strides = [1, 1]} : vector<2x128xf32> to vector<2x32xf32>
    %818 = vector.extract_strided_slice %815 {offsets = [0, 32], sizes = [2, 32], strides = [1, 1]} : vector<2x128xf32> to vector<2x32xf32>
    %819 = vector.extract_strided_slice %816 {offsets = [0, 64], sizes = [2, 32], strides = [1, 1]} : vector<2x128xf32> to vector<2x32xf32>
    %820 = vector.extract_strided_slice %815 {offsets = [0, 96], sizes = [2, 32], strides = [1, 1]} : vector<2x128xf32> to vector<2x32xf32>
    %821 = arith.mulf %818, %803 : vector<2x32xf32>
    %822 = arith.mulf %817, %819 : vector<2x32xf32>
    %823 = arith.addf %821, %822 : vector<2x32xf32>
    %824 = math.tanh %823 : vector<2x32xf32>
    %825 = arith.mulf %820, %824 : vector<2x32xf32>
    %c2_356 = arith.constant 2 : index
    %c0_357 = arith.constant 0 : index
    %c0_358 = arith.constant 0 : index
    %826 = vector.load %arg11[%c2_356, %c0_357, %c0_358] : memref<3x2x32xf32, #tpu.memory_space<vmem>>, vector<1x2x32xf32>
    %827 = vector.shape_cast %826 : vector<1x2x32xf32> to vector<2x32xf32>
    %828 = vector.shape_cast %825 : vector<2x32xf32> to vector<1x2x32xf32>
    tpu.vector_store %arg11[%c2_356, %c0_357, %c0_358], %828 {strides = array<i32>} : memref<3x2x32xf32, #tpu.memory_space<vmem>>, vector<1x2x32xf32>,
    %c2_359 = arith.constant 2 : index
    %c0_360 = arith.constant 0 : index
    %c0_361 = arith.constant 0 : index
    %829 = vector.load %arg12[%c2_359, %c0_360, %c0_361] : memref<3x2x32xf32, #tpu.memory_space<vmem>>, vector<1x2x32xf32>
    %830 = vector.shape_cast %829 : vector<1x2x32xf32> to vector<2x32xf32>
    %831 = vector.shape_cast %823 : vector<2x32xf32> to vector<1x2x32xf32>
    tpu.vector_store %arg12[%c2_359, %c0_360, %c0_361], %831 {strides = array<i32>} : memref<3x2x32xf32, #tpu.memory_space<vmem>>, vector<1x2x32xf32>,
    return
  }
}

</mosaic_0001>

<bundles_post_ra>
// kernel: pitg_encoder_forward.1
= control target key start
LH: loop header
LB: loop body
LE: loop exit
PB: predicated region body
PF: predicated region fallthrough
CT: control target
= control target key end

     0   :  { %18 = vsyncpa [#allocation7], 0  ;;  %s4772_s0 = inlined_call_operand.vmem [shape: s32[2,8], index: 0, kind: input, shape index: {}]   ;;  %s4773_s1 = inlined_call_operand.vmem [shape: s32[2], index: 1, kind: input, shape index: {}]   ;;  %s4774_s2 = inlined_call_operand.vmem [shape: s32[2], index: 2, kind: input, shape index: {}]   ;;  %s4775_s3 = inlined_call_operand.hbm [shape: f32[20,1,128], index: 3, kind: input, shape index: {}]   ;;  %s4776_s4 = inlined_call_operand.hbm [shape: bf16[2,32,128], index: 4, kind: input, shape index: {}]   ;;  %s4777_s5 = inlined_call_operand.hbm [shape: bf16[3,32,128], index: 5, kind: input, shape index: {}]   ;;  %s4778_s6 = inlined_call_operand.hbm [shape: f32[2,1,128], index: 6, kind: input, shape index: {}]   ;;  %s4779_s7 = inlined_call_operand.hbm [shape: f32[10,3,32], index: 7, kind: input, shape index: {}]   ;;  %s4780_s8 = inlined_call_operand.hbm [shape: f32[12,3,32], index: 8, kind: input, shape index: {}]   ;;  %s4781_s9 = inlined_call_operand.hbm [shape: f32[10,3,32], index: 9, kind: input, shape index: {}]   ;;  %s4782_s10 = inlined_call_operand.hbm [shape: f32[12,3,32], index: 10, kind: input, shape index: {}]   ;;  %s4783_s11 = inlined_call_operand.hbm [shape: f32[3,2,32], index: 11, kind: output, shape index: {0}]   ;;  %s4784_s12 = inlined_call_operand.hbm [shape: f32[3,2,32], index: 12, kind: output, shape index: {1}]  }
   0x1   :  { %19 = vsyncpa [#allocation9], 0 }
   0x2   :  { %20 = vsyncpa [#allocation5], 0 }
   0x3   :  { %21 = vsyncpa [#allocation13], 0 }
   0x4   :  { %22 = vsyncpa [#allocation16], 0 }
   0x5   :  { %23 = vsyncpa [#allocation19], 0 }
   0x6   :  { %24 = vsyncpa [#allocation22], 0 }
   0x7   :  { %25 = vsyncpa [#allocation6], 0  ;;  %s43_s23 = sshll.u32 %s4773_s1, 4  ;;  %s44_s23 = int_to_ptr.vmem [resolvable:$true] %s43_s23 }
   0x8   :  { %26 = vsyncpa [#allocation25], 0  ;;  %s3829_s24 = scalar_lea.vmem %s44_s23, 16  ;;  %p3834_p1 = scmp.lt.s32.totalorder %s44_s23, %s44_s23 }
   0x9   :  { %p3830_p0 = scmp.ne.s32.totalorder %s44_s23, %s3829_s24  ;;  %p3835_p2 = scmp.lt.s32.totalorder %s3829_s24, %s3829_s24 }
   0xb   :  { %p3836_p3 = por %p3835_p2, %p3834_p1 }
   0xd   :  { %p3837_p4 = pnand %p3836_p3, %p3830_p0 }
   0xf   :  { %3840 = shalt.err (!%p3837_p4)
}
  0x10   :  { %s4083_s25 = smov [#allocation8]   ;;  %s4084_s26 = smov [#allocation12]  }
  0x11   :  { %46 = dma.vmem_to_smem %s44_s23, 16, %s4083_s25, [#allocation9]  }
  0x12   :  { %s74_s27 = sshll.u32 %s4084_s26, 4  ;;  %s75_s27 = int_to_ptr.vmem [resolvable:$true] %s74_s27 }
  0x13   :  { %s3849_s28 = scalar_lea.vmem %s75_s27, 512  ;;  %p3854_p6 = scmp.lt.s32.totalorder %s75_s27, %s75_s27 }
  0x14   :  { %p3850_p5 = scmp.ne.s32.totalorder %s75_s27, %s3849_s28  ;;  %p3855_p7 = scmp.lt.s32.totalorder %s3849_s28, %s3849_s28 }
  0x16   :  { %p3856_p8 = por %p3855_p7, %p3854_p6 }
  0x18   :  { %p3857_p9 = pnand %p3856_p8, %p3850_p5 }
  0x1a   :  { %3860 = shalt.err (!%p3857_p9)
}
  0x1b   :  { %s4085_s1 = smov 64   ;;  %s4086_s29 = smov 4  }
  0x1c   :  { %80 = dma.hbm_to_vmem [thread:$0]  %s4776_s4, 512, %s75_s27, [#allocation13], %s4085_s1, %s4085_s1, %s4086_s29  }
  0x1d   :  { %s4087_s14 = smov [#allocation15]   ;;  %s4088_s16 = smov [#allocation18]  }
  0x1e   :  { %s98_s15 = sshll.u32 %s4087_s14, 4  ;;  %s122_s17 = sshll.u32 %s4088_s16, 4  ;;  %s99_s15 = int_to_ptr.vmem [resolvable:$true] %s98_s15  ;;  %s123_s17 = int_to_ptr.vmem [resolvable:$true] %s122_s17 }
  0x1f   :  { %s3869_s18 = scalar_lea.vmem %s99_s15, 32  ;;  %p3874_p11 = scmp.lt.s32.totalorder %s99_s15, %s99_s15 }
  0x20   :  { %p3870_p10 = scmp.ne.s32.totalorder %s99_s15, %s3869_s18  ;;  %p3875_p12 = scmp.lt.s32.totalorder %s3869_s18, %s3869_s18 }
  0x22   :  { %p3876_p13 = por %p3875_p12, %p3874_p11 }
  0x24   :  { %p3877_p0 = pnand %p3876_p13, %p3870_p10 }
  0x26   :  { %3880 = shalt.err (!%p3877_p0)
}
  0x27   :  { %s4089_s19 = smov 16   ;;  %s4090_s20 = smov 1  }
  0x28   :  { %104 = dma.hbm_to_vmem [thread:$0]  %s4778_s6, 32, %s99_s15, [#allocation16], %s4089_s19, %s4089_s19, %s4090_s20  }
  0x29   :  { %s3889_s22 = scalar_lea.vmem %s123_s17, 768  ;;  %p3894_p2 = scmp.lt.s32.totalorder %s123_s17, %s123_s17 }
  0x2a   :  { %p3890_p1 = scmp.ne.s32.totalorder %s123_s17, %s3889_s22  ;;  %p3895_p3 = scmp.lt.s32.totalorder %s3889_s22, %s3889_s22 }
  0x2c   :  { %p3896_p4 = por %p3895_p3, %p3894_p2 }
  0x2e   :  { %p3897_p5 = pnand %p3896_p4, %p3890_p1 }
  0x30   :  { %3900 = shalt.err (!%p3897_p5)
}
  0x31   :  { %128 = dma.hbm_to_vmem [thread:$0]  %s4780_s8, 768, %s123_s17, [#allocation19], %s4085_s1, %s4085_s1, %s4086_s29  }
  0x32   :  { %s33_s27 = sshll.u32 %s4772_s0, 4  ;;  %s53_s30 = sshll.u32 %s4774_s2, 4  ;;  %s34_s27 = int_to_ptr.vmem [resolvable:$true] %s33_s27  ;;  %s54_s30 = int_to_ptr.vmem [resolvable:$true] %s53_s30 }
  0x33   :  { %s3901_s13 = scalar_lea.vmem %s34_s27, 32  ;;  %p3906_p7 = scmp.lt.s32.totalorder %s34_s27, %s34_s27 }
  0x34   :  { %p3902_p6 = scmp.ne.s32.totalorder %s34_s27, %s3901_s13  ;;  %p3907_p8 = scmp.lt.s32.totalorder %s3901_s13, %s3901_s13 }
  0x36   :  { %p3908_p9 = por %p3907_p8, %p3906_p7 }
  0x38   :  { %p3909_p10 = pnand %p3908_p9, %p3902_p6 }
  0x3a   :  { %3912 = shalt.err (!%p3909_p10)
}
  0x3b   :  { %s4091_s14 = smov [#allocation4]   ;;  %s3913_s8 = scalar_lea.vmem %s54_s30, 16 }
  0x3c   :  { %36 = dma.vmem_to_smem %s34_s27, 32, %s4091_s14, [#allocation7]  }
  0x3d   :  { %p3914_p11 = scmp.ne.s32.totalorder %s54_s30, %s3913_s8  ;;  %p3918_p12 = scmp.lt.s32.totalorder %s54_s30, %s54_s30 }
  0x3e   :  { %p3919_p13 = scmp.lt.s32.totalorder %s3913_s8, %s3913_s8 }
  0x40   :  { %p3920_p0 = por %p3919_p13, %p3918_p12 }
  0x42   :  { %p3921_p1 = pnand %p3920_p0, %p3914_p11 }
  0x44   :  { %3924 = shalt.err (!%p3921_p1)
}
  0x45   :  { %s4092_s0 = smov [#allocation10]   ;;  %s4093_s2 = smov [#allocation11]  }
  0x46   :  { %56 = dma.vmem_to_smem %s54_s30, 16, %s4092_s0, [#allocation9]  }
  0x47   :  { %s62_s15 = sshll.u32 %s4093_s2, 4  ;;  %s4094_s16 = smov [#allocation14]   ;;  %s63_s15 = int_to_ptr.vmem [resolvable:$true] %s62_s15 }
  0x48   :  { %s86_s17 = sshll.u32 %s4094_s16, 4  ;;  %s3933_s18 = scalar_lea.vmem %s63_s15, 320  ;;  %s87_s17 = int_to_ptr.vmem [resolvable:$true] %s86_s17 }
  0x49   :  { %p3934_p2 = scmp.ne.s32.totalorder %s63_s15, %s3933_s18  ;;  %p3938_p3 = scmp.lt.s32.totalorder %s63_s15, %s63_s15 }
  0x4a   :  { %p3939_p4 = scmp.lt.s32.totalorder %s3933_s18, %s3933_s18 }
  0x4c   :  { %p3940_p5 = por %p3939_p4, %p3938_p3 }
  0x4e   :  { %p3941_p6 = pnand %p3940_p5, %p3934_p2 }
  0x50   :  { %3944 = shalt.err (!%p3941_p6)
}
  0x51   :  { %68 = dma.hbm_to_vmem [thread:$0]  %s4775_s3, 320, %s63_s15, [#allocation5], %s4089_s19, %s4089_s19, %s4090_s20  }
  0x52   :  { %s3953_s22 = scalar_lea.vmem %s87_s17, 768  ;;  %p3958_p8 = scmp.lt.s32.totalorder %s87_s17, %s87_s17 }
  0x53   :  { %p3954_p7 = scmp.ne.s32.totalorder %s87_s17, %s3953_s22  ;;  %p3959_p9 = scmp.lt.s32.totalorder %s3953_s22, %s3953_s22 }
  0x55   :  { %p3960_p10 = por %p3959_p9, %p3958_p8 }
  0x57   :  { %p3961_p11 = pnand %p3960_p10, %p3954_p7 }
  0x59   :  { %3964 = shalt.err (!%p3961_p11)
}
  0x5a   :  { %92 = dma.hbm_to_vmem [thread:$0]  %s4777_s5, 768, %s87_s17, [#allocation13], %s4085_s1, %s4085_s1, %s4086_s29  }
  0x5b   :  { %s4095_s25 = smov [#allocation17]   ;;  %s4096_s27 = smov [#allocation20]  }
  0x5c   :  { %s110_s26 = sshll.u32 %s4095_s25, 4  ;;  %s134_s6 = sshll.u32 %s4096_s27, 4  ;;  %s111_s26 = int_to_ptr.vmem [resolvable:$true] %s110_s26  ;;  %s135_s6 = int_to_ptr.vmem [resolvable:$true] %s134_s6 }
  0x5d   :  { %s3973_s3 = scalar_lea.vmem %s111_s26, 640  ;;  %p3978_p13 = scmp.lt.s32.totalorder %s111_s26, %s111_s26 }
  0x5e   :  { %p3974_p12 = scmp.ne.s32.totalorder %s111_s26, %s3973_s3  ;;  %p3979_p0 = scmp.lt.s32.totalorder %s3973_s3, %s3973_s3 }
  0x60   :  { %p3980_p1 = por %p3979_p0, %p3978_p13 }
  0x62   :  { %p3981_p2 = pnand %p3980_p1, %p3974_p12 }
  0x64   :  { %3984 = shalt.err (!%p3981_p2)
}
  0x65   :  { %116 = dma.hbm_to_vmem [thread:$0]  %s4779_s7, 640, %s111_s26, [#allocation16], %s4085_s1, %s4085_s1, %s4086_s29  }
  0x66   :  { %s3993_s5 = scalar_lea.vmem %s135_s6, 640  ;;  %p3998_p4 = scmp.lt.s32.totalorder %s135_s6, %s135_s6 }
  0x67   :  { %p3994_p3 = scmp.ne.s32.totalorder %s135_s6, %s3993_s5  ;;  %p3999_p5 = scmp.lt.s32.totalorder %s3993_s5, %s3993_s5 }
  0x69   :  { %p4000_p6 = por %p3999_p5, %p3998_p4 }
  0x6b   :  { %p4001_p7 = pnand %p4000_p6, %p3994_p3 }
  0x6d   :  { %4004 = shalt.err (!%p4001_p7)
}
  0x6e   :  { %140 = dma.hbm_to_vmem [thread:$0]  %s4781_s9, 640, %s135_s6, [#allocation19], %s4085_s1, %s4085_s1, %s4086_s29  }
  0x6f   :  { %s4097_s13 = smov [#allocation21]  }
  0x70   :  { %s146_s14 = sshll.u32 %s4097_s13, 4  ;;  %s147_s14 = int_to_ptr.vmem [resolvable:$true] %s146_s14 }
  0x71   :  { %s4013_s8 = scalar_lea.vmem %s147_s14, 768  ;;  %p4018_p9 = scmp.lt.s32.totalorder %s147_s14, %s147_s14 }
  0x72   :  { %p4014_p8 = scmp.ne.s32.totalorder %s147_s14, %s4013_s8  ;;  %p4019_p10 = scmp.lt.s32.totalorder %s4013_s8, %s4013_s8 }
  0x74   :  { %p4020_p11 = por %p4019_p10, %p4018_p9 }
  0x76   :  { %p4021_p12 = pnand %p4020_p11, %p4014_p8 }
  0x78   :  { %4024 = shalt.err (!%p4021_p12)
}
  0x79   :  { %152 = dma.hbm_to_vmem [thread:$0]  %s4782_s10, 768, %s147_s14, [#allocation22], %s4085_s1, %s4085_s1, %s4086_s29  }
  0x7a   :  { %4065 = dma.done.wait [#allocation7], 32  }
  0x7b   :  { %4066 = vsyncadd [#allocation7], 4294967264 }
  0x7c   :  { %4067 = dma.done.wait [#allocation9], 32  }
  0x7d   :  { %4068 = vsyncadd [#allocation9], 4294967264 }
  0x7e   :  { %4069 = dma.done.wait [#allocation5], 320  }
  0x7f   :  { %4070 = vsyncadd [#allocation5], 4294966976 }
  0x80   :  { %4071 = dma.done.wait [#allocation13], 1280  }
  0x81   :  { %4072 = vsyncadd [#allocation13], 4294966016 }
  0x82   :  { %4073 = dma.done.wait [#allocation16], 672  }
  0x83   :  { %4074 = vsyncadd [#allocation16], 4294966624 }
  0x84   :  { %4075 = dma.done.wait [#allocation19], 1408  }
  0x85   :  { %4076 = vsyncadd [#allocation19], 4294965888 }
  0x86   :  { %4077 = dma.done.wait [#allocation22], 768  }
  0x87   :  { %4078 = vsyncadd [#allocation22], 4294966528 }
  0x88   :  { %186 = sfence }
  0x89   :  { %v4227_v0 = vld [vmem:[#allocation14 + $0x8] sm:$0xff]   ;;  %v4098_v1 = vmov 0.0   ;;  %v4232_v2 = vld [vmem:[#allocation14] sm:$0xff]   ;;  %vm4099_vm0 = vmmov 0   ;;  %s4236_s9 = sld [smem:[#allocation8]]  ;;  %vm200_vm1 = vcmask 1040384  }
  0x8a   :  { %3284 = vmatprep.subr.bf16.mxu0 %v4098_v1  ;;  %3292 = vmatprep.subr.bf16.mxu1 %v4098_v1  ;;  %s4239_s10 = sld [smem:[#allocation10]]  ;;  %vm345_vm2 = vcmask 261120   ;;  %s4100_s24 = smov 32   ;;  %v4274_v30 = vld [vmem:[#allocation12 + $0x8] sm:$0xff]   ;;  %v4277_v31 = vld [vmem:[#allocation12] sm:$0xff]   ;;  %vm1301_vm3 = vcmask 254976  }
  0x8b   :  { %3285 = vmatpush3.bf16.msra.mxu0 %v4227_v0  ;;  %3288 = vmatprep.mubr.msk.bf16.mxu0 %vm4099_vm0, %v4098_v1  ;;  %s188_s29 = sld [smem:[#allocation4]]  ;;  %v4299_v40 = vld [vmem:[#allocation15] ss:$0 sm:$0xff] }
  0x8c   :  { %3286 = vmatprep.subr.bf16.mxu0 %v4098_v1  ;;  %3296 = vmatprep.mubr.msk.bf16.mxu1 %vm4099_vm0, %v4098_v1  ;;  %s3053_s2 = sld [smem:[#allocation4 + $0x80]] }
  0x8d   :  { %3293 = vmatpush3.bf16.msra.mxu1 %v4274_v30  ;;  %s3055_s25 = sld [smem:[#allocation4 + $0x1]] }
  0x8e   :  { %3294 = vmatprep.subr.bf16.mxu1 %v4098_v1  ;;  %s3056_s26 = sld [smem:[#allocation4 + $0x81]] }
  0x8f   :  { %3287 = vmatpush3.bf16.msra.mxu0 %v4232_v2  ;;  %s3076_s15 = sshll.u32 %s4236_s9, 2  ;;  %s3058_s3 = sld [smem:[#allocation4 + $0x2]] }
  0x90   :  { %3300 = vmatprep.subr.bf16.mxu0 %v4098_v1  ;;  %s3077_s16 = sshll.u32 %s4239_s10, 2  ;;  %s4247_s17 = scalar_lea.vmem [#allocation17], %s3076_s15 }
  0x91   :  { %v312_v3 = vld [vmem:[%s4247_s17] sm:$0x7]  ;;  %s4252_s18 = scalar_lea.vmem [#allocation18], %s3077_s16  ;;  %s189_s21 = scalar_lea.vmem [#allocation11], %s188_s29  ;;  %3295 = vmatpush3.bf16.msra.mxu1 %v4277_v31 }
  0x92   :  { %v315_v4 = vld [vmem:[%s4252_s18] sm:$0x7]  ;;  %s192_s4 = scalar_lea.vmem [#allocation11], %s3053_s2  ;;  %s4263_s22 = scalar_lea.vmem [#allocation20], %s3076_s15  ;;  %3308 = vmatprep.subr.bf16.mxu1 %v4098_v1 }
  0x93   :  { %v190_v5 = vld [vmem:[%s189_s21] sm:$0x1]  ;;  %v316_v6 = vadd.f32 %v315_v4, %v312_v3  ;;  %s4268_s23 = scalar_lea.vmem [#allocation21], %s3077_s16  ;;  %s204_s27 = scalar_lea.vmem [#allocation11], %s3055_s25 }
  0x94   :  { %v3054_v7 = vld [vmem:[%s192_s4] ss:$0 sm:$0xff]  ;;  %s207_s6 = scalar_lea.vmem [#allocation11], %s3056_s26  ;;  %s3059_s19 = sld [smem:[#allocation4 + $0x82]] }
  0x95   :  { %v201_v8 = vsel %vm200_vm1, %v190_v5, %v3054_v7  ;;  %v331_v9 = vpack.c.bf16 %v316_v6, %v316_v6  ;;  %v318_v16 = vld [vmem:[%s4263_s22] sm:$0x7]  ;;  %s219_s20 = scalar_lea.vmem [#allocation11], %s3058_s3  ;;  %s3061_s28 = sld [smem:[#allocation4 + $0x3]] }
  0x96   :  { %202 = vst [vmem:[#allocation2] sm:$0x3] %v201_v8  ;;  %v320_v17 = vld [vmem:[%s4268_s23] sm:$0x7]  ;;  %s3062_s30 = sld [smem:[#allocation4 + $0x83]] }
  0x97   :  { %3289 = vmatmul.mubr.msk.bf16.vlgmr.msra.gmra.mxu0 %vm345_vm2, %v331_v9  ;;  %v321_v19 = vadd.f32 %v320_v17, %v318_v16  ;;  %v205_v37 = vld [vmem:[%s204_s27] sm:$0x1]  ;;  %s3064_s8 = sld [smem:[#allocation4 + $0x4]] }
  0x98   :  { %3301 = vmatpush3.bf16.msra.mxu0 %v4227_v0  ;;  %3304 = vmatprep.mubr.msk.bf16.mxu0 %vm4099_vm0, %v4098_v1  ;;  %v3057_v38 = vld [vmem:[%s207_s6] ss:$0 sm:$0xff]  ;;  %s3065_s7 = sld [smem:[#allocation4 + $0x84]] }
  0x99   :  { %3302 = vmatprep.subr.bf16.mxu0 %v4098_v1  ;;  %v215_v39 = vsel %vm200_vm1, %v205_v37, %v3057_v38  ;;  %v220_v6 = vld [vmem:[%s219_s20] sm:$0x1]  ;;  %s3067_s10 = sld [smem:[#allocation4 + $0x5]] }
  0x9a   :  { %217 = vst [vmem:[#allocation2 + $0x2] sm:$0x3] %v215_v39  ;;  %s222_s5 = scalar_lea.vmem [#allocation11], %s3059_s19  ;;  %s3068_s29 = sld [smem:[#allocation4 + $0x85]] }
  0x9b   :  { %v3060_v7 = vld [vmem:[%s222_s5] ss:$0 sm:$0xff]  ;;  %s234_s13 = scalar_lea.vmem [#allocation11], %s3061_s28  ;;  %s3070_s16 = sld [smem:[#allocation4 + $0x6]] }
  0x9c   :  { %3303 = vmatpush3.bf16.msra.mxu0 %v4232_v2  ;;  %v230_v8 = vsel %vm200_vm1, %v220_v6, %v3060_v7  ;;  %v235_v37 = vld [vmem:[%s234_s13] sm:$0x1]  ;;  %s237_s14 = scalar_lea.vmem [#allocation11], %s3062_s30  ;;  %s3071_s21 = sld [smem:[#allocation4 + $0x86]] }
  0x9d   :  { %3316 = vmatprep.subr.bf16.mxu0 %v4098_v1  ;;  %v332_v10 = vld [vmem:[#allocation2] sm:$0x3]  ;;  %232 = vst [vmem:[#allocation2 + $0x4] sm:$0x3] %v230_v8  ;;  %s249_s0 = scalar_lea.vmem [#allocation11], %s3064_s8  ;;  %s3109_s26 = sld [smem:[#allocation8 + $0x1]] }
  0x9e   :  { %v3063_v38 = vld [vmem:[%s237_s14] ss:$0 sm:$0xff]  ;;  %s252_s9 = scalar_lea.vmem [#allocation11], %s3065_s7  ;;  %s3110_s27 = sld [smem:[#allocation10 + $0x1]] }
  0x9f   :  { %v245_v39 = vsel %vm200_vm1, %v235_v37, %v3063_v38  ;;  %v250_v6 = vld [vmem:[%s249_s0] sm:$0x1]  ;;  %s264_s2 = scalar_lea.vmem [#allocation11], %s3067_s10  ;;  %s4101_s30 = smov 96  }
  0xa0   :  { %247 = vst [vmem:[#allocation2 + $0x6] sm:$0x3] %v245_v39  ;;  %v3066_v7 = vld [vmem:[%s252_s9] ss:$0 sm:$0xff]  ;;  %s267_s15 = scalar_lea.vmem [#allocation11], %s3068_s29  ;;  %s4102_s13 = smov [#allocation24]  }
  0xa1   :  { %v485_v41 = vld [vmem:[#allocation2 + $0x2] sm:$0x3]  ;;  %v260_v8 = vsel %vm200_vm1, %v250_v6, %v3066_v7  ;;  %v265_v37 = vld [vmem:[%s264_s2] sm:$0x1]  ;;  %s279_s4 = scalar_lea.vmem [#allocation11], %s3070_s16  ;;  %s2983_s14 = sshll.u32 %s4102_s13, 4  ;;  %s2984_s14 = int_to_ptr.vmem [resolvable:$true] %s2983_s14 }
  0xa2   :  { %262 = vst [vmem:[#allocation2 + $0x8] sm:$0x3] %v260_v8  ;;  %v3069_v38 = vld [vmem:[%s267_s15] ss:$0 sm:$0xff]  ;;  %s282_s25 = scalar_lea.vmem [#allocation11], %s3071_s21  ;;  %p4030_p0 = scmp.lt.s32.totalorder %s2984_s14, %s2984_s14 }
  0xa3   :  { %v275_v39 = vsel %vm200_vm1, %v265_v37, %v3069_v38  ;;  %v3072_v6 = vld [vmem:[%s282_s25] ss:$0 sm:$0xff]  ;;  %s3111_s6 = sshll.u32 %s3109_s26, 2 }
  0xa4   :  { %v601_v9 = vld [vmem:[#allocation2 + $0x4] sm:$0x3]  ;;  %277 = vst [vmem:[#allocation2 + $0xa] sm:$0x3] %v275_v39  ;;  %s3112_s3 = sshll.u32 %s3110_s27, 2  ;;  %s4410_s19 = scalar_lea.vmem [#allocation20], %s3111_s6 }
  0xa5   :  { %s4413_s20 = scalar_lea.vmem [#allocation21], %s3112_s3 }
  0xa6   :  { %v1334_v37 = vld [vmem:[%s4413_s20] sm:$0x7] }
 0x157   :  { %v383_v11 = vpop.f32.mrf.mxu0 }
 0x158   :  { %v389_v12 = vadd.f32 %v383_v11, %v332_v10 }
 0x159   :  { %v3290_v13 = vpop.f32.mrf.mxu0 }
 0x15a   :  { %3636 = vtanh.f32 %v389_v12  ;;  %v3081_v20 = vmul.f32 -1.442695, %v389_v12 }
 0x15b   :  { %v386_v14 = vpop.f32.mrf.mxu0 }
 0x15c   :  { %3638 = vpow2.f32 %v3081_v20 }
 0x15d   :  { %v3291_v15 = vpop.f32.mrf.mxu0 }
 0x167   :  { %v3637_v18 = vpop.eup %3636 }
 0x168   :  { %403 = vrot.lane.b32.xlu0 %v3637_v18, %s4085_s1 }
 0x169   :  { %v3639_v21 = vpop.eup %3638 }
 0x16a   :  { %v393_v22 = vadd.f32 1.0, %v3639_v21 }
 0x16c   :  { %398 = vrot.lane.b32.xlu0 %v321_v19, %s4100_s24  ;;  %3640 = vrcp.f32 %v393_v22 }
 0x179   :  { %v3641_v23 = vpop.eup %3640 }
 0x1da   :  { %v404_v24 = vpop.permute.xlu0 %403 }
 0x1db   :  { %v406_v25 = vmul.f32 %v3641_v23, %v404_v24 }
 0x1dd   :  { %408 = vrot.lane.b32.xlu1 %v406_v25, %s4100_s24 }
 0x1de   :  { %v399_v26 = vpop.permute.xlu0 %398 }
 0x1df   :  { %v401_v27 = vmul.f32 %v3641_v23, %v399_v26 }
 0x24f   :  { %v409_v28 = vpop.permute.xlu1 %408 }
 0x250   :  { %v411_v29 = vadd.f32 %v409_v28, %v401_v27 }
 0x252   :  { %3642 = vtanh.f32 %v411_v29 }
 0x25f   :  { %v3643_v32 = vpop.eup %3642 }
 0x260   :  { %414 = vrot.lane.b32.xlu1 %v3643_v32, %s4085_s1 }
 0x2d2   :  { %v415_v33 = vpop.permute.xlu1 %414 }
 0x2d3   :  { %v417_v34 = vmul.f32 %v3641_v23, %v415_v33 }
 0x2d5   :  { %v418_v35 = vpack.c.bf16 %v417_v34, %v417_v34 }
 0x2d7   :  { %420 = vrot.lane.b32.xlu0 %v418_v35, %s4100_s24 }
 0x349   :  { %v421_v36 = vpop.permute.xlu0 %420 }
 0x34a   :  { %3297 = vmatmul.mubr.msk.bf16.vlgmr.msra.gmra.mxu1 %vm345_vm2, %v421_v36  ;;  %3305 = vmatmul.mubr.msk.bf16.vlgmr.msra.gmra.mxu0 %vm345_vm2, %v421_v36 }
 0x34b   :  { %3317 = vmatpush3.bf16.msra.mxu0 %v4227_v0  ;;  %3309 = vmatpush3.bf16.msra.mxu1 %v4274_v30 }
 0x34c   :  { %3318 = vmatprep.subr.bf16.mxu0 %v4098_v1  ;;  %3310 = vmatprep.subr.bf16.mxu1 %v4098_v1 }
 0x34d   :  { %3320 = vmatprep.mubr.msk.bf16.mxu0 %vm4099_vm0, %v4098_v1  ;;  %3312 = vmatprep.mubr.msk.bf16.mxu1 %vm4099_vm0, %v4098_v1 }
 0x34f   :  { %3319 = vmatpush3.bf16.msra.mxu0 %v4232_v2  ;;  %3311 = vmatpush3.bf16.msra.mxu1 %v4277_v31 }
 0x350   :  { %3332 = vmatprep.subr.bf16.mxu0 %v4098_v1  ;;  %3324 = vmatprep.subr.bf16.mxu1 %v4098_v1 }
 0x40a   :  { %v471_v42 = vpop.f32.mrf.mxu1  ;;  %v520_v43 = vpop.f32.mrf.mxu0 }
 0x40b   :  { %v483_v44 = vadd.f32 %v4299_v40, %v471_v42  ;;  %v526_v45 = vadd.f32 %v520_v43, %v485_v41  ;;  %v717_v41 = vld [vmem:[#allocation2 + $0x6] sm:$0x3] }
 0x40c   :  { %v3298_v46 = vpop.f32.mrf.mxu1  ;;  %v3306_v47 = vpop.f32.mrf.mxu0 }
 0x40d   :  { %484 = vst [vmem:[#allocation3] sm:$0x3] %v483_v44  ;;  %3644 = vtanh.f32 %v526_v45  ;;  %v3087_v53 = vmul.f32 -1.442695, %v526_v45 }
 0x40e   :  { %v474_v48 = vpop.f32.mrf.mxu1  ;;  %v523_v49 = vpop.f32.mrf.mxu0 }
 0x40f   :  { %3646 = vpow2.f32 %v3087_v53 }
 0x410   :  { %v3299_v50 = vpop.f32.mrf.mxu1  ;;  %v3307_v51 = vpop.f32.mrf.mxu0 }
 0x41a   :  { %v3645_v52 = vpop.eup %3644 }
 0x41b   :  { %536 = vrot.lane.b32.xlu1 %v3645_v52, %s4085_s1 }
 0x41c   :  { %v3647_v54 = vpop.eup %3646 }
 0x41d   :  { %v530_v55 = vadd.f32 1.0, %v3647_v54 }
 0x41f   :  { %3648 = vrcp.f32 %v530_v55 }
 0x42c   :  { %v3649_v56 = vpop.eup %3648 }
 0x42d   :  { %v534_v59 = vmul.f32 %v3649_v56, %v411_v29 }
 0x48d   :  { %v537_v57 = vpop.permute.xlu1 %536 }
 0x48e   :  { %v539_v58 = vmul.f32 %v3649_v56, %v537_v57 }
 0x490   :  { %541 = vrot.lane.b32.xlu0 %v539_v58, %s4100_s24 }
 0x502   :  { %v542_v60 = vpop.permute.xlu0 %541 }
 0x503   :  { %v544_v61 = vadd.f32 %v542_v60, %v534_v59 }
 0x505   :  { %3650 = vtanh.f32 %v544_v61 }
 0x512   :  { %v3651_v62 = vpop.eup %3650 }
 0x513   :  { %547 = vrot.lane.b32.xlu1 %v3651_v62, %s4085_s1 }
 0x585   :  { %v548_v63 = vpop.permute.xlu1 %547 }
 0x586   :  { %v550_v3 = vmul.f32 %v3649_v56, %v548_v63 }
 0x588   :  { %v551_v4 = vpack.c.bf16 %v550_v3, %v550_v3 }
 0x58a   :  { %553 = vrot.lane.b32.xlu0 %v551_v4, %s4100_s24 }
 0x5fc   :  { %v554_v5 = vpop.permute.xlu0 %553 }
 0x5fd   :  { %3313 = vmatmul.mubr.msk.bf16.vlgmr.msra.gmra.mxu1 %vm345_vm2, %v554_v5  ;;  %3321 = vmatmul.mubr.msk.bf16.vlgmr.msra.gmra.mxu0 %vm345_vm2, %v554_v5 }
 0x5fe   :  { %3333 = vmatpush3.bf16.msra.mxu0 %v4227_v0  ;;  %3325 = vmatpush3.bf16.msra.mxu1 %v4274_v30 }
 0x5ff   :  { %3334 = vmatprep.subr.bf16.mxu0 %v4098_v1  ;;  %3326 = vmatprep.subr.bf16.mxu1 %v4098_v1 }
 0x600   :  { %3336 = vmatprep.mubr.msk.bf16.mxu0 %vm4099_vm0, %v4098_v1  ;;  %3328 = vmatprep.mubr.msk.bf16.mxu1 %vm4099_vm0, %v4098_v1 }
 0x602   :  { %3335 = vmatpush3.bf16.msra.mxu0 %v4232_v2  ;;  %3327 = vmatpush3.bf16.msra.mxu1 %v4277_v31 }
 0x603   :  { %3348 = vmatprep.subr.bf16.mxu0 %v4098_v1  ;;  %3340 = vmatprep.subr.bf16.mxu1 %v4098_v1 }
 0x6bd   :  { %v592_v10 = vpop.f32.mrf.mxu1  ;;  %v636_v11 = vpop.f32.mrf.mxu0 }
 0x6be   :  { %v598_v12 = vadd.f32 %v4299_v40, %v592_v10  ;;  %v642_v13 = vadd.f32 %v636_v11, %v601_v9  ;;  %v833_v9 = vld [vmem:[#allocation2 + $0x8] sm:$0x3] }
 0x6bf   :  { %v3314_v14 = vpop.f32.mrf.mxu1  ;;  %v3322_v15 = vpop.f32.mrf.mxu0 }
 0x6c0   :  { %600 = vst [vmem:[#allocation3 + $0x2] sm:$0x3] %v598_v12  ;;  %3652 = vtanh.f32 %v642_v13  ;;  %v3090_v21 = vmul.f32 -1.442695, %v642_v13 }
 0x6c1   :  { %v595_v16 = vpop.f32.mrf.mxu1  ;;  %v639_v17 = vpop.f32.mrf.mxu0 }
 0x6c2   :  { %3654 = vpow2.f32 %v3090_v21 }
 0x6c3   :  { %v3315_v18 = vpop.f32.mrf.mxu1  ;;  %v3323_v19 = vpop.f32.mrf.mxu0 }
 0x6cd   :  { %v3653_v20 = vpop.eup %3652 }
 0x6ce   :  { %652 = vrot.lane.b32.xlu1 %v3653_v20, %s4085_s1 }
 0x6cf   :  { %v3655_v22 = vpop.eup %3654 }
 0x6d0   :  { %v646_v23 = vadd.f32 1.0, %v3655_v22 }
 0x6d2   :  { %3656 = vrcp.f32 %v646_v23 }
 0x6df   :  { %v3657_v24 = vpop.eup %3656 }
 0x6e0   :  { %v650_v27 = vmul.f32 %v3657_v24, %v544_v61 }
 0x740   :  { %v653_v25 = vpop.permute.xlu1 %652 }
 0x741   :  { %v655_v26 = vmul.f32 %v3657_v24, %v653_v25 }
 0x743   :  { %657 = vrot.lane.b32.xlu0 %v655_v26, %s4100_s24 }
 0x7b5   :  { %v658_v28 = vpop.permute.xlu0 %657 }
 0x7b6   :  { %v660_v29 = vadd.f32 %v658_v28, %v650_v27 }
 0x7b8   :  { %3658 = vtanh.f32 %v660_v29 }
 0x7c5   :  { %v3659_v32 = vpop.eup %3658 }
 0x7c6   :  { %663 = vrot.lane.b32.xlu1 %v3659_v32, %s4085_s1 }
 0x838   :  { %v664_v33 = vpop.permute.xlu1 %663 }
 0x839   :  { %v666_v34 = vmul.f32 %v3657_v24, %v664_v33 }
 0x83b   :  { %v667_v35 = vpack.c.bf16 %v666_v34, %v666_v34 }
 0x83d   :  { %669 = vrot.lane.b32.xlu0 %v667_v35, %s4100_s24 }
 0x8af   :  { %v670_v36 = vpop.permute.xlu0 %669 }
 0x8b0   :  { %3329 = vmatmul.mubr.msk.bf16.vlgmr.msra.gmra.mxu1 %vm345_vm2, %v670_v36  ;;  %3337 = vmatmul.mubr.msk.bf16.vlgmr.msra.gmra.mxu0 %vm345_vm2, %v670_v36 }
 0x8b1   :  { %3349 = vmatpush3.bf16.msra.mxu0 %v4227_v0  ;;  %3341 = vmatpush3.bf16.msra.mxu1 %v4274_v30 }
 0x8b2   :  { %3350 = vmatprep.subr.bf16.mxu0 %v4098_v1  ;;  %3342 = vmatprep.subr.bf16.mxu1 %v4098_v1 }
 0x8b3   :  { %3352 = vmatprep.mubr.msk.bf16.mxu0 %vm4099_vm0, %v4098_v1  ;;  %3344 = vmatprep.mubr.msk.bf16.mxu1 %vm4099_vm0, %v4098_v1 }
 0x8b5   :  { %3351 = vmatpush3.bf16.msra.mxu0 %v4232_v2  ;;  %3343 = vmatpush3.bf16.msra.mxu1 %v4277_v31 }
 0x8b6   :  { %3364 = vmatprep.subr.bf16.mxu0 %v4098_v1  ;;  %3356 = vmatprep.subr.bf16.mxu1 %v4098_v1 }
 0x970   :  { %v708_v42 = vpop.f32.mrf.mxu1  ;;  %v752_v43 = vpop.f32.mrf.mxu0 }
 0x971   :  { %v714_v44 = vadd.f32 %v4299_v40, %v708_v42  ;;  %v758_v45 = vadd.f32 %v752_v43, %v717_v41  ;;  %v949_v41 = vld [vmem:[#allocation2 + $0xa] sm:$0x3] }
 0x972   :  { %v3330_v46 = vpop.f32.mrf.mxu1  ;;  %v3338_v47 = vpop.f32.mrf.mxu0 }
 0x973   :  { %716 = vst [vmem:[#allocation3 + $0x4] sm:$0x3] %v714_v44  ;;  %3660 = vtanh.f32 %v758_v45  ;;  %v3093_v53 = vmul.f32 -1.442695, %v758_v45 }
 0x974   :  { %v711_v48 = vpop.f32.mrf.mxu1  ;;  %v755_v49 = vpop.f32.mrf.mxu0 }
 0x975   :  { %3662 = vpow2.f32 %v3093_v53 }
 0x976   :  { %v3331_v50 = vpop.f32.mrf.mxu1  ;;  %v3339_v51 = vpop.f32.mrf.mxu0 }
 0x980   :  { %v3661_v52 = vpop.eup %3660 }
 0x981   :  { %768 = vrot.lane.b32.xlu1 %v3661_v52, %s4085_s1 }
 0x982   :  { %v3663_v54 = vpop.eup %3662 }
 0x983   :  { %v762_v55 = vadd.f32 1.0, %v3663_v54 }
 0x985   :  { %3664 = vrcp.f32 %v762_v55 }
 0x992   :  { %v3665_v56 = vpop.eup %3664 }
 0x993   :  { %v766_v59 = vmul.f32 %v3665_v56, %v660_v29 }
 0x9f3   :  { %v769_v57 = vpop.permute.xlu1 %768 }
 0x9f4   :  { %v771_v58 = vmul.f32 %v3665_v56, %v769_v57 }
 0x9f6   :  { %773 = vrot.lane.b32.xlu0 %v771_v58, %s4100_s24 }
 0xa68   :  { %v774_v60 = vpop.permute.xlu0 %773 }
 0xa69   :  { %v776_v61 = vadd.f32 %v774_v60, %v766_v59 }
 0xa6b   :  { %3666 = vtanh.f32 %v776_v61 }
 0xa78   :  { %v3667_v62 = vpop.eup %3666 }
 0xa79   :  { %779 = vrot.lane.b32.xlu1 %v3667_v62, %s4085_s1 }
 0xaeb   :  { %v780_v63 = vpop.permute.xlu1 %779 }
 0xaec   :  { %v782_v3 = vmul.f32 %v3665_v56, %v780_v63 }
 0xaee   :  { %v783_v4 = vpack.c.bf16 %v782_v3, %v782_v3 }
 0xaf0   :  { %785 = vrot.lane.b32.xlu0 %v783_v4, %s4100_s24 }
 0xb62   :  { %v786_v5 = vpop.permute.xlu0 %785 }
 0xb63   :  { %3345 = vmatmul.mubr.msk.bf16.vlgmr.msra.gmra.mxu1 %vm345_vm2, %v786_v5  ;;  %3353 = vmatmul.mubr.msk.bf16.vlgmr.msra.gmra.mxu0 %vm345_vm2, %v786_v5 }
 0xb64   :  { %3365 = vmatpush3.bf16.msra.mxu0 %v4227_v0  ;;  %3357 = vmatpush3.bf16.msra.mxu1 %v4274_v30 }
 0xb65   :  { %3366 = vmatprep.subr.bf16.mxu0 %v4098_v1  ;;  %3358 = vmatprep.subr.bf16.mxu1 %v4098_v1 }
 0xb66   :  { %3368 = vmatprep.mubr.msk.bf16.mxu0 %vm4099_vm0, %v4098_v1  ;;  %3360 = vmatprep.mubr.msk.bf16.mxu1 %vm4099_vm0, %v4098_v1 }
 0xb68   :  { %3367 = vmatpush3.bf16.msra.mxu0 %v4232_v2  ;;  %3359 = vmatpush3.bf16.msra.mxu1 %v4277_v31 }
 0xb69   :  { %3380 = vmatprep.subr.bf16.mxu0 %v4098_v1  ;;  %3372 = vmatprep.subr.bf16.mxu1 %v4098_v1 }
 0xc23   :  { %v824_v10 = vpop.f32.mrf.mxu1  ;;  %v868_v11 = vpop.f32.mrf.mxu0 }
 0xc24   :  { %v830_v12 = vadd.f32 %v4299_v40, %v824_v10  ;;  %v874_v13 = vadd.f32 %v868_v11, %v833_v9 }
 0xc25   :  { %v3346_v14 = vpop.f32.mrf.mxu1  ;;  %v3354_v15 = vpop.f32.mrf.mxu0 }
 0xc26   :  { %832 = vst [vmem:[#allocation3 + $0x6] sm:$0x3] %v830_v12  ;;  %3668 = vtanh.f32 %v874_v13  ;;  %v3096_v21 = vmul.f32 -1.442695, %v874_v13 }
 0xc27   :  { %v827_v16 = vpop.f32.mrf.mxu1  ;;  %v871_v17 = vpop.f32.mrf.mxu0 }
 0xc28   :  { %3670 = vpow2.f32 %v3096_v21 }
 0xc29   :  { %v3347_v18 = vpop.f32.mrf.mxu1  ;;  %v3355_v19 = vpop.f32.mrf.mxu0 }
 0xc33   :  { %v3669_v20 = vpop.eup %3668 }
 0xc34   :  { %884 = vrot.lane.b32.xlu1 %v3669_v20, %s4085_s1 }
 0xc35   :  { %v3671_v22 = vpop.eup %3670 }
 0xc36   :  { %v878_v23 = vadd.f32 1.0, %v3671_v22 }
 0xc38   :  { %3672 = vrcp.f32 %v878_v23 }
 0xc45   :  { %v3673_v24 = vpop.eup %3672 }
 0xc46   :  { %v882_v27 = vmul.f32 %v3673_v24, %v776_v61 }
 0xca6   :  { %v885_v25 = vpop.permute.xlu1 %884 }
 0xca7   :  { %v887_v26 = vmul.f32 %v3673_v24, %v885_v25 }
 0xca9   :  { %889 = vrot.lane.b32.xlu0 %v887_v26, %s4100_s24 }
 0xd1b   :  { %v890_v28 = vpop.permute.xlu0 %889 }
 0xd1c   :  { %v892_v29 = vadd.f32 %v890_v28, %v882_v27 }
 0xd1e   :  { %3674 = vtanh.f32 %v892_v29 }
 0xd2b   :  { %v3675_v32 = vpop.eup %3674 }
 0xd2c   :  { %895 = vrot.lane.b32.xlu1 %v3675_v32, %s4085_s1  ;;  %v1318_v32 = vld [vmem:[%s4263_s22] sm:$0x7]  ;;  %s4421_s22 = scalar_lea.vmem [#allocation17], %s3111_s6 }
 0xd9e   :  { %v896_v33 = vpop.permute.xlu1 %895 }
 0xd9f   :  { %v898_v34 = vmul.f32 %v3673_v24, %v896_v33  ;;  %v1320_v33 = vld [vmem:[%s4268_s23] sm:$0x7]  ;;  %s4424_s23 = scalar_lea.vmem [#allocation18], %s3112_s3 }
 0xda1   :  { %v899_v35 = vpack.c.bf16 %v898_v34, %v898_v34 }
 0xda3   :  { %901 = vrot.lane.b32.xlu0 %v899_v35, %s4100_s24  ;;  %v1321_v35 = vadd.f32 %v1320_v33, %v1318_v32 }
 0xe15   :  { %v902_v36 = vpop.permute.xlu0 %901 }
 0xe16   :  { %3361 = vmatmul.mubr.msk.bf16.vlgmr.msra.gmra.mxu1 %vm345_vm2, %v902_v36  ;;  %3369 = vmatmul.mubr.msk.bf16.vlgmr.msra.gmra.mxu0 %vm345_vm2, %v902_v36  ;;  %v1332_v36 = vld [vmem:[%s4410_s19] sm:$0x7] }
 0xe17   :  { %3381 = vmatpush3.bf16.msra.mxu0 %v4227_v0  ;;  %3373 = vmatpush3.bf16.msra.mxu1 %v4274_v30  ;;  %v1335_v38 = vadd.f32 %v1334_v37, %v1332_v36 }
 0xe18   :  { %3382 = vmatprep.subr.bf16.mxu0 %v4098_v1  ;;  %3374 = vmatprep.subr.bf16.mxu1 %v4098_v1 }
 0xe19   :  { %3384 = vmatprep.mubr.msk.bf16.mxu0 %vm4099_vm0, %v4098_v1  ;;  %3376 = vmatprep.mubr.msk.bf16.mxu1 %vm4099_vm0, %v4098_v1 }
 0xe1b   :  { %3383 = vmatpush3.bf16.msra.mxu0 %v4232_v2  ;;  %3375 = vmatpush3.bf16.msra.mxu1 %v4277_v31 }
 0xe1c   :  { %3396 = vmatprep.subr.bf16.mxu0 %v4098_v1  ;;  %3388 = vmatprep.subr.bf16.mxu1 %v4098_v1 }
 0xed6   :  { %v940_v42 = vpop.f32.mrf.mxu1  ;;  %v984_v43 = vpop.f32.mrf.mxu0 }
 0xed7   :  { %v946_v44 = vadd.f32 %v4299_v40, %v940_v42  ;;  %v990_v45 = vadd.f32 %v984_v43, %v949_v41  ;;  %v1344_v41 = vrot.slane %v1321_v35, 2  ;;  %v1347_v42 = vrot.slane %v1335_v38, 7 }
 0xed8   :  { %v3362_v46 = vpop.f32.mrf.mxu1  ;;  %v3370_v47 = vpop.f32.mrf.mxu0 }
 0xed9   :  { %948 = vst [vmem:[#allocation3 + $0x8] sm:$0x3] %v946_v44  ;;  %3676 = vtanh.f32 %v990_v45  ;;  %v3099_v53 = vmul.f32 -1.442695, %v990_v45  ;;  %v1349_v43 = vsel %vm200_vm1, %v1344_v41, %v1347_v42  ;;  %v1312_v44 = vld [vmem:[%s4247_s17] sm:$0x7] }
 0xeda   :  { %v943_v48 = vpop.f32.mrf.mxu1  ;;  %v987_v49 = vpop.f32.mrf.mxu0  ;;  %v1315_v45 = vld [vmem:[%s4252_s18] sm:$0x7]  ;;  %s3073_s17 = sld [smem:[#allocation4 + $0x7]] }
 0xedb   :  { %3678 = vpow2.f32 %v3099_v53  ;;  %v1326_v46 = vld [vmem:[%s4421_s22] sm:$0x7]  ;;  %v1316_v48 = vadd.f32 %v1315_v45, %v1312_v44  ;;  %s3074_s18 = sld [smem:[#allocation4 + $0x87]] }
 0xedc   :  { %v3363_v50 = vpop.f32.mrf.mxu1  ;;  %v3371_v51 = vpop.f32.mrf.mxu0  ;;  %v1329_v47 = vld [vmem:[%s4424_s23] sm:$0x7] }
 0xedd   :  { %v1330_v49 = vadd.f32 %v1329_v47, %v1326_v46  ;;  %v4427_v50 = vld [vmem:[#allocation14 + $0x18] sm:$0xff]   ;;  %v1337_v51 = vrot.slane %v1316_v48, 2 }
 0xee0   :  { %s294_s5 = scalar_lea.vmem [#allocation11], %s3073_s17 }
 0xee1   :  { %s297_s28 = scalar_lea.vmem [#allocation11], %s3074_s18 }
 0xee6   :  { %v3677_v52 = vpop.eup %3676 }
 0xee7   :  { %1000 = vrot.lane.b32.xlu1 %v3677_v52, %s4085_s1  ;;  %v1340_v52 = vrot.slane %v1330_v49, 7 }
 0xee8   :  { %v3679_v54 = vpop.eup %3678 }
 0xee9   :  { %v994_v55 = vadd.f32 1.0, %v3679_v54  ;;  %v4432_v54 = vld [vmem:[#allocation14 + $0x10] sm:$0xff]  }
 0xeeb   :  { %3680 = vrcp.f32 %v994_v55  ;;  %v1342_v55 = vsel %vm200_vm1, %v1337_v51, %v1340_v52  ;;  %v1630_v51 = vld [vmem:[#allocation3 + $0x4] sm:$0x3] }
 0xef8   :  { %v3681_v56 = vpop.eup %3680 }
 0xef9   :  { %v998_v59 = vmul.f32 %v3681_v56, %v892_v29 }
 0xf59   :  { %v1001_v57 = vpop.permute.xlu1 %1000 }
 0xf5a   :  { %v1003_v58 = vmul.f32 %v3681_v56, %v1001_v57 }
 0xf5c   :  { %1005 = vrot.lane.b32.xlu0 %v1003_v58, %s4100_s24 }
 0xfce   :  { %v1006_v60 = vpop.permute.xlu0 %1005 }
 0xfcf   :  { %v1008_v61 = vadd.f32 %v1006_v60, %v998_v59 }
 0xfd1   :  { %3682 = vtanh.f32 %v1008_v61 }
 0xfde   :  { %v3683_v62 = vpop.eup %3682 }
 0xfdf   :  { %1011 = vrot.lane.b32.xlu1 %v3683_v62, %s4085_s1 }
0x1051   :  { %v1012_v63 = vpop.permute.xlu1 %1011 }
0x1052   :  { %v1014_v3 = vmul.f32 %v3681_v56, %v1012_v63  ;;  %v1362_v56 = vpack.c.bf16 %v1342_v55, %v1342_v55 }
0x1054   :  { %v1015_v4 = vpack.c.bf16 %v1014_v3, %v1014_v3 }
0x1056   :  { %1017 = vrot.lane.b32.xlu0 %v1015_v4, %s4100_s24 }
0x10c8   :  { %v1018_v5 = vpop.permute.xlu0 %1017 }
0x10c9   :  { %3377 = vmatmul.mubr.msk.bf16.vlgmr.msra.gmra.mxu1 %vm345_vm2, %v1018_v5  ;;  %3385 = vmatmul.mubr.msk.bf16.vlgmr.msra.gmra.mxu0 %vm345_vm2, %v1018_v5 }
0x10ca   :  { %3397 = vmatpush3.bf16.msra.mxu0 %v4227_v0  ;;  %3389 = vmatpush3.bf16.msra.mxu1 %v4274_v30  ;;  %v280_v0 = vld [vmem:[%s279_s4] sm:$0x1] }
0x10cb   :  { %3398 = vmatprep.subr.bf16.mxu0 %v4098_v1  ;;  %3390 = vmatprep.subr.bf16.mxu1 %v4098_v1  ;;  %v290_v7 = vsel %vm200_vm1, %v280_v0, %v3072_v6  ;;  %v1363_v0 = vld [vmem:[#allocation3] sm:$0x3] }
0x10cc   :  { %3400 = vmatprep.mubr.msk.bf16.mxu0 %vm4099_vm0, %v4098_v1  ;;  %3392 = vmatprep.mubr.msk.bf16.mxu1 %vm4099_vm0, %v4098_v1  ;;  %292 = vst [vmem:[#allocation2 + $0xc] sm:$0x3] %v290_v7 }
0x10ce   :  { %3399 = vmatpush3.bf16.msra.mxu0 %v4232_v2  ;;  %3391 = vmatpush3.bf16.msra.mxu1 %v4277_v31 }
0x10cf   :  { %3412 = vmatprep.subr.bf16.mxu0 %v4098_v1  ;;  %3404 = vmatprep.subr.bf16.mxu1 %v4098_v1 }
0x10d3   :  { %v1065_v8 = vld [vmem:[#allocation2 + $0xc] sm:$0x3] }
0x1189   :  { %v1056_v9 = vpop.f32.mrf.mxu1  ;;  %v1100_v10 = vpop.f32.mrf.mxu0 }
0x118a   :  { %v1062_v2 = vadd.f32 %v4299_v40, %v1056_v9  ;;  %v1106_v11 = vadd.f32 %v1100_v10, %v1065_v8 }
0x118b   :  { %v3378_v12 = vpop.f32.mrf.mxu1  ;;  %v3386_v13 = vpop.f32.mrf.mxu0 }
0x118c   :  { %1064 = vst [vmem:[#allocation3 + $0xa] sm:$0x3] %v1062_v2  ;;  %3684 = vtanh.f32 %v1106_v11  ;;  %v3102_v19 = vmul.f32 -1.442695, %v1106_v11 }
0x118d   :  { %v1059_v14 = vpop.f32.mrf.mxu1  ;;  %v1103_v15 = vpop.f32.mrf.mxu0 }
0x118e   :  { %3686 = vpow2.f32 %v3102_v19 }
0x118f   :  { %v3379_v16 = vpop.f32.mrf.mxu1  ;;  %v3387_v17 = vpop.f32.mrf.mxu0 }
0x1199   :  { %v3685_v18 = vpop.eup %3684 }
0x119a   :  { %1116 = vrot.lane.b32.xlu1 %v3685_v18, %s4085_s1 }
0x119b   :  { %v3687_v20 = vpop.eup %3686 }
0x119c   :  { %v1110_v21 = vadd.f32 1.0, %v3687_v20 }
0x119e   :  { %3688 = vrcp.f32 %v1110_v21 }
0x11ab   :  { %v3689_v22 = vpop.eup %3688 }
0x11ac   :  { %v1114_v25 = vmul.f32 %v3689_v22, %v1008_v61 }
0x120c   :  { %v1117_v23 = vpop.permute.xlu1 %1116 }
0x120d   :  { %v1119_v24 = vmul.f32 %v3689_v22, %v1117_v23 }
0x120f   :  { %1121 = vrot.lane.b32.xlu0 %v1119_v24, %s4100_s24 }
0x1281   :  { %v1122_v26 = vpop.permute.xlu0 %1121 }
0x1282   :  { %v4404_v27 = vadd.f32 %v1122_v26, %v1114_v25  ;;  %v1515_v25 = vld [vmem:[#allocation3 + $0x2] sm:$0x3] }
0x1284   :  { %3690 = vtanh.f32 %v4404_v27 }
0x1291   :  { %v3691_v28 = vpop.eup %3690 }
0x1292   :  { %1127 = vrot.lane.b32.xlu1 %v3691_v28, %s4085_s1 }
0x1304   :  { %v1128_v29 = vpop.permute.xlu1 %1127 }
0x1305   :  { %v1130_v34 = vmul.f32 %v3689_v22, %v1128_v29 }
0x1307   :  { %v1131_v39 = vpack.c.bf16 %v1130_v34, %v1130_v34 }
0x1309   :  { %1133 = vrot.lane.b32.xlu0 %v1131_v39, %s4100_s24 }
0x130d   :  { %1428 = vrot.lane.b32.xlu0 %v1349_v43, %s4100_s24 }
0x137b   :  { %v1134_v53 = vpop.permute.xlu0 %1133 }
0x137c   :  { %3393 = vmatmul.mubr.msk.bf16.vlgmr.msra.gmra.mxu1 %vm345_vm2, %v1134_v53  ;;  %3401 = vmatmul.mubr.msk.bf16.vlgmr.msra.gmra.mxu0 %vm345_vm2, %v1134_v53 }
0x137d   :  { %3413 = vmatpush3.bf16.msra.mxu0 %v4427_v50  ;;  %3416 = vmatprep.mubr.msk.bf16.mxu0 %vm4099_vm0, %v4098_v1 }
0x137e   :  { %3414 = vmatprep.subr.bf16.mxu0 %v4098_v1  ;;  %3405 = vmatpush3.bf16.msra.mxu1 %v4274_v30  ;;  %v295_v30 = vld [vmem:[%s294_s5] sm:$0x1] }
0x137f   :  { %3406 = vmatprep.subr.bf16.mxu1 %v4098_v1  ;;  %3408 = vmatprep.mubr.msk.bf16.mxu1 %vm4099_vm0, %v4098_v1  ;;  %v1429_v16 = vpop.permute.xlu0 %1428 }
0x1381   :  { %3415 = vmatpush3.bf16.msra.mxu0 %v4432_v54 }
0x1382   :  { %3428 = vmatprep.subr.bf16.mxu0 %v4098_v1  ;;  %3407 = vmatpush3.bf16.msra.mxu1 %v4277_v31  ;;  %v3075_v31 = vld [vmem:[%s297_s28] ss:$0 sm:$0xff] }
0x1383   :  { %3420 = vmatprep.subr.bf16.mxu1 %v4098_v1  ;;  %v305_v57 = vsel %vm200_vm1, %v295_v30, %v3075_v31 }
0x1384   :  { %3417 = vmatmul.mubr.msk.bf16.vlgmr.msra.gmra.mxu0 %vm345_vm2, %v1362_v56  ;;  %307 = vst [vmem:[#allocation2 + $0xe] sm:$0x3] %v305_v57 }
0x1385   :  { %3429 = vmatpush3.bf16.msra.mxu0 %v4427_v50  ;;  %3432 = vmatprep.mubr.msk.bf16.mxu0 %vm4099_vm0, %v4098_v1 }
0x1386   :  { %3430 = vmatprep.subr.bf16.mxu0 %v4098_v1 }
0x1389   :  { %3431 = vmatpush3.bf16.msra.mxu0 %v4432_v54 }
0x138a   :  { %3444 = vmatprep.subr.bf16.mxu0 %v4098_v1 }
0x143c   :  { %v1172_v58 = vpop.f32.mrf.mxu1  ;;  %v4454_v59 = vpop.f32.mrf.mxu0 }
0x143d   :  { %v1178_v60 = vadd.f32 %v4299_v40, %v1172_v58 }
0x143e   :  { %v3394_v61 = vpop.f32.mrf.mxu1  ;;  %v3402_v62 = vpop.f32.mrf.mxu0 }
0x143f   :  { %1180 = vst [vmem:[#allocation3 + $0xc] sm:$0x3] %v1178_v60 }
0x1440   :  { %v1175_v63 = vpop.f32.mrf.mxu1  ;;  %v1219_v3 = vpop.f32.mrf.mxu0 }
0x1442   :  { %v3395_v4 = vpop.f32.mrf.mxu1  ;;  %v3403_v5 = vpop.f32.mrf.mxu0 }
0x1444   :  { %v1413_v6 = vpop.f32.mrf.mxu0 }
0x1445   :  { %v1419_v7 = vadd.f32 %v1413_v6, %v1363_v0 }
0x1446   :  { %v3418_v8 = vpop.f32.mrf.mxu0 }
0x1447   :  { %3692 = vtanh.f32 %v1419_v7  ;;  %v3116_v11 = vmul.f32 -1.442695, %v1419_v7 }
0x1448   :  { %v1416_v9 = vpop.f32.mrf.mxu0 }
0x1449   :  { %3694 = vpow2.f32 %v3116_v11 }
0x144a   :  { %v3419_v10 = vpop.f32.mrf.mxu0 }
0x144b   :  { %v1745_v10 = vld [vmem:[#allocation3 + $0x6] sm:$0x3] }
0x1454   :  { %v3693_v2 = vpop.eup %3692 }
0x1455   :  { %1433 = vrot.lane.b32.xlu1 %v3693_v2, %s4085_s1 }
0x1456   :  { %v3695_v40 = vpop.eup %3694 }
0x1457   :  { %v1423_v12 = vadd.f32 1.0, %v3695_v40 }
0x1459   :  { %3696 = vrcp.f32 %v1423_v12 }
0x1466   :  { %v3697_v13 = vpop.eup %3696 }
0x1467   :  { %v1431_v17 = vmul.f32 %v3697_v13, %v1429_v16 }
0x14c7   :  { %v1434_v14 = vpop.permute.xlu1 %1433 }
0x14c8   :  { %v1436_v15 = vmul.f32 %v3697_v13, %v1434_v14 }
0x14ca   :  { %1438 = vrot.lane.b32.xlu1 %v1436_v15, %s4100_s24 }
0x153c   :  { %v1439_v18 = vpop.permute.xlu1 %1438 }
0x153d   :  { %v1441_v19 = vadd.f32 %v1439_v18, %v1431_v17 }
0x153f   :  { %3698 = vtanh.f32 %v1441_v19 }
0x154c   :  { %v3699_v20 = vpop.eup %3698 }
0x154d   :  { %1444 = vrot.lane.b32.xlu0 %v3699_v20, %s4085_s1 }
0x15bf   :  { %v1445_v21 = vpop.permute.xlu0 %1444 }
0x15c0   :  { %v1447_v22 = vmul.f32 %v3697_v13, %v1445_v21 }
0x15c2   :  { %v1448_v23 = vpack.c.bf16 %v1447_v22, %v1447_v22 }
0x15c4   :  { %1450 = vrot.lane.b32.xlu1 %v1448_v23, %s4100_s24 }
0x1636   :  { %v4461_v24 = vpop.permute.xlu1 %1450 }
0x1637   :  { %3433 = vmatmul.mubr.msk.bf16.vlgmr.msra.gmra.mxu0 %vm345_vm2, %v4461_v24 }
0x1638   :  { %3445 = vmatpush3.bf16.msra.mxu0 %v4427_v50  ;;  %3448 = vmatprep.mubr.msk.bf16.mxu0 %vm4099_vm0, %v4098_v1 }
0x1639   :  { %3446 = vmatprep.subr.bf16.mxu0 %v4098_v1 }
0x163c   :  { %3447 = vmatpush3.bf16.msra.mxu0 %v4432_v54 }
0x163d   :  { %3460 = vmatprep.subr.bf16.mxu0 %v4098_v1 }
0x16f7   :  { %v1550_v26 = vpop.f32.mrf.mxu0 }
0x16f8   :  { %v1556_v28 = vadd.f32 %v1550_v26, %v1515_v25 }
0x16f9   :  { %v3434_v29 = vpop.f32.mrf.mxu0 }
0x16fa   :  { %3700 = vtanh.f32 %v1556_v28  ;;  %v3122_v35 = vmul.f32 -1.442695, %v1556_v28 }
0x16fb   :  { %v1553_v32 = vpop.f32.mrf.mxu0 }
0x16fc   :  { %3702 = vpow2.f32 %v3122_v35 }
0x16fd   :  { %v3435_v33 = vpop.f32.mrf.mxu0 }
0x16fe   :  { %v1860_v33 = vld [vmem:[#allocation3 + $0x8] sm:$0x3] }
0x1707   :  { %v3701_v34 = vpop.eup %3700 }
0x1708   :  { %1566 = vrot.lane.b32.xlu0 %v3701_v34, %s4085_s1 }
0x1709   :  { %v3703_v36 = vpop.eup %3702 }
0x170a   :  { %v1560_v37 = vadd.f32 1.0, %v3703_v36 }
0x170c   :  { %3704 = vrcp.f32 %v1560_v37 }
0x1719   :  { %v3705_v38 = vpop.eup %3704 }
0x171a   :  { %v1564_v42 = vmul.f32 %v3705_v38, %v1441_v19 }
0x177a   :  { %v1567_v39 = vpop.permute.xlu0 %1566 }
0x177b   :  { %v1569_v41 = vmul.f32 %v3705_v38, %v1567_v39 }
0x177d   :  { %1571 = vrot.lane.b32.xlu1 %v1569_v41, %s4100_s24 }
0x17ef   :  { %v1572_v43 = vpop.permute.xlu1 %1571 }
0x17f0   :  { %v1574_v44 = vadd.f32 %v1572_v43, %v1564_v42 }
0x17f2   :  { %3706 = vtanh.f32 %v1574_v44 }
0x17ff   :  { %v3707_v45 = vpop.eup %3706 }
0x1800   :  { %1577 = vrot.lane.b32.xlu0 %v3707_v45, %s4085_s1 }
0x1872   :  { %v1578_v46 = vpop.permute.xlu0 %1577 }
0x1873   :  { %v1580_v47 = vmul.f32 %v3705_v38, %v1578_v46 }
0x1875   :  { %v1581_v48 = vpack.c.bf16 %v1580_v47, %v1580_v47 }
0x1877   :  { %1583 = vrot.lane.b32.xlu1 %v1581_v48, %s4100_s24 }
0x18e9   :  { %v4475_v49 = vpop.permute.xlu1 %1583 }
0x18ea   :  { %3449 = vmatmul.mubr.msk.bf16.vlgmr.msra.gmra.mxu0 %vm345_vm2, %v4475_v49 }
0x18eb   :  { %3461 = vmatpush3.bf16.msra.mxu0 %v4427_v50  ;;  %3464 = vmatprep.mubr.msk.bf16.mxu0 %vm4099_vm0, %v4098_v1 }
0x18ec   :  { %3462 = vmatprep.subr.bf16.mxu0 %v4098_v1 }
0x18ef   :  { %3463 = vmatpush3.bf16.msra.mxu0 %v4432_v54 }
0x18f0   :  { %3476 = vmatprep.subr.bf16.mxu0 %v4098_v1 }
0x19aa   :  { %v1665_v52 = vpop.f32.mrf.mxu0 }
0x19ab   :  { %v1671_v53 = vadd.f32 %v1665_v52, %v1630_v51 }
0x19ac   :  { %v3450_v55 = vpop.f32.mrf.mxu0 }
0x19ad   :  { %3708 = vtanh.f32 %v1671_v53  ;;  %v3125_v57 = vmul.f32 -1.442695, %v1671_v53 }
0x19ae   :  { %v1668_v56 = vpop.f32.mrf.mxu0 }
0x19af   :  { %3710 = vpow2.f32 %v3125_v57 }
0x19b0   :  { %v3451_v30 = vpop.f32.mrf.mxu0 }
0x19ba   :  { %v3709_v31 = vpop.eup %3708 }
0x19bb   :  { %1681 = vrot.lane.b32.xlu0 %v3709_v31, %s4085_s1  ;;  %v1975_v31 = vld [vmem:[#allocation3 + $0xa] sm:$0x3] }
0x19bc   :  { %v3711_v58 = vpop.eup %3710 }
0x19bd   :  { %v1675_v60 = vadd.f32 1.0, %v3711_v58 }
0x19bf   :  { %3712 = vrcp.f32 %v1675_v60 }
0x19cc   :  { %v3713_v61 = vpop.eup %3712 }
0x19cd   :  { %v1679_v3 = vmul.f32 %v3713_v61, %v1574_v44 }
0x1a2d   :  { %v1682_v62 = vpop.permute.xlu0 %1681 }
0x1a2e   :  { %v1684_v63 = vmul.f32 %v3713_v61, %v1682_v62 }
0x1a30   :  { %1686 = vrot.lane.b32.xlu1 %v1684_v63, %s4100_s24 }
0x1aa2   :  { %v1687_v4 = vpop.permute.xlu1 %1686 }
0x1aa3   :  { %v1689_v5 = vadd.f32 %v1687_v4, %v1679_v3 }
0x1aa5   :  { %3714 = vtanh.f32 %v1689_v5 }
0x1ab2   :  { %v3715_v0 = vpop.eup %3714 }
0x1ab3   :  { %1692 = vrot.lane.b32.xlu0 %v3715_v0, %s4085_s1 }
0x1b25   :  { %v1693_v6 = vpop.permute.xlu0 %1692 }
0x1b26   :  { %v1695_v7 = vmul.f32 %v3713_v61, %v1693_v6 }
0x1b28   :  { %v1696_v8 = vpack.c.bf16 %v1695_v7, %v1695_v7 }
0x1b2a   :  { %1698 = vrot.lane.b32.xlu1 %v1696_v8, %s4100_s24 }
0x1b9c   :  { %v4489_v9 = vpop.permute.xlu1 %1698 }
0x1b9d   :  { %3465 = vmatmul.mubr.msk.bf16.vlgmr.msra.gmra.mxu0 %vm345_vm2, %v4489_v9 }
0x1b9e   :  { %3477 = vmatpush3.bf16.msra.mxu0 %v4427_v50  ;;  %3480 = vmatprep.mubr.msk.bf16.mxu0 %vm4099_vm0, %v4098_v1 }
0x1b9f   :  { %3478 = vmatprep.subr.bf16.mxu0 %v4098_v1 }
0x1ba2   :  { %3479 = vmatpush3.bf16.msra.mxu0 %v4432_v54 }
0x1ba3   :  { %3492 = vmatprep.subr.bf16.mxu0 %v4098_v1 }
0x1c5d   :  { %v1780_v2 = vpop.f32.mrf.mxu0 }
0x1c5e   :  { %v1786_v11 = vadd.f32 %v1780_v2, %v1745_v10  ;;  %v1181_v10 = vld [vmem:[#allocation2 + $0xe] sm:$0x3] }
0x1c5f   :  { %v3466_v40 = vpop.f32.mrf.mxu0 }
0x1c60   :  { %3716 = vtanh.f32 %v1786_v11  ;;  %v3128_v15 = vmul.f32 -1.442695, %v1786_v11  ;;  %v1222_v40 = vadd.f32 %v4454_v59, %v1181_v10 }
0x1c61   :  { %v1783_v12 = vpop.f32.mrf.mxu0 }
0x1c62   :  { %3718 = vpow2.f32 %v3128_v15 }
0x1c63   :  { %v3467_v13 = vpop.f32.mrf.mxu0 }
0x1c6d   :  { %v3717_v14 = vpop.eup %3716 }
0x1c6e   :  { %1796 = vrot.lane.b32.xlu0 %v3717_v14, %s4085_s1  ;;  %v3105_v14 = vmul.f32 -1.442695, %v1222_v40 }
0x1c6f   :  { %v3719_v16 = vpop.eup %3718 }
0x1c70   :  { %v1790_v17 = vadd.f32 1.0, %v3719_v16 }
0x1c72   :  { %3720 = vrcp.f32 %v1790_v17 }
0x1c7f   :  { %v3721_v18 = vpop.eup %3720 }
0x1c80   :  { %v1794_v21 = vmul.f32 %v3721_v18, %v1689_v5 }
0x1ce0   :  { %v1797_v19 = vpop.permute.xlu0 %1796 }
0x1ce1   :  { %v1799_v20 = vmul.f32 %v3721_v18, %v1797_v19 }
0x1ce3   :  { %1801 = vrot.lane.b32.xlu1 %v1799_v20, %s4100_s24 }
0x1d55   :  { %v1802_v22 = vpop.permute.xlu1 %1801 }
0x1d56   :  { %v1804_v23 = vadd.f32 %v1802_v22, %v1794_v21 }
0x1d58   :  { %3722 = vtanh.f32 %v1804_v23 }
0x1d65   :  { %v3723_v25 = vpop.eup %3722 }
0x1d66   :  { %1807 = vrot.lane.b32.xlu0 %v3723_v25, %s4085_s1 }
0x1dd8   :  { %v1808_v26 = vpop.permute.xlu0 %1807 }
0x1dd9   :  { %v1810_v28 = vmul.f32 %v3721_v18, %v1808_v26 }
0x1ddb   :  { %v1811_v29 = vpack.c.bf16 %v1810_v28, %v1810_v28 }
0x1ddd   :  { %1813 = vrot.lane.b32.xlu1 %v1811_v29, %s4100_s24 }
0x1e4f   :  { %v4503_v32 = vpop.permute.xlu1 %1813 }
0x1e50   :  { %3481 = vmatmul.mubr.msk.bf16.vlgmr.msra.gmra.mxu0 %vm345_vm2, %v4503_v32 }
0x1e51   :  { %3493 = vmatpush3.bf16.msra.mxu0 %v4427_v50  ;;  %3496 = vmatprep.mubr.msk.bf16.mxu0 %vm4099_vm0, %v4098_v1 }
0x1e52   :  { %3494 = vmatprep.subr.bf16.mxu0 %v4098_v1 }
0x1e55   :  { %3495 = vmatpush3.bf16.msra.mxu0 %v4432_v54 }
0x1e56   :  { %3508 = vmatprep.subr.bf16.mxu0 %v4098_v1 }
0x1f10   :  { %v1895_v34 = vpop.f32.mrf.mxu0 }
0x1f11   :  { %v1901_v35 = vadd.f32 %v1895_v34, %v1860_v33  ;;  %v2090_v33 = vld [vmem:[#allocation3 + $0xc] sm:$0x3] }
0x1f12   :  { %v3482_v36 = vpop.f32.mrf.mxu0 }
0x1f13   :  { %3724 = vtanh.f32 %v1901_v35  ;;  %v3131_v41 = vmul.f32 -1.442695, %v1901_v35 }
0x1f14   :  { %v1898_v37 = vpop.f32.mrf.mxu0 }
0x1f15   :  { %3726 = vpow2.f32 %v3131_v41 }
0x1f16   :  { %v3483_v38 = vpop.f32.mrf.mxu0 }
0x1f20   :  { %v3725_v39 = vpop.eup %3724 }
0x1f21   :  { %1911 = vrot.lane.b32.xlu0 %v3725_v39, %s4085_s1  ;;  %v4558_v39 = vld [vmem:[#allocation12 + $0x18] sm:$0xff]  }
0x1f22   :  { %v3727_v42 = vpop.eup %3726 }
0x1f23   :  { %v1905_v43 = vadd.f32 1.0, %v3727_v42  ;;  %v4562_v42 = vld [vmem:[#allocation12 + $0x10] sm:$0xff]  }
0x1f25   :  { %3728 = vrcp.f32 %v1905_v43 }
0x1f32   :  { %v3729_v44 = vpop.eup %3728 }
0x1f33   :  { %v1909_v47 = vmul.f32 %v3729_v44, %v1804_v23 }
0x1f93   :  { %v1912_v45 = vpop.permute.xlu0 %1911 }
0x1f94   :  { %v1914_v46 = vmul.f32 %v3729_v44, %v1912_v45 }
0x1f96   :  { %1916 = vrot.lane.b32.xlu1 %v1914_v46, %s4100_s24 }
0x2008   :  { %v1917_v48 = vpop.permute.xlu1 %1916 }
0x2009   :  { %v1919_v51 = vadd.f32 %v1917_v48, %v1909_v47 }
0x200b   :  { %3730 = vtanh.f32 %v1919_v51 }
0x2018   :  { %v3731_v52 = vpop.eup %3730 }
0x2019   :  { %1922 = vrot.lane.b32.xlu0 %v3731_v52, %s4085_s1 }
0x208b   :  { %v1923_v53 = vpop.permute.xlu0 %1922 }
0x208c   :  { %v1925_v55 = vmul.f32 %v3729_v44, %v1923_v53 }
0x208e   :  { %v1926_v56 = vpack.c.bf16 %v1925_v55, %v1925_v55 }
0x2090   :  { %1928 = vrot.lane.b32.xlu1 %v1926_v56, %s4100_s24 }
0x2102   :  { %v4517_v30 = vpop.permute.xlu1 %1928 }
0x2103   :  { %3497 = vmatmul.mubr.msk.bf16.vlgmr.msra.gmra.mxu0 %vm345_vm2, %v4517_v30 }
0x2104   :  { %3509 = vmatpush3.bf16.msra.mxu0 %v4427_v50  ;;  %3512 = vmatprep.mubr.msk.bf16.mxu0 %vm4099_vm0, %v4098_v1 }
0x2105   :  { %3510 = vmatprep.subr.bf16.mxu0 %v4098_v1 }
0x2108   :  { %3511 = vmatpush3.bf16.msra.mxu0 %v4432_v54 }
0x2109   :  { %3524 = vmatprep.subr.bf16.mxu0 %v4098_v1 }
0x21c3   :  { %v2010_v57 = vpop.f32.mrf.mxu0 }
0x21c4   :  { %v2016_v58 = vadd.f32 %v2010_v57, %v1975_v31 }
0x21c5   :  { %v3498_v60 = vpop.f32.mrf.mxu0 }
0x21c6   :  { %3732 = vtanh.f32 %v2016_v58  ;;  %v3134_v3 = vmul.f32 -1.442695, %v2016_v58 }
0x21c7   :  { %v2013_v61 = vpop.f32.mrf.mxu0 }
0x21c8   :  { %3734 = vpow2.f32 %v3134_v3 }
0x21c9   :  { %v3499_v62 = vpop.f32.mrf.mxu0 }
0x21d3   :  { %v3733_v63 = vpop.eup %3732 }
0x21d4   :  { %2026 = vrot.lane.b32.xlu0 %v3733_v63, %s4085_s1 }
0x21d5   :  { %v3735_v4 = vpop.eup %3734 }
0x21d6   :  { %v2020_v5 = vadd.f32 1.0, %v3735_v4 }
0x21d8   :  { %3736 = vrcp.f32 %v2020_v5 }
0x21e5   :  { %v3737_v0 = vpop.eup %3736 }
0x21e6   :  { %v2024_v8 = vmul.f32 %v3737_v0, %v1919_v51  ;;  %v3828_v51 = vld [vmem:[#allocation15] ss:$0 sm:$0xff] }
0x2246   :  { %v2027_v6 = vpop.permute.xlu0 %2026 }
0x2247   :  { %v2029_v7 = vmul.f32 %v3737_v0, %v2027_v6 }
0x2249   :  { %2031 = vrot.lane.b32.xlu1 %v2029_v7, %s4100_s24 }
0x22bb   :  { %v2032_v2 = vpop.permute.xlu1 %2031 }
0x22bc   :  { %v4529_v11 = vadd.f32 %v2032_v2, %v2024_v8 }
0x22be   :  { %3738 = vtanh.f32 %v4529_v11 }
0x22bf   :  { %3740 = vtanh.f32 %v1222_v40 }
0x22c0   :  { %3742 = vpow2.f32 %v3105_v14 }
0x22cb   :  { %v3739_v12 = vpop.eup %3738 }
0x22cc   :  { %2037 = vrot.lane.b32.xlu0 %v3739_v12, %s4085_s1  ;;  %v3741_v13 = vpop.eup %3740 }
0x22cd   :  { %v3743_v15 = vpop.eup %3742 }
0x22ce   :  { %v1226_v16 = vadd.f32 1.0, %v3743_v15 }
0x22d0   :  { %1232 = vrot.lane.b32.xlu0 %v3741_v13, %s4085_s1  ;;  %3744 = vrcp.f32 %v1226_v16 }
0x22dd   :  { %v3745_v20 = vpop.eup %3744 }
0x22de   :  { %v1230_v23 = vmul.f32 %v3745_v20, %v4404_v27 }
0x233e   :  { %v2038_v17 = vpop.permute.xlu0 %2037 }
0x233f   :  { %v2040_v18 = vmul.f32 %v3737_v0, %v2038_v17 }
0x2341   :  { %v2041_v19 = vpack.c.bf16 %v2040_v18, %v2040_v18 }
0x2342   :  { %v1233_v21 = vpop.permute.xlu0 %1232 }
0x2343   :  { %v1235_v59 = vmul.f32 %v3745_v20, %v1233_v21  ;;  %2043 = vrot.lane.b32.xlu1 %v2041_v19, %s4100_s24 }
0x2345   :  { %1237 = vrot.lane.b32.xlu0 %v1235_v59, %s4100_s24 }
0x23b5   :  { %v4537_v22 = vpop.permute.xlu1 %2043 }
0x23b6   :  { %3513 = vmatmul.mubr.msk.bf16.vlgmr.msra.gmra.mxu0 %vm345_vm2, %v4537_v22 }
0x23b7   :  { %v1238_v25 = vpop.permute.xlu0 %1237  ;;  %3525 = vmatpush3.bf16.msra.mxu0 %v4427_v50  ;;  %3528 = vmatprep.mubr.msk.bf16.mxu0 %vm4099_vm0, %v4098_v1 }
0x23b8   :  { %v4545_v26 = vadd.f32 %v1238_v25, %v1230_v23  ;;  %3526 = vmatprep.subr.bf16.mxu0 %v4098_v1 }
0x23ba   :  { %3746 = vtanh.f32 %v4545_v26 }
0x23bb   :  { %3527 = vmatpush3.bf16.msra.mxu0 %v4432_v54 }
0x23bc   :  { %3540 = vmatprep.subr.bf16.mxu0 %v4098_v1 }
0x23c7   :  { %v3747_v28 = vpop.eup %3746 }
0x23c8   :  { %1243 = vrot.lane.b32.xlu0 %v3747_v28, %s4085_s1 }
0x243a   :  { %v1244_v27 = vpop.permute.xlu0 %1243 }
0x243b   :  { %v4552_v29 = vmul.f32 %v3745_v20, %v1244_v27 }
0x243d   :  { %v1247_v50 = vpack.c.bf16 %v4552_v29, %v4552_v29 }
0x243f   :  { %1249 = vrot.lane.b32.xlu0 %v1247_v50, %s4100_s24  ;;  %v2336_v50 = vld [vmem:[%s4421_s22] sm:$0x7] }
0x2476   :  { %v2125_v34 = vpop.f32.mrf.mxu0 }
0x2477   :  { %v2131_v35 = vadd.f32 %v2125_v34, %v2090_v33  ;;  %v2339_v33 = vld [vmem:[%s4424_s23] sm:$0x7] }
0x2478   :  { %v3514_v36 = vpop.f32.mrf.mxu0  ;;  %v2340_v34 = vadd.f32 %v2339_v33, %v2336_v50 }
0x2479   :  { %3748 = vtanh.f32 %v2131_v35 }
0x247a   :  { %v2128_v37 = vpop.f32.mrf.mxu0 }
0x247b   :  { %v2347_v37 = vrot.slane %v2340_v34, 1 }
0x247c   :  { %v3515_v54 = vpop.f32.mrf.mxu0 }
0x247d   :  { %v4639_v54 = vld [vmem:[#allocation14 + $0x20] sm:$0xff]  }
0x2486   :  { %v3749_v38 = vpop.eup %3748 }
0x2487   :  { %2141 = vrot.lane.b32.xlu1 %v3749_v38, %s4085_s1  ;;  %v2357_v38 = vpack.c.bf16 %v2347_v37, %v2347_v37 }
0x24b1   :  { %v1250_v41 = vpop.permute.xlu0 %1249 }
0x24b2   :  { %3409 = vmatmul.mubr.msk.bf16.vlgmr.msra.gmra.mxu1 %vm345_vm2, %v1250_v41 }
0x24b3   :  { %3421 = vmatpush3.bf16.msra.mxu1 %v4558_v39  ;;  %3424 = vmatprep.mubr.msk.bf16.mxu1 %vm4099_vm0, %v4098_v1 }
0x24b4   :  { %3422 = vmatprep.subr.bf16.mxu1 %v4098_v1 }
0x24b7   :  { %3423 = vmatpush3.bf16.msra.mxu1 %v4562_v42 }
0x24b8   :  { %3436 = vmatprep.subr.bf16.mxu1 %v4098_v1 }
0x24ba   :  { %3425 = vmatmul.mubr.msk.bf16.vlgmr.msra.gmra.mxu1 %vm345_vm2, %v4461_v24  ;;  %v3137_v24 = vmul.f32 -1.442695, %v2131_v35  ;;  %v4634_v35 = vld [vmem:[#allocation14 + $0x28] sm:$0xff]  }
0x24bb   :  { %3437 = vmatpush3.bf16.msra.mxu1 %v4558_v39  ;;  %3440 = vmatprep.mubr.msk.bf16.mxu1 %vm4099_vm0, %v4098_v1 }
0x24bc   :  { %3438 = vmatprep.subr.bf16.mxu1 %v4098_v1  ;;  %3750 = vpow2.f32 %v3137_v24 }
0x24bf   :  { %3439 = vmatpush3.bf16.msra.mxu1 %v4562_v42 }
0x24c0   :  { %3452 = vmatprep.subr.bf16.mxu1 %v4098_v1 }
0x24c2   :  { %3441 = vmatmul.mubr.msk.bf16.vlgmr.msra.gmra.mxu1 %vm345_vm2, %v4475_v49 }
0x24c3   :  { %3453 = vmatpush3.bf16.msra.mxu1 %v4558_v39  ;;  %3456 = vmatprep.mubr.msk.bf16.mxu1 %vm4099_vm0, %v4098_v1 }
0x24c4   :  { %3454 = vmatprep.subr.bf16.mxu1 %v4098_v1 }
0x24c7   :  { %3455 = vmatpush3.bf16.msra.mxu1 %v4562_v42 }
0x24c8   :  { %3468 = vmatprep.subr.bf16.mxu1 %v4098_v1 }
0x24c9   :  { %v3751_v49 = vpop.eup %3750 }
0x24ca   :  { %3457 = vmatmul.mubr.msk.bf16.vlgmr.msra.gmra.mxu1 %vm345_vm2, %v4489_v9  ;;  %v2135_v9 = vadd.f32 1.0, %v3751_v49 }
0x24cb   :  { %3469 = vmatpush3.bf16.msra.mxu1 %v4558_v39  ;;  %3472 = vmatprep.mubr.msk.bf16.mxu1 %vm4099_vm0, %v4098_v1 }
0x24cc   :  { %3470 = vmatprep.subr.bf16.mxu1 %v4098_v1  ;;  %3752 = vrcp.f32 %v2135_v9 }
0x24cf   :  { %3471 = vmatpush3.bf16.msra.mxu1 %v4562_v42 }
0x24d0   :  { %3484 = vmatprep.subr.bf16.mxu1 %v4098_v1 }
0x24d2   :  { %3473 = vmatmul.mubr.msk.bf16.vlgmr.msra.gmra.mxu1 %vm345_vm2, %v4503_v32 }
0x24d3   :  { %3485 = vmatpush3.bf16.msra.mxu1 %v4558_v39  ;;  %3488 = vmatprep.mubr.msk.bf16.mxu1 %vm4099_vm0, %v4098_v1 }
0x24d4   :  { %3486 = vmatprep.subr.bf16.mxu1 %v4098_v1 }
0x24d7   :  { %3487 = vmatpush3.bf16.msra.mxu1 %v4562_v42 }
0x24d8   :  { %3500 = vmatprep.subr.bf16.mxu1 %v4098_v1 }
0x24d9   :  { %v3753_v32 = vpop.eup %3752 }
0x24da   :  { %3489 = vmatmul.mubr.msk.bf16.vlgmr.msra.gmra.mxu1 %vm345_vm2, %v4517_v30  ;;  %v2139_v45 = vmul.f32 %v3753_v32, %v4529_v11  ;;  %v4622_v30 = vld [vmem:[#allocation15 + $0x1] ss:$0 sm:$0xff] }
0x24db   :  { %3501 = vmatpush3.bf16.msra.mxu1 %v4558_v39  ;;  %3504 = vmatprep.mubr.msk.bf16.mxu1 %vm4099_vm0, %v4098_v1 }
0x24dc   :  { %3502 = vmatprep.subr.bf16.mxu1 %v4098_v1 }
0x24df   :  { %3503 = vmatpush3.bf16.msra.mxu1 %v4562_v42 }
0x24e0   :  { %3516 = vmatprep.subr.bf16.mxu1 %v4098_v1 }
0x24e2   :  { %3505 = vmatmul.mubr.msk.bf16.vlgmr.msra.gmra.mxu1 %vm345_vm2, %v4537_v22 }
0x24e3   :  { %3517 = vmatpush3.bf16.msra.mxu1 %v4558_v39  ;;  %3520 = vmatprep.mubr.msk.bf16.mxu1 %vm4099_vm0, %v4098_v1 }
0x24e4   :  { %3518 = vmatprep.subr.bf16.mxu1 %v4098_v1 }
0x24e7   :  { %3519 = vmatpush3.bf16.msra.mxu1 %v4562_v42 }
0x24e8   :  { %3532 = vmatprep.subr.bf16.mxu1 %v4098_v1 }
0x24f9   :  { %v2142_v43 = vpop.permute.xlu1 %2141 }
0x24fa   :  { %v2144_v44 = vmul.f32 %v3753_v32, %v2142_v43 }
0x24fc   :  { %2146 = vrot.lane.b32.xlu1 %v2144_v44, %s4100_s24 }
0x256e   :  { %v2147_v46 = vpop.permute.xlu1 %2146 }
0x256f   :  { %v4619_v47 = vadd.f32 %v2147_v46, %v2139_v45 }
0x2571   :  { %3754 = vtanh.f32 %v4619_v47 }
0x2572   :  { %v1288_v48 = vpop.f32.mrf.mxu1 }
0x2573   :  { %v1294_v52 = vadd.f32 %v3828_v51, %v1288_v48 }
0x2574   :  { %v3410_v53 = vpop.f32.mrf.mxu1 }
0x2575   :  { %1296 = vst [vmem:[#allocation3 + $0xe] sm:$0x3] %v1294_v52 }
0x2576   :  { %v1291_v55 = vpop.f32.mrf.mxu1 }
0x2578   :  { %v3411_v56 = vpop.f32.mrf.mxu1 }
0x257a   :  { %v1501_v31 = vpop.f32.mrf.mxu1 }
0x257b   :  { %v1513_v57 = vadd.f32 %v4622_v30, %v1501_v31 }
0x257c   :  { %v3426_v58 = vpop.f32.mrf.mxu1  ;;  %v2205_v41 = vld [vmem:[#allocation3 + $0xe] sm:$0x3] }
0x257d   :  { %1514 = vst [vmem:[#allocation2] sm:$0x3] %v1513_v57  ;;  %v2342_v57 = vld [vmem:[%s4410_s19] sm:$0x7] }
0x257e   :  { %v3755_v60 = vpop.eup %3754  ;;  %v1504_v61 = vpop.f32.mrf.mxu1  ;;  %v2344_v58 = vld [vmem:[%s4413_s20] sm:$0x7] }
0x257f   :  { %2152 = vrot.lane.b32.xlu1 %v3755_v60, %s4085_s1  ;;  %v2345_v60 = vadd.f32 %v2344_v58, %v2342_v57 }
0x2580   :  { %v3427_v62 = vpop.f32.mrf.mxu1 }
0x2581   :  { %v2350_v62 = vrot.slane %v2345_v60, 1 }
0x2582   :  { %v1622_v63 = vpop.f32.mrf.mxu1 }
0x2583   :  { %v1628_v3 = vadd.f32 %v4622_v30, %v1622_v63 }
0x2584   :  { %v3442_v4 = vpop.f32.mrf.mxu1  ;;  %v2358_v48 = vld [vmem:[#allocation2] sm:$0x3] }
0x2585   :  { %1629 = vst [vmem:[#allocation2 + $0x2] sm:$0x3] %v1628_v3 }
0x2586   :  { %v1625_v5 = vpop.f32.mrf.mxu1 }
0x2588   :  { %v3443_v0 = vpop.f32.mrf.mxu1 }
0x258a   :  { %v1737_v6 = vpop.f32.mrf.mxu1 }
0x258b   :  { %v1743_v7 = vadd.f32 %v4622_v30, %v1737_v6 }
0x258c   :  { %v3458_v8 = vpop.f32.mrf.mxu1 }
0x258d   :  { %1744 = vst [vmem:[#allocation2 + $0x4] sm:$0x3] %v1743_v7 }
0x258e   :  { %v1740_v10 = vpop.f32.mrf.mxu1 }
0x2590   :  { %v3459_v2 = vpop.f32.mrf.mxu1 }
0x2592   :  { %v1852_v11 = vpop.f32.mrf.mxu1 }
0x2593   :  { %v1858_v40 = vadd.f32 %v4622_v30, %v1852_v11 }
0x2594   :  { %v3474_v12 = vpop.f32.mrf.mxu1  ;;  %v2517_v58 = vld [vmem:[#allocation2 + $0x4] sm:$0x3] }
0x2595   :  { %1859 = vst [vmem:[#allocation2 + $0x6] sm:$0x3] %v1858_v40 }
0x2596   :  { %v1855_v13 = vpop.f32.mrf.mxu1 }
0x2598   :  { %v3475_v14 = vpop.f32.mrf.mxu1 }
0x259a   :  { %v1967_v15 = vpop.f32.mrf.mxu1 }
0x259b   :  { %v1973_v16 = vadd.f32 %v4622_v30, %v1967_v15 }
0x259c   :  { %v3490_v17 = vpop.f32.mrf.mxu1 }
0x259d   :  { %1974 = vst [vmem:[#allocation2 + $0x8] sm:$0x3] %v1973_v16 }
0x259e   :  { %v1970_v18 = vpop.f32.mrf.mxu1 }
0x25a0   :  { %v3491_v19 = vpop.f32.mrf.mxu1 }
0x25a2   :  { %v2082_v20 = vpop.f32.mrf.mxu1 }
0x25a3   :  { %v2088_v21 = vadd.f32 %v4622_v30, %v2082_v20 }
0x25a4   :  { %v3506_v59 = vpop.f32.mrf.mxu1 }
0x25a5   :  { %2089 = vst [vmem:[#allocation2 + $0xa] sm:$0x3] %v2088_v21 }
0x25a6   :  { %v2085_v22 = vpop.f32.mrf.mxu1 }
0x25a8   :  { %v3507_v23 = vpop.f32.mrf.mxu1 }
0x25f1   :  { %v2153_v25 = vpop.permute.xlu1 %2152 }
0x25f2   :  { %v2155_v28 = vmul.f32 %v3753_v32, %v2153_v25 }
0x25f4   :  { %v2156_v27 = vpack.c.bf16 %v2155_v28, %v2155_v28 }
0x25f6   :  { %2158 = vrot.lane.b32.xlu1 %v2156_v27, %s4100_s24 }
0x2668   :  { %v2159_v36 = vpop.permute.xlu1 %2158 }
0x2669   :  { %3521 = vmatmul.mubr.msk.bf16.vlgmr.msra.gmra.mxu1 %vm345_vm2, %v2159_v36  ;;  %3529 = vmatmul.mubr.msk.bf16.vlgmr.msra.gmra.mxu0 %vm345_vm2, %v2159_v36 }
0x266a   :  { %3541 = vmatpush3.bf16.msra.mxu0 %v4634_v35  ;;  %3544 = vmatprep.mubr.msk.bf16.mxu0 %vm4099_vm0, %v4098_v1 }
0x266b   :  { %3542 = vmatprep.subr.bf16.mxu0 %v4098_v1  ;;  %3533 = vmatpush3.bf16.msra.mxu1 %v4558_v39 }
0x266c   :  { %3534 = vmatprep.subr.bf16.mxu1 %v4098_v1  ;;  %3536 = vmatprep.mubr.msk.bf16.mxu1 %vm4099_vm0, %v4098_v1 }
0x266e   :  { %3543 = vmatpush3.bf16.msra.mxu0 %v4639_v54 }
0x266f   :  { %3535 = vmatpush3.bf16.msra.mxu1 %v4562_v42  ;;  %3556 = vmatprep.subr.bf16.mxu0 %v4098_v1 }
0x2670   :  { %3548 = vmatprep.subr.bf16.mxu1 %v4098_v1 }
0x2671   :  { %3545 = vmatmul.mubr.msk.bf16.vlgmr.msra.gmra.mxu0 %vm345_vm2, %v2357_v38  ;;  %v2444_v38 = vld [vmem:[#allocation2 + $0x2] sm:$0x3] }
0x2672   :  { %3557 = vmatpush3.bf16.msra.mxu0 %v4634_v35  ;;  %3560 = vmatprep.mubr.msk.bf16.mxu0 %vm4099_vm0, %v4098_v1 }
0x2673   :  { %3558 = vmatprep.subr.bf16.mxu0 %v4098_v1 }
0x2676   :  { %3559 = vmatpush3.bf16.msra.mxu0 %v4639_v54 }
0x2677   :  { %3572 = vmatprep.subr.bf16.mxu0 %v4098_v1 }
0x2729   :  { %v2197_v39 = vpop.f32.mrf.mxu1  ;;  %v2240_v42 = vpop.f32.mrf.mxu0 }
0x272a   :  { %v2203_v24 = vadd.f32 %v4622_v30, %v2197_v39  ;;  %v2246_v49 = vadd.f32 %v2240_v42, %v2205_v41 }
0x272b   :  { %v3522_v9 = vpop.f32.mrf.mxu1  ;;  %v3530_v32 = vpop.f32.mrf.mxu0 }
0x272c   :  { %2204 = vst [vmem:[#allocation2 + $0xc] sm:$0x3] %v2203_v24  ;;  %3756 = vtanh.f32 %v2246_v49  ;;  %v3140_v63 = vmul.f32 -1.442695, %v2246_v49 }
0x272d   :  { %v2200_v43 = vpop.f32.mrf.mxu1  ;;  %v2243_v44 = vpop.f32.mrf.mxu0 }
0x272f   :  { %v3523_v45 = vpop.f32.mrf.mxu1  ;;  %v3531_v46 = vpop.f32.mrf.mxu0 }
0x2731   :  { %v2408_v51 = vpop.f32.mrf.mxu0 }
0x2732   :  { %v2414_v52 = vadd.f32 %v2408_v51, %v2358_v48 }
0x2733   :  { %v3546_v53 = vpop.f32.mrf.mxu0 }
0x2734   :  { %3758 = vtanh.f32 %v2414_v52  ;;  %v3149_v3 = vmul.f32 -1.442695, %v2414_v52 }
0x2735   :  { %v2411_v55 = vpop.f32.mrf.mxu0  ;;  %3760 = vpow2.f32 %v3140_v63 }
0x2736   :  { %3762 = vpow2.f32 %v3149_v3 }
0x2737   :  { %v3547_v56 = vpop.f32.mrf.mxu0 }
0x2739   :  { %v3757_v31 = vpop.eup %3756 }
0x273a   :  { %2256 = vrot.lane.b32.xlu0 %v3757_v31, %s4085_s1 }
0x2741   :  { %v3759_v61 = vpop.eup %3758 }
0x2742   :  { %2428 = vrot.lane.b32.xlu1 %v3759_v61, %s4085_s1  ;;  %v3761_v4 = vpop.eup %3760 }
0x2743   :  { %v2250_v5 = vadd.f32 1.0, %v3761_v4  ;;  %v3763_v0 = vpop.eup %3762 }
0x2744   :  { %v2418_v6 = vadd.f32 1.0, %v3763_v0 }
0x2745   :  { %3764 = vrcp.f32 %v2250_v5 }
0x2746   :  { %2423 = vrot.lane.b32.xlu1 %v2350_v62, %s4100_s24  ;;  %3766 = vrcp.f32 %v2418_v6 }
0x2752   :  { %v3765_v7 = vpop.eup %3764 }
0x2753   :  { %v3767_v2 = vpop.eup %3766  ;;  %v2254_v12 = vmul.f32 %v3765_v7, %v4619_v47 }
0x27ac   :  { %v2257_v8 = vpop.permute.xlu0 %2256 }
0x27ad   :  { %v2259_v10 = vmul.f32 %v3765_v7, %v2257_v8 }
0x27af   :  { %2261 = vrot.lane.b32.xlu0 %v2259_v10, %s4100_s24 }
0x27b4   :  { %v2429_v11 = vpop.permute.xlu1 %2428 }
0x27b5   :  { %v2431_v40 = vmul.f32 %v3767_v2, %v2429_v11 }
0x27b7   :  { %2433 = vrot.lane.b32.xlu0 %v2431_v40, %s4100_s24 }
0x27b8   :  { %v2424_v15 = vpop.permute.xlu1 %2423 }
0x27b9   :  { %v2426_v16 = vmul.f32 %v3767_v2, %v2424_v15 }
0x2821   :  { %v2262_v13 = vpop.permute.xlu0 %2261 }
0x2822   :  { %v4668_v14 = vadd.f32 %v2262_v13, %v2254_v12 }
0x2824   :  { %3768 = vtanh.f32 %v4668_v14 }
0x2829   :  { %v2434_v17 = vpop.permute.xlu0 %2433 }
0x282a   :  { %v2436_v18 = vadd.f32 %v2434_v17, %v2426_v16 }
0x282c   :  { %3770 = vtanh.f32 %v2436_v18 }
0x2831   :  { %v3769_v19 = vpop.eup %3768 }
0x2832   :  { %2267 = vrot.lane.b32.xlu1 %v3769_v19, %s4085_s1 }
0x2839   :  { %v3771_v20 = vpop.eup %3770 }
0x283a   :  { %2439 = vrot.lane.b32.xlu0 %v3771_v20, %s4085_s1 }
0x28a4   :  { %v2268_v21 = vpop.permute.xlu1 %2267 }
0x28a5   :  { %v4673_v59 = vmul.f32 %v3765_v7, %v2268_v21 }
0x28a7   :  { %v2271_v47 = vpack.c.bf16 %v4673_v59, %v4673_v59 }
0x28a9   :  { %2273 = vrot.lane.b32.xlu1 %v2271_v47, %s4100_s24 }
0x28ac   :  { %v2440_v22 = vpop.permute.xlu0 %2439 }
0x28ad   :  { %v2442_v23 = vmul.f32 %v3767_v2, %v2440_v22 }
0x28af   :  { %v2443_v25 = vpack.c.bf16 %v2442_v23, %v2442_v23 }
0x28b1   :  { %2446 = vrot.lane.b32.xlu0 %v2443_v25, %s4100_s24 }
0x291b   :  { %v2274_v28 = vpop.permute.xlu1 %2273 }
0x291c   :  { %3537 = vmatmul.mubr.msk.bf16.vlgmr.msra.gmra.mxu1 %vm345_vm2, %v2274_v28 }
0x291d   :  { %3549 = vmatpush3.bf16.msra.mxu1 %v4634_v35  ;;  %3552 = vmatprep.mubr.msk.bf16.mxu1 %vm4099_vm0, %v4098_v1 }
0x291e   :  { %3550 = vmatprep.subr.bf16.mxu1 %v4098_v1 }
0x2921   :  { %3551 = vmatpush3.bf16.msra.mxu1 %v4639_v54 }
0x2922   :  { %3564 = vmatprep.subr.bf16.mxu1 %v4098_v1 }
0x2923   :  { %v2447_v27 = vpop.permute.xlu0 %2446 }
0x2924   :  { %3553 = vmatmul.mubr.msk.bf16.vlgmr.msra.gmra.mxu1 %vm345_vm2, %v2447_v27 }
0x2925   :  { %3565 = vmatpush3.bf16.msra.mxu1 %v4634_v35  ;;  %3568 = vmatprep.mubr.msk.bf16.mxu1 %vm4099_vm0, %v4098_v1 }
0x2926   :  { %3566 = vmatprep.subr.bf16.mxu1 %v4098_v1 }
0x2929   :  { %3567 = vmatpush3.bf16.msra.mxu1 %v4639_v54 }
0x292a   :  { %3580 = vmatprep.subr.bf16.mxu1 %v4098_v1 }
0x29dc   :  { %v2312_v50 = vpop.f32.mrf.mxu1 }
0x29dd   :  { %v2318_v33 = vadd.f32 %v4622_v30, %v2312_v50 }
0x29de   :  { %v3538_v34 = vpop.f32.mrf.mxu1 }
0x29df   :  { %2319 = vst [vmem:[#allocation2 + $0xe] sm:$0x3] %v2318_v33 }
0x29e0   :  { %v2315_v36 = vpop.f32.mrf.mxu1 }
0x29e2   :  { %v3539_v37 = vpop.f32.mrf.mxu1 }
0x29e4   :  { %v2485_v39 = vpop.f32.mrf.mxu1 }
0x29e5   :  { %v2491_v41 = vadd.f32 %v2485_v39, %v2444_v38 }
0x29e6   :  { %v3554_v42 = vpop.f32.mrf.mxu1 }
0x29e7   :  { %3772 = vtanh.f32 %v2491_v41  ;;  %v3151_v32 = vmul.f32 -1.442695, %v2491_v41 }
0x29e8   :  { %v2488_v24 = vpop.f32.mrf.mxu1 }
0x29e9   :  { %3774 = vpow2.f32 %v3151_v32 }
0x29ea   :  { %v3555_v49 = vpop.f32.mrf.mxu1 }
0x29f4   :  { %v3773_v9 = vpop.eup %3772 }
0x29f5   :  { %2501 = vrot.lane.b32.xlu1 %v3773_v9, %s4085_s1  ;;  %v2663_v9 = vld [vmem:[#allocation2 + $0x8] sm:$0x3] }
0x29f6   :  { %v3775_v43 = vpop.eup %3774 }
0x29f7   :  { %v2495_v44 = vadd.f32 1.0, %v3775_v43 }
0x29f9   :  { %3776 = vrcp.f32 %v2495_v44 }
0x2a06   :  { %v3777_v30 = vpop.eup %3776 }
0x2a07   :  { %v2499_v48 = vmul.f32 %v3777_v30, %v2436_v18  ;;  %v2590_v18 = vld [vmem:[#allocation2 + $0x6] sm:$0x3] }
0x2a67   :  { %v2502_v45 = vpop.permute.xlu1 %2501 }
0x2a68   :  { %v2504_v46 = vmul.f32 %v3777_v30, %v2502_v45 }
0x2a6a   :  { %2506 = vrot.lane.b32.xlu0 %v2504_v46, %s4100_s24 }
0x2adc   :  { %v2507_v51 = vpop.permute.xlu0 %2506 }
0x2add   :  { %v2509_v52 = vadd.f32 %v2507_v51, %v2499_v48 }
0x2adf   :  { %3778 = vtanh.f32 %v2509_v52 }
0x2aec   :  { %v3779_v53 = vpop.eup %3778 }
0x2aed   :  { %2512 = vrot.lane.b32.xlu1 %v3779_v53, %s4085_s1 }
0x2b5f   :  { %v2513_v55 = vpop.permute.xlu1 %2512 }
0x2b60   :  { %v2515_v56 = vmul.f32 %v3777_v30, %v2513_v55 }
0x2b62   :  { %v2516_v31 = vpack.c.bf16 %v2515_v56, %v2515_v56 }
0x2b64   :  { %2519 = vrot.lane.b32.xlu0 %v2516_v31, %s4100_s24 }
0x2bd6   :  { %v2520_v57 = vpop.permute.xlu0 %2519 }
0x2bd7   :  { %3561 = vmatmul.mubr.msk.bf16.vlgmr.msra.gmra.mxu0 %vm345_vm2, %v2520_v57 }
0x2bd8   :  { %3573 = vmatpush3.bf16.msra.mxu0 %v4634_v35  ;;  %3576 = vmatprep.mubr.msk.bf16.mxu0 %vm4099_vm0, %v4098_v1 }
0x2bd9   :  { %3574 = vmatprep.subr.bf16.mxu0 %v4098_v1 }
0x2bdc   :  { %3575 = vmatpush3.bf16.msra.mxu0 %v4639_v54 }
0x2bdd   :  { %3588 = vmatprep.subr.bf16.mxu0 %v4098_v1 }
0x2c97   :  { %v2558_v60 = vpop.f32.mrf.mxu0 }
0x2c98   :  { %v2564_v61 = vadd.f32 %v2558_v60, %v2517_v58 }
0x2c99   :  { %v3562_v62 = vpop.f32.mrf.mxu0 }
0x2c9a   :  { %3780 = vtanh.f32 %v2564_v61  ;;  %v3153_v5 = vmul.f32 -1.442695, %v2564_v61 }
0x2c9b   :  { %v2561_v63 = vpop.f32.mrf.mxu0 }
0x2c9c   :  { %3782 = vpow2.f32 %v3153_v5 }
0x2c9d   :  { %v3563_v3 = vpop.f32.mrf.mxu0 }
0x2ca7   :  { %v3781_v4 = vpop.eup %3780 }
0x2ca8   :  { %2574 = vrot.lane.b32.xlu1 %v3781_v4, %s4085_s1  ;;  %v2736_v4 = vld [vmem:[#allocation2 + $0xa] sm:$0x3] }
0x2ca9   :  { %v3783_v0 = vpop.eup %3782 }
0x2caa   :  { %v2568_v6 = vadd.f32 1.0, %v3783_v0 }
0x2cac   :  { %3784 = vrcp.f32 %v2568_v6 }
0x2cb9   :  { %v3785_v7 = vpop.eup %3784 }
0x2cba   :  { %v2572_v2 = vmul.f32 %v3785_v7, %v2509_v52 }
0x2d1a   :  { %v2575_v8 = vpop.permute.xlu1 %2574 }
0x2d1b   :  { %v2577_v10 = vmul.f32 %v3785_v7, %v2575_v8 }
0x2d1d   :  { %2579 = vrot.lane.b32.xlu0 %v2577_v10, %s4100_s24 }
0x2d8f   :  { %v2580_v11 = vpop.permute.xlu0 %2579 }
0x2d90   :  { %v2582_v40 = vadd.f32 %v2580_v11, %v2572_v2 }
0x2d92   :  { %3786 = vtanh.f32 %v2582_v40 }
0x2d9f   :  { %v3787_v12 = vpop.eup %3786 }
0x2da0   :  { %2585 = vrot.lane.b32.xlu1 %v3787_v12, %s4085_s1 }
0x2e12   :  { %v2586_v13 = vpop.permute.xlu1 %2585 }
0x2e13   :  { %v2588_v15 = vmul.f32 %v3785_v7, %v2586_v13 }
0x2e15   :  { %v2589_v16 = vpack.c.bf16 %v2588_v15, %v2588_v15 }
0x2e17   :  { %2592 = vrot.lane.b32.xlu0 %v2589_v16, %s4100_s24 }
0x2e89   :  { %v2593_v17 = vpop.permute.xlu0 %2592 }
0x2e8a   :  { %3569 = vmatmul.mubr.msk.bf16.vlgmr.msra.gmra.mxu1 %vm345_vm2, %v2593_v17 }
0x2e8b   :  { %3581 = vmatpush3.bf16.msra.mxu1 %v4634_v35  ;;  %3584 = vmatprep.mubr.msk.bf16.mxu1 %vm4099_vm0, %v4098_v1 }
0x2e8c   :  { %3582 = vmatprep.subr.bf16.mxu1 %v4098_v1 }
0x2e8f   :  { %3583 = vmatpush3.bf16.msra.mxu1 %v4639_v54 }
0x2e90   :  { %3596 = vmatprep.subr.bf16.mxu1 %v4098_v1 }
0x2f4a   :  { %v2631_v19 = vpop.f32.mrf.mxu1 }
0x2f4b   :  { %v2637_v20 = vadd.f32 %v2631_v19, %v2590_v18 }
0x2f4c   :  { %v3570_v21 = vpop.f32.mrf.mxu1 }
0x2f4d   :  { %3788 = vtanh.f32 %v2637_v20  ;;  %v3155_v25 = vmul.f32 -1.442695, %v2637_v20  ;;  %v2809_v21 = vld [vmem:[#allocation2 + $0xc] sm:$0x3] }
0x2f4e   :  { %v2634_v47 = vpop.f32.mrf.mxu1 }
0x2f4f   :  { %3790 = vpow2.f32 %v3155_v25 }
0x2f50   :  { %v3571_v22 = vpop.f32.mrf.mxu1 }
0x2f5a   :  { %v3789_v23 = vpop.eup %3788 }
0x2f5b   :  { %2647 = vrot.lane.b32.xlu1 %v3789_v23, %s4085_s1 }
0x2f5c   :  { %v3791_v28 = vpop.eup %3790 }
0x2f5d   :  { %v2641_v27 = vadd.f32 1.0, %v3791_v28 }
0x2f5f   :  { %3792 = vrcp.f32 %v2641_v27 }
0x2f6c   :  { %v3793_v50 = vpop.eup %3792 }
0x2f6d   :  { %v2645_v36 = vmul.f32 %v3793_v50, %v2582_v40 }
0x2fcd   :  { %v2648_v33 = vpop.permute.xlu1 %2647 }
0x2fce   :  { %v2650_v34 = vmul.f32 %v3793_v50, %v2648_v33 }
0x2fd0   :  { %2652 = vrot.lane.b32.xlu0 %v2650_v34, %s4100_s24 }
0x3042   :  { %v2653_v37 = vpop.permute.xlu0 %2652 }
0x3043   :  { %v2655_v38 = vadd.f32 %v2653_v37, %v2645_v36 }
0x3045   :  { %3794 = vtanh.f32 %v2655_v38 }
0x3052   :  { %v3795_v39 = vpop.eup %3794 }
0x3053   :  { %2658 = vrot.lane.b32.xlu1 %v3795_v39, %s4085_s1 }
0x30c5   :  { %v2659_v41 = vpop.permute.xlu1 %2658 }
0x30c6   :  { %v2661_v42 = vmul.f32 %v3793_v50, %v2659_v41 }
0x30c8   :  { %v2662_v24 = vpack.c.bf16 %v2661_v42, %v2661_v42 }
0x30ca   :  { %2665 = vrot.lane.b32.xlu0 %v2662_v24, %s4100_s24 }
0x313c   :  { %v2666_v49 = vpop.permute.xlu0 %2665 }
0x313d   :  { %3577 = vmatmul.mubr.msk.bf16.vlgmr.msra.gmra.mxu0 %vm345_vm2, %v2666_v49 }
0x313e   :  { %3589 = vmatpush3.bf16.msra.mxu0 %v4634_v35  ;;  %3592 = vmatprep.mubr.msk.bf16.mxu0 %vm4099_vm0, %v4098_v1 }
0x313f   :  { %3590 = vmatprep.subr.bf16.mxu0 %v4098_v1 }
0x3142   :  { %3591 = vmatpush3.bf16.msra.mxu0 %v4639_v54 }
0x31fd   :  { %v2704_v32 = vpop.f32.mrf.mxu0 }
0x31fe   :  { %v2710_v43 = vadd.f32 %v2704_v32, %v2663_v9 }
0x31ff   :  { %v3578_v44 = vpop.f32.mrf.mxu0 }
0x3200   :  { %3796 = vtanh.f32 %v2710_v43  ;;  %v3157_v48 = vmul.f32 -1.442695, %v2710_v43  ;;  %v2882_v44 = vld [vmem:[#allocation2 + $0xe] sm:$0x3] }
0x3201   :  { %v2707_v30 = vpop.f32.mrf.mxu0 }
0x3202   :  { %3798 = vpow2.f32 %v3157_v48 }
0x3203   :  { %v3579_v45 = vpop.f32.mrf.mxu0 }
0x320d   :  { %v3797_v46 = vpop.eup %3796 }
0x320e   :  { %2720 = vrot.lane.b32.xlu1 %v3797_v46, %s4085_s1 }
0x320f   :  { %v3799_v51 = vpop.eup %3798 }
0x3210   :  { %v2714_v52 = vadd.f32 1.0, %v3799_v51 }
0x3212   :  { %3800 = vrcp.f32 %v2714_v52 }
0x321f   :  { %v3801_v53 = vpop.eup %3800 }
0x3220   :  { %v2718_v31 = vmul.f32 %v3801_v53, %v2655_v38 }
0x3280   :  { %v2721_v55 = vpop.permute.xlu1 %2720 }
0x3281   :  { %v2723_v56 = vmul.f32 %v3801_v53, %v2721_v55 }
0x3283   :  { %2725 = vrot.lane.b32.xlu0 %v2723_v56, %s4100_s24 }
0x32f5   :  { %v2726_v57 = vpop.permute.xlu0 %2725 }
0x32f6   :  { %v2728_v58 = vadd.f32 %v2726_v57, %v2718_v31 }
0x32f8   :  { %3802 = vtanh.f32 %v2728_v58 }
0x3305   :  { %v3803_v60 = vpop.eup %3802 }
0x3306   :  { %2731 = vrot.lane.b32.xlu1 %v3803_v60, %s4085_s1 }
0x3378   :  { %v2732_v61 = vpop.permute.xlu1 %2731 }
0x3379   :  { %v2734_v62 = vmul.f32 %v3801_v53, %v2732_v61 }
0x337b   :  { %v2735_v63 = vpack.c.bf16 %v2734_v62, %v2734_v62 }
0x337d   :  { %2738 = vrot.lane.b32.xlu0 %v2735_v63, %s4100_s24 }
0x33ef   :  { %v2739_v3 = vpop.permute.xlu0 %2738 }
0x33f0   :  { %3585 = vmatmul.mubr.msk.bf16.vlgmr.msra.gmra.mxu1 %vm345_vm2, %v2739_v3 }
0x33f1   :  { %3597 = vmatpush3.bf16.msra.mxu1 %v4634_v35  ;;  %3600 = vmatprep.mubr.msk.bf16.mxu1 %vm4099_vm0, %v4098_v1 }
0x33f2   :  { %3598 = vmatprep.subr.bf16.mxu1 %v4098_v1 }
0x33f5   :  { %3599 = vmatpush3.bf16.msra.mxu1 %v4639_v54 }
0x34b0   :  { %v2777_v5 = vpop.f32.mrf.mxu1 }
0x34b1   :  { %v2783_v0 = vadd.f32 %v2777_v5, %v2736_v4 }
0x34b2   :  { %v3586_v6 = vpop.f32.mrf.mxu1 }
0x34b3   :  { %3804 = vtanh.f32 %v2783_v0  ;;  %v3159_v2 = vmul.f32 -1.442695, %v2783_v0 }
0x34b4   :  { %v2780_v7 = vpop.f32.mrf.mxu1 }
0x34b5   :  { %3806 = vpow2.f32 %v3159_v2 }
0x34b6   :  { %v3587_v8 = vpop.f32.mrf.mxu1 }
0x34c0   :  { %v3805_v10 = vpop.eup %3804 }
0x34c1   :  { %2793 = vrot.lane.b32.xlu1 %v3805_v10, %s4085_s1 }
0x34c2   :  { %v3807_v35 = vpop.eup %3806 }
0x34c3   :  { %v2787_v11 = vadd.f32 1.0, %v3807_v35 }
0x34c5   :  { %3808 = vrcp.f32 %v2787_v11 }
0x34d2   :  { %v3809_v40 = vpop.eup %3808 }
0x34d3   :  { %v2791_v54 = vmul.f32 %v3809_v40, %v2728_v58 }
0x3533   :  { %v2794_v12 = vpop.permute.xlu1 %2793 }
0x3534   :  { %v2796_v1 = vmul.f32 %v3809_v40, %v2794_v12 }
0x3536   :  { %2798 = vrot.lane.b32.xlu0 %v2796_v1, %s4100_s24 }
0x35a8   :  { %v2799_v13 = vpop.permute.xlu0 %2798 }
0x35a9   :  { %v2801_v15 = vadd.f32 %v2799_v13, %v2791_v54 }
0x35ab   :  { %3810 = vtanh.f32 %v2801_v15 }
0x35b8   :  { %v3811_v16 = vpop.eup %3810 }
0x35b9   :  { %2804 = vrot.lane.b32.xlu1 %v3811_v16, %s4085_s1 }
0x362b   :  { %v2805_v17 = vpop.permute.xlu1 %2804 }
0x362c   :  { %v2807_v18 = vmul.f32 %v3809_v40, %v2805_v17 }
0x362e   :  { %v2808_v19 = vpack.c.bf16 %v2807_v18, %v2807_v18 }
0x3630   :  { %2811 = vrot.lane.b32.xlu0 %v2808_v19, %s4100_s24 }
0x36a2   :  { %v2812_v20 = vpop.permute.xlu0 %2811 }
0x36a3   :  { %3593 = vmatmul.mubr.msk.bf16.vlgmr.msra.gmra.mxu0 %vm345_vm2, %v2812_v20 }
0x3763   :  { %v2850_v47 = vpop.f32.mrf.mxu0 }
0x3764   :  { %v2856_v22 = vadd.f32 %v2850_v47, %v2809_v21 }
0x3765   :  { %v3594_v23 = vpop.f32.mrf.mxu0 }
0x3766   :  { %3812 = vtanh.f32 %v2856_v22  ;;  %v3161_v50 = vmul.f32 -1.442695, %v2856_v22 }
0x3767   :  { %v2853_v25 = vpop.f32.mrf.mxu0 }
0x3768   :  { %3814 = vpow2.f32 %v3161_v50 }
0x3769   :  { %v3595_v28 = vpop.f32.mrf.mxu0 }
0x3773   :  { %v3813_v27 = vpop.eup %3812 }
0x3774   :  { %2866 = vrot.lane.b32.xlu1 %v3813_v27, %s4085_s1 }
0x3775   :  { %v3815_v33 = vpop.eup %3814 }
0x3776   :  { %v2860_v34 = vadd.f32 1.0, %v3815_v33 }
0x3778   :  { %3816 = vrcp.f32 %v2860_v34 }
0x3785   :  { %v3817_v36 = vpop.eup %3816 }
0x3786   :  { %v2864_v39 = vmul.f32 %v3817_v36, %v2801_v15 }
0x37e6   :  { %v2867_v37 = vpop.permute.xlu1 %2866 }
0x37e7   :  { %v2869_v38 = vmul.f32 %v3817_v36, %v2867_v37 }
0x37e9   :  { %2871 = vrot.lane.b32.xlu0 %v2869_v38, %s4100_s24 }
0x385b   :  { %v2872_v41 = vpop.permute.xlu0 %2871 }
0x385c   :  { %v2874_v42 = vadd.f32 %v2872_v41, %v2864_v39 }
0x385e   :  { %3818 = vtanh.f32 %v2874_v42 }
0x386b   :  { %v3819_v24 = vpop.eup %3818 }
0x386c   :  { %2877 = vrot.lane.b32.xlu1 %v3819_v24, %s4085_s1 }
0x38de   :  { %v2878_v49 = vpop.permute.xlu1 %2877 }
0x38df   :  { %v2880_v9 = vmul.f32 %v3817_v36, %v2878_v49 }
0x38e1   :  { %v2881_v32 = vpack.c.bf16 %v2880_v9, %v2880_v9 }
0x38e3   :  { %2884 = vrot.lane.b32.xlu0 %v2881_v32, %s4100_s24 }
0x3955   :  { %v2885_v43 = vpop.permute.xlu0 %2884 }
0x3956   :  { %3601 = vmatmul.mubr.msk.bf16.vlgmr.msra.gmra.mxu1 %vm345_vm2, %v2885_v43 }
0x3a16   :  { %v2923_v30 = vpop.f32.mrf.mxu1 }
0x3a17   :  { %v2929_v45 = vadd.f32 %v2923_v30, %v2882_v44 }
0x3a18   :  { %v3602_v46 = vpop.f32.mrf.mxu1 }
0x3a19   :  { %3820 = vtanh.f32 %v2929_v45  ;;  %v3163_v53 = vmul.f32 -1.442695, %v2929_v45 }
0x3a1a   :  { %v2926_v48 = vpop.f32.mrf.mxu1 }
0x3a1b   :  { %3822 = vpow2.f32 %v3163_v53 }
0x3a1c   :  { %v3603_v51 = vpop.f32.mrf.mxu1 }
0x3a26   :  { %v3821_v52 = vpop.eup %3820 }
0x3a27   :  { %2939 = vrot.lane.b32.xlu1 %v3821_v52, %s4085_s1 }
0x3a28   :  { %v3823_v55 = vpop.eup %3822 }
0x3a29   :  { %v2933_v56 = vadd.f32 1.0, %v3823_v55 }
0x3a2b   :  { %3824 = vrcp.f32 %v2933_v56 }
0x3a38   :  { %v3825_v31 = vpop.eup %3824 }
0x3a39   :  { %v2937_v60 = vmul.f32 %v3825_v31, %v2874_v42 }
0x3a99   :  { %v2940_v57 = vpop.permute.xlu1 %2939 }
0x3a9a   :  { %v2942_v58 = vmul.f32 %v3825_v31, %v2940_v57 }
0x3a9c   :  { %2944 = vrot.lane.b32.xlu0 %v2942_v58, %s4100_s24 }
0x3aa0   :  { %1298 = vrot.lane.b32.xlu0 %v4552_v29, %s4100_s24 }
0x3aa4   :  { %2321 = vrot.lane.b32.xlu0 %v4673_v59, %s4100_s24 }
0x3b0e   :  { %v2945_v61 = vpop.permute.xlu0 %2944 }
0x3b0f   :  { %v2947_v62 = vadd.f32 %v2945_v61, %v2937_v60 }
0x3b11   :  { %3826 = vtanh.f32 %v2947_v62 }
0x3b12   :  { %v1299_v63 = vpop.permute.xlu0 %1298 }
0x3b13   :  { %1302 = vst.msk [vmem:[#allocation23] sm:$0x3] %vm1301_vm3, %v1299_v63 }
0x3b16   :  { %v2322_v3 = vpop.permute.xlu0 %2321 }
0x3b17   :  { %2325 = vst.msk [vmem:[#allocation23 + $0x2] sm:$0x3] %vm1301_vm3, %v2322_v3 }
0x3b1e   :  { %v3827_v4 = vpop.eup %3826 }
0x3b1f   :  { %2950 = vrot.lane.b32.xlu1 %v3827_v4, %s4085_s1  ;;  %s4025_s1 = scalar_lea.vmem %s2984_s14, 96 }
0x3b20   :  { %p4026_p13 = scmp.ne.s32.totalorder %s2984_s14, %s4025_s1  ;;  %p4031_p1 = scmp.lt.s32.totalorder %s4025_s1, %s4025_s1 }
0x3b22   :  { %p4032_p2 = por %p4031_p1, %p4030_p0 }
0x3b23   :  { %1304 = vrot.lane.b32.xlu1 %v4545_v26, %s4101_s30 }
0x3b24   :  { %p4033_p3 = pnand %p4032_p2, %p4026_p13 }
0x3b27   :  { %2327 = vrot.lane.b32.xlu1 %v4668_v14, %s4101_s30 }
0x3b2b   :  { %2961 = vrot.lane.b32.xlu1 %v2947_v62, %s4101_s30 }
0x3b91   :  { %v2951_v29 = vpop.permute.xlu1 %2950 }
0x3b92   :  { %v2953_v59 = vmul.f32 %v3825_v31, %v2951_v29 }
0x3b94   :  { %2955 = vrot.lane.b32.xlu0 %v2953_v59, %s4100_s24 }
0x3b95   :  { %v1305_v5 = vpop.permute.xlu1 %1304 }
0x3b96   :  { %1307 = vst.msk [vmem:[#allocation24] sm:$0x3] %vm1301_vm3, %v1305_v5 }
0x3b99   :  { %v2328_v0 = vpop.permute.xlu1 %2327 }
0x3b9a   :  { %2331 = vst.msk [vmem:[#allocation24 + $0x2] sm:$0x3] %vm1301_vm3, %v2328_v0 }
0x3b9d   :  { %v2962_v6 = vpop.permute.xlu1 %2961 }
0x3b9e   :  { %2965 = vst.msk [vmem:[#allocation24 + $0x4] sm:$0x3] %vm1301_vm3, %v2962_v6 }
0x3b9f   :  { %4036 = shalt.err (!%p4033_p3)
}
0x3ba0   :  { %s4103_s8 = smov 2   ;;  %s4104_s9 = smov [#allocation23]  }
0x3ba1   :  { %2989 = dma.vmem_to_hbm [thread:$0]  %s2984_s14, 96, %s4784_s12, [#allocation25], %s4100_s24, %s4100_s24, %s4103_s8  }
0x3ba2   :  { %s2971_s10 = sshll.u32 %s4104_s9, 4  ;;  %s2972_s10 = int_to_ptr.vmem [resolvable:$true] %s2971_s10 }
0x3ba3   :  { %s4045_s29 = scalar_lea.vmem %s2972_s10, 96  ;;  %p4050_p5 = scmp.lt.s32.totalorder %s2972_s10, %s2972_s10 }
0x3ba4   :  { %p4046_p4 = scmp.ne.s32.totalorder %s2972_s10, %s4045_s29  ;;  %p4051_p6 = scmp.lt.s32.totalorder %s4045_s29, %s4045_s29 }
0x3ba6   :  { %p4052_p7 = por %p4051_p6, %p4050_p5 }
0x3ba8   :  { %p4053_p8 = pnand %p4052_p7, %p4046_p4 }
0x3c06   :  { %v2956_v26 = vpop.permute.xlu0 %2955 }
0x3c07   :  { %2959 = vst.msk [vmem:[#allocation23 + $0x4] sm:$0x3] %vm1301_vm3, %v2956_v26 }
0x3c08   :  { %4056 = shalt.err (!%p4053_p8)
}
0x3c09   :  { %2977 = dma.vmem_to_hbm [thread:$0]  %s2972_s10, 96, %s4783_s11, [#allocation6], %s4100_s24, %s4100_s24, %s4103_s8  }
0x3c0a   :  { %4079 = dma.done.wait [#allocation6], 96  }
0x3c0b   :  { %4080 = vsyncadd [#allocation6], 4294967200 }
0x3c0c   :  { %4081 = dma.done.wait [#allocation25], 96  }
0x3c0d   :  { %4082 = vsyncadd [#allocation25], 4294967200 }
0x3c0e   :  { %2996 = vsyncpa [#allocation5], 1 }
0x3c0f   :  { %2997 = vsyncpa [#allocation13], 1 }
0x3c10   :  { %2998 = vsyncpa [#allocation16], 1 }
0x3c11   :  { %2999 = vsyncpa [#allocation19], 1 }
0x3c12   :  { %3000 = vsyncpa [#allocation22], 1 }
0x3c13   :  { %3001 = vsyncpa [#allocation6], 1 }
0x3c14   :  { %3002 = vsyncpa [#allocation25], 1 }
0x3c15   :  { %3003 = vsyncpa [#allocation7], 1 }
0x3c16   :  { %3004 = vsyncpa [#allocation9], 1 }

</bundles_post_ra>
